<compile_context>
chip_gen: v5e
topology: v5e:2x2
jax: 0.10.0
libtpu: 0.0.40
codegen_flags: <defaults>
</compile_context>

<pallas_src>
from functools import partial
import math

import jax
import jax.numpy as jnp
from jax import lax
from jax.experimental import pallas as pl
from jax.experimental.pallas import tpu as pltpu


# ----------------------------- Model config -----------------------------

CFG = dict(
    vocab_size=50,
    embedding_dim=32,
    hidden_size=64,
    num_hidden_layers=2,
    num_attention_heads=4,
    intermediate_size=256,          # 4 * hidden_size
    max_position_embeddings=32,
    type_vocab_size=2,
    train_diffusion_steps=20,
    num_labels=2,
)

_LN_EPS = 1e-12
_SQRT_2_OVER_PI = math.sqrt(2.0 / math.pi)


# ----------------------------- Pallas kernel -----------------------------

def _full_spec(shape):
    n = len(shape)
    return pl.BlockSpec(shape, lambda i, n=n: (0,) * n)


def _layernorm(x, gamma, beta, eps=_LN_EPS):
    mu = jnp.mean(x, axis=-1, keepdims=True)
    var = jnp.mean(jnp.square(x - mu), axis=-1, keepdims=True)
    return (x - mu) * lax.rsqrt(var + eps) * gamma + beta


def _gelu(x):
    # tanh-approximate GELU (EUP tanh); TODO(synk): exact erf-GELU in HF BERT.
    return 0.5 * x * (1.0 + jnp.tanh(_SQRT_2_OVER_PI * (x + 0.044715 * x * x * x)))


def _model_kernel(xe_ref, add_ref, rmask_ref, bias_ref, hmask_ref,
                  up1w_ref, up1b_ref, up2w_ref, up2b_ref,
                  eg_ref, eb_ref,
                  qkvw_ref, qkvb_ref, aow_ref, aob_ref, alng_ref, alnb_ref,
                  iw_ref, ib_ref, ow_ref, ob_ref, olng_ref, olnb_ref,
                  out_ref, *, num_layers, num_heads, head_dim):
    H = num_heads * head_dim
    scale = 1.0 / math.sqrt(head_dim)

    # ---- up_proj: Linear -> Tanh -> Linear (fused, stays in VMEM) ----
    h1 = jnp.tanh(jnp.dot(xe_ref[...].astype(jnp.bfloat16), up1w_ref[...],
                          preferred_element_type=jnp.float32) + up1b_ref[...])
    x = jnp.dot(h1.astype(jnp.bfloat16), up2w_ref[...],
                preferred_element_type=jnp.float32) + up2b_ref[...]

    # rmask zeroes the time-token rows (they were not up-projected); add_ref
    # carries position + token-type embeddings everywhere and the time
    # embedding on the time-token rows.
    x = x * rmask_ref[...] + add_ref[...]

    # ---- BertEmbeddings LayerNorm ----
    hs = _layernorm(x, eg_ref[...], eb_ref[...])                   # (M, H) f32
    bias = bias_ref[...]                                            # (M, M)

    # ---- BertEncoder ----
    for l in range(num_layers):
        # Fused QKV projection: one (M,H)x(H,3H) MXU matmul per layer.
        qkv = jnp.dot(hs.astype(jnp.bfloat16), qkvw_ref[l],
                      preferred_element_type=jnp.float32) + qkvb_ref[l]
        q = qkv[:, :H] * scale
        k = qkv[:, H:2 * H].astype(jnp.bfloat16)
        v = qkv[:, 2 * H:]

        # Multi-head attention via per-head lane masks: no reshape/transpose,
        # no k.T; cross-batch attention blocked by the additive bias.
        ctx = jnp.zeros_like(hs)
        for h in range(num_heads):
            hm = hmask_ref[h]                                       # (1, H) 0/1
            s = lax.dot_general(
                (q * hm).astype(jnp.bfloat16), k,
                (((1,), (1,)), ((), ())),                           # contract last dims
                preferred_element_type=jnp.float32) + bias
            m = jnp.max(s, axis=-1, keepdims=True)
            p = jnp.exp(s - m)
            p = p * pl.reciprocal(jnp.sum(p, axis=-1, keepdims=True), approx=True)
            ctx = ctx + jnp.dot(p.astype(jnp.bfloat16),
                                (v * hm).astype(jnp.bfloat16),
                                preferred_element_type=jnp.float32)

        attn = jnp.dot(ctx.astype(jnp.bfloat16), aow_ref[l],
                       preferred_element_type=jnp.float32) + aob_ref[l]
        hs = _layernorm(attn + hs, alng_ref[l], alnb_ref[l])

        inter = _gelu(jnp.dot(hs.astype(jnp.bfloat16), iw_ref[l],
                              preferred_element_type=jnp.float32) + ib_ref[l])
        ffn = jnp.dot(inter.astype(jnp.bfloat16), ow_ref[l],
                      preferred_element_type=jnp.float32) + ob_ref[l]
        hs = _layernorm(ffn + hs, olng_ref[l], olnb_ref[l])

    out_ref[...] = hs


def pallas_trunk(xe, add_emb, row_mask, attn_bias, head_mask, params,
                 *, num_heads, head_dim):
    """up_proj + BertEmbeddings LN + full BertEncoder in one pallas_call."""
    M, _ = xe.shape
    H = num_heads * head_dim
    enc = params["encoder"]
    num_layers = enc["qkv_w"].shape[0]
    args = (xe, add_emb, row_mask, attn_bias, head_mask,
            params["up1_w"], params["up1_b"], params["up2_w"], params["up2_b"],
            enc["emb_ln_g"], enc["emb_ln_b"],
            enc["qkv_w"], enc["qkv_b"], enc["ao_w"], enc["ao_b"],
            enc["attn_ln_g"], enc["attn_ln_b"],
            enc["i_w"], enc["i_b"], enc["o_w"], enc["o_b"],
            enc["out_ln_g"], enc["out_ln_b"])
    return pl.pallas_call(
        partial(_model_kernel, num_layers=num_layers,
                num_heads=num_heads, head_dim=head_dim),
        out_shape=jax.ShapeDtypeStruct((M, H), jnp.float32),
        grid=(1,),
        in_specs=[_full_spec(a.shape) for a in args],
        out_specs=_full_spec((M, H)),
        compiler_params=pltpu.CompilerParams(dimension_semantics=("arbitrary",)),
    )(*args)


# ----------------------------- Params -----------------------------

def init_params(key):
    cfg = CFG
    E, H, I = cfg["embedding_dim"], cfg["hidden_size"], cfg["intermediate_size"]
    nl = cfg["num_hidden_layers"]
    std = 0.02

    def nrm(k, shape, dtype=jnp.float32):
        return (std * jax.random.normal(k, shape)).astype(dtype)

    keys = iter(jax.random.split(key, 256))
    p = {
        "word_emb": nrm(next(keys), (cfg["vocab_size"], E)),
        "time_emb": nrm(next(keys), (2000 + 1, H)),
        "pos_emb": nrm(next(keys), (cfg["max_position_embeddings"], H)),
        "type_emb": nrm(next(keys), (cfg["type_vocab_size"], H)),
        # up_proj: bf16 matmul operands, f32 biases (accumulation stays f32)
        "up1_w": nrm(next(keys), (E, 4 * E), jnp.bfloat16),
        "up1_b": jnp.zeros((1, 4 * E), jnp.float32),
        "up2_w": nrm(next(keys), (4 * E, H), jnp.bfloat16),
        "up2_b": jnp.zeros((1, H), jnp.float32),
        # pooler / classification head (plain-JAX tail)
        "pool_w": nrm(next(keys), (H, H)), "pool_b": jnp.zeros((H,), jnp.float32),
        "cls1_w": nrm(next(keys), (H, H)), "cls1_b": jnp.zeros((H,), jnp.float32),
        "cls2_w": nrm(next(keys), (H, cfg["num_labels"])),
        "cls2_b": jnp.zeros((cfg["num_labels"],), jnp.float32),
    }

    # Encoder weights: stacked over layers, QKV fused into one (H, 3H) matmul,
    # matmul weights stored in bf16.
    qkv_w, ao_w, i_w, o_w = [], [], [], []
    for _ in range(nl):
        qkv_w.append(jnp.concatenate(
            [nrm(next(keys), (H, H)) for _ in range(3)], axis=1))
        ao_w.append(nrm(next(keys), (H, H)))
        i_w.append(nrm(next(keys), (H, I)))
        o_w.append(nrm(next(keys), (I, H)))
    p["encoder"] = {
        "emb_ln_g": jnp.ones((1, H), jnp.float32),
        "emb_ln_b": jnp.zeros((1, H), jnp.float32),
        "qkv_w": jnp.stack(qkv_w).astype(jnp.bfloat16),
        "qkv_b": jnp.zeros((nl, 1, 3 * H), jnp.float32),
        "ao_w": jnp.stack(ao_w).astype(jnp.bfloat16),
        "ao_b": jnp.zeros((nl, 1, H), jnp.float32),
        "attn_ln_g": jnp.ones((nl, 1, H), jnp.float32),
        "attn_ln_b": jnp.zeros((nl, 1, H), jnp.float32),
        "i_w": jnp.stack(i_w).astype(jnp.bfloat16),
        "i_b": jnp.zeros((nl, 1, I), jnp.float32),
        "o_w": jnp.stack(o_w).astype(jnp.bfloat16),
        "o_b": jnp.zeros((nl, 1, H), jnp.float32),
        "out_ln_g": jnp.ones((nl, 1, H), jnp.float32),
        "out_ln_b": jnp.zeros((nl, 1, H), jnp.float32),
    }

    # Gaussian diffusion schedule (linear betas).
    T = cfg["train_diffusion_steps"]
    betas = jnp.linspace(1e-4, 0.02, T, dtype=jnp.float32)
    alphas_cumprod = jnp.cumprod(1.0 - betas)
    p["sqrt_alphas_cumprod"] = jnp.sqrt(alphas_cumprod)
    p["sqrt_one_minus_alphas_cumprod"] = jnp.sqrt(1.0 - alphas_cumprod)
    return p


# ----------------------------- Forward pass -----------------------------

def forward(params, input_ids, labels, rng):
    cfg = CFG
    B, S = input_ids.shape
    E, H = cfg["embedding_dim"], cfg["hidden_size"]
    nheads = cfg["num_attention_heads"]
    d_head = H // nheads
    T = cfg["train_diffusion_steps"]
    L = S + 1
    M = B * L

    # word embedding lookup (gather glue, stays in XLA)
    inputs_embeds = params["word_emb"][input_ids]                    # (B, S, E)

    # diffusion q_sample with random timestep, applied only where t >= 0
    rng_t, rng_n = jax.random.split(rng)
    t = jax.random.randint(rng_t, (B,), -1, T)
    t_mask = t >= 0
    noise = jax.random.normal(rng_n, inputs_embeds.shape, dtype=jnp.float32)
    safe_t = jnp.where(t_mask, t, 0)
    a = params["sqrt_alphas_cumprod"][safe_t][:, None, None]
    s1m = params["sqrt_one_minus_alphas_cumprod"][safe_t][:, None, None]
    noisy = a * inputs_embeds + s1m * noise
    inputs_embeds = jnp.where(t_mask[:, None, None], noisy, inputs_embeds)

    # ---- prepare flat (M, *) inputs for the single fused trunk kernel ----
    # xe: up_proj input, with a zero row where the time token will be spliced.
    xe = jnp.concatenate(
        [inputs_embeds, jnp.zeros((B, 1, E), jnp.float32)], axis=1  # (B, L, E)
    ).reshape(M, E)

    # additive embedding slab: pos + token_type everywhere, + time_emb on the
    # time-token row of each sequence.
    t_time = jnp.where(t_mask, t, T)
    time_emb = params["time_emb"][t_time]                            # (B, H)
    pos_type = params["pos_emb"][:L] + params["type_emb"][0][None]   # (L, H)
    add_emb = jnp.broadcast_to(pos_type[None], (B, L, H))
    add_emb = add_emb.at[:, L - 1, :].add(time_emb).reshape(M, H)

    # row mask: 1 for sequence rows (keep up_proj output), 0 for time rows.
    row_mask = ((jnp.arange(M) % L) != (L - 1)).astype(jnp.float32)[:, None]

    # batch block-diagonal additive attention bias (no cross-batch attention)
    row_batch = jnp.repeat(jnp.arange(B), L)
    attn_bias = jnp.where(row_batch[:, None] == row_batch[None, :],
                          0.0, -1e30).astype(jnp.float32)            # (M, M)

    # per-head lane masks for in-kernel head split
    head_id = jnp.arange(H) // d_head
    head_mask = (head_id[None, :] == jnp.arange(nheads)[:, None]
                 ).astype(jnp.float32)[:, None, :]                   # (nh,1,H)

    # ---- ONE pallas_call: up_proj + emb LN + full encoder ----
    seq_out = pallas_trunk(xe, add_emb, row_mask, attn_bias, head_mask, params,
                           num_heads=nheads, head_dim=d_head).reshape(B, L, H)

    # Pooler + classification head + MSE loss: plain JAX (XLA fuses these);
    # last dims of 64 / 2 in Pallas would be pure launch overhead.
    cls_tok = seq_out[:, 0, :]                                       # (B, H)
    pooled = jnp.tanh(cls_tok @ params["pool_w"] + params["pool_b"])
    ch = jnp.tanh(pooled @ params["cls1_w"] + params["cls1_b"])
    logits = ch @ params["cls2_w"] + params["cls2_b"]                # (B, labels)

    # MSE with PyTorch broadcasting: target (B,1) broadcast against logits.
    target = jnp.broadcast_to(labels[:, None].astype(jnp.float32), logits.shape)
    loss = jnp.mean(jnp.square(logits - target))
    return loss, logits


# ----------------------------- Main -----------------------------

if __name__ == "__main__":
    root = jax.random.PRNGKey(0)
    k_param, k_ids, k_labels, k_fwd = jax.random.split(root, 4)

    params = init_params(k_param)

    B, S = 2, 8
    input_ids = jax.random.randint(k_ids, (B, S), 0, CFG["vocab_size"])
    labels = jax.random.normal(k_labels, (B,), dtype=jnp.float32)

    loss, logits = jax.jit(forward)(params, input_ids, labels, k_fwd)
    jax.block_until_ready((loss, logits))
    assert logits.shape == (B, CFG["num_labels"])
    assert bool(jnp.isfinite(loss))
    print("KERNEL_OK")
</pallas_src>

<mosaic_0001>
module attributes {stable_mosaic.version = 11 : i64} {
  func.func @_model_kernel(%arg0: i32, %arg1: memref<18x32xf32, #tpu.memory_space<vmem>>, %arg2: memref<18x64xf32, #tpu.memory_space<vmem>>, %arg3: memref<18x1xf32, #tpu.memory_space<vmem>>, %arg4: memref<18x18xf32, #tpu.memory_space<vmem>>, %arg5: memref<4x1x64xf32, #tpu.memory_space<vmem>>, %arg6: memref<32x128xbf16, #tpu.memory_space<vmem>>, %arg7: memref<1x128xf32, #tpu.memory_space<vmem>>, %arg8: memref<128x64xbf16, #tpu.memory_space<vmem>>, %arg9: memref<1x64xf32, #tpu.memory_space<vmem>>, %arg10: memref<1x64xf32, #tpu.memory_space<vmem>>, %arg11: memref<1x64xf32, #tpu.memory_space<vmem>>, %arg12: memref<2x64x192xbf16, #tpu.memory_space<vmem>>, %arg13: memref<2x1x192xf32, #tpu.memory_space<vmem>>, %arg14: memref<2x64x64xbf16, #tpu.memory_space<vmem>>, %arg15: memref<2x1x64xf32, #tpu.memory_space<vmem>>, %arg16: memref<2x1x64xf32, #tpu.memory_space<vmem>>, %arg17: memref<2x1x64xf32, #tpu.memory_space<vmem>>, %arg18: memref<2x64x256xbf16, #tpu.memory_space<vmem>>, %arg19: memref<2x1x256xf32, #tpu.memory_space<vmem>>, %arg20: memref<2x256x64xbf16, #tpu.memory_space<vmem>>, %arg21: memref<2x1x64xf32, #tpu.memory_space<vmem>>, %arg22: memref<2x1x64xf32, #tpu.memory_space<vmem>>, %arg23: memref<2x1x64xf32, #tpu.memory_space<vmem>>, %arg24: memref<18x64xf32, #tpu.memory_space<vmem>>) attributes {dimension_semantics = [#tpu.dimension_semantics<arbitrary>], iteration_bounds = array<i64: 1>, scalar_prefetch = 0 : i64, scratch_operands = 0 : i64, tpu.core_type = #tpu.core_type<tc>, window_params = [{pipeline_mode = #tpu.pipeline_mode<synchronous>, transform_indices = @transform_0, window_bounds = array<i64: 18, 32>}, {pipeline_mode = #tpu.pipeline_mode<synchronous>, transform_indices = @transform_1, window_bounds = array<i64: 18, 64>}, {pipeline_mode = #tpu.pipeline_mode<synchronous>, transform_indices = @transform_2, window_bounds = array<i64: 18, 1>}, {pipeline_mode = #tpu.pipeline_mode<synchronous>, transform_indices = @transform_3, window_bounds = array<i64: 18, 18>}, {pipeline_mode = #tpu.pipeline_mode<synchronous>, transform_indices = @transform_4, window_bounds = array<i64: 4, 1, 64>}, {pipeline_mode = #tpu.pipeline_mode<synchronous>, transform_indices = @transform_5, window_bounds = array<i64: 32, 128>}, {pipeline_mode = #tpu.pipeline_mode<synchronous>, transform_indices = @transform_6, window_bounds = array<i64: 1, 128>}, {pipeline_mode = #tpu.pipeline_mode<synchronous>, transform_indices = @transform_7, window_bounds = array<i64: 128, 64>}, {pipeline_mode = #tpu.pipeline_mode<synchronous>, transform_indices = @transform_8, window_bounds = array<i64: 1, 64>}, {pipeline_mode = #tpu.pipeline_mode<synchronous>, transform_indices = @transform_9, window_bounds = array<i64: 1, 64>}, {pipeline_mode = #tpu.pipeline_mode<synchronous>, transform_indices = @transform_10, window_bounds = array<i64: 1, 64>}, {pipeline_mode = #tpu.pipeline_mode<synchronous>, transform_indices = @transform_11, window_bounds = array<i64: 2, 64, 192>}, {pipeline_mode = #tpu.pipeline_mode<synchronous>, transform_indices = @transform_12, window_bounds = array<i64: 2, 1, 192>}, {pipeline_mode = #tpu.pipeline_mode<synchronous>, transform_indices = @transform_13, window_bounds = array<i64: 2, 64, 64>}, {pipeline_mode = #tpu.pipeline_mode<synchronous>, transform_indices = @transform_14, window_bounds = array<i64: 2, 1, 64>}, {pipeline_mode = #tpu.pipeline_mode<synchronous>, transform_indices = @transform_15, window_bounds = array<i64: 2, 1, 64>}, {pipeline_mode = #tpu.pipeline_mode<synchronous>, transform_indices = @transform_16, window_bounds = array<i64: 2, 1, 64>}, {pipeline_mode = #tpu.pipeline_mode<synchronous>, transform_indices = @transform_17, window_bounds = array<i64: 2, 64, 256>}, {pipeline_mode = #tpu.pipeline_mode<synchronous>, transform_indices = @transform_18, window_bounds = array<i64: 2, 1, 256>}, {pipeline_mode = #tpu.pipeline_mode<synchronous>, transform_indices = @transform_19, window_bounds = array<i64: 2, 256, 64>}, {pipeline_mode = #tpu.pipeline_mode<synchronous>, transform_indices = @transform_20, window_bounds = array<i64: 2, 1, 64>}, {pipeline_mode = #tpu.pipeline_mode<synchronous>, transform_indices = @transform_21, window_bounds = array<i64: 2, 1, 64>}, {pipeline_mode = #tpu.pipeline_mode<synchronous>, transform_indices = @transform_22, window_bounds = array<i64: 2, 1, 64>}, {pipeline_mode = #tpu.pipeline_mode<synchronous>, transform_indices = @transform_23, window_bounds = array<i64: 18, 64>}]} {
    %c0 = arith.constant 0 : index
    %c0_0 = arith.constant 0 : index
    %0 = vector.load %arg1[%c0, %c0_0] : memref<18x32xf32, #tpu.memory_space<vmem>>, vector<18x32xf32>
    %1 = arith.truncf %0 : vector<18x32xf32> to vector<18x32xbf16>
    %c0_1 = arith.constant 0 : index
    %c0_2 = arith.constant 0 : index
    %2 = vector.load %arg6[%c0_1, %c0_2] : memref<32x128xbf16, #tpu.memory_space<vmem>>, vector<32x128xbf16>
    %cst = arith.constant dense<0.000000e+00> : vector<18x128xf32>
    %3 = tpu.matmul %1, %2, %cst {dimension_numbers = #tpu.dot_dimension_numbers<[1], [0], [0], [1], [0, 0, 1, 1], [], []>} : vector<18x32xbf16>, vector<32x128xbf16>, vector<18x128xf32> -> vector<18x128xf32>
    %c0_3 = arith.constant 0 : index
    %c0_4 = arith.constant 0 : index
    %4 = vector.load %arg7[%c0_3, %c0_4] : memref<1x128xf32, #tpu.memory_space<vmem>>, vector<1x128xf32>
    %5 = vector.broadcast %4 : vector<1x128xf32> to vector<18x128xf32>
    %6 = arith.addf %3, %5 : vector<18x128xf32>
    %7 = math.tanh %6 : vector<18x128xf32>
    %8 = arith.truncf %7 : vector<18x128xf32> to vector<18x128xbf16>
    %c0_5 = arith.constant 0 : index
    %c0_6 = arith.constant 0 : index
    %9 = vector.load %arg8[%c0_5, %c0_6] : memref<128x64xbf16, #tpu.memory_space<vmem>>, vector<128x64xbf16>
    %cst_7 = arith.constant dense<0.000000e+00> : vector<18x64xf32>
    %10 = tpu.matmul %8, %9, %cst_7 {dimension_numbers = #tpu.dot_dimension_numbers<[1], [0], [0], [1], [0, 0, 1, 1], [], []>} : vector<18x128xbf16>, vector<128x64xbf16>, vector<18x64xf32> -> vector<18x64xf32>
    %c0_8 = arith.constant 0 : index
    %c0_9 = arith.constant 0 : index
    %11 = vector.load %arg9[%c0_8, %c0_9] : memref<1x64xf32, #tpu.memory_space<vmem>>, vector<1x64xf32>
    %12 = vector.broadcast %11 : vector<1x64xf32> to vector<18x64xf32>
    %13 = arith.addf %10, %12 : vector<18x64xf32>
    %c0_10 = arith.constant 0 : index
    %c0_11 = arith.constant 0 : index
    %14 = vector.load %arg3[%c0_10, %c0_11] : memref<18x1xf32, #tpu.memory_space<vmem>>, vector<18x1xf32>
    %15 = vector.broadcast %14 : vector<18x1xf32> to vector<18x64xf32>
    %16 = arith.mulf %13, %15 : vector<18x64xf32>
    %c0_12 = arith.constant 0 : index
    %c0_13 = arith.constant 0 : index
    %17 = vector.load %arg2[%c0_12, %c0_13] : memref<18x64xf32, #tpu.memory_space<vmem>>, vector<18x64xf32>
    %18 = arith.addf %16, %17 : vector<18x64xf32>
    %c0_14 = arith.constant 0 : index
    %c0_15 = arith.constant 0 : index
    %19 = vector.load %arg10[%c0_14, %c0_15] : memref<1x64xf32, #tpu.memory_space<vmem>>, vector<1x64xf32>
    %c0_16 = arith.constant 0 : index
    %c0_17 = arith.constant 0 : index
    %20 = vector.load %arg11[%c0_16, %c0_17] : memref<1x64xf32, #tpu.memory_space<vmem>>, vector<1x64xf32>
    %cst_18 = arith.constant dense<0.000000e+00> : vector<18xf32>
    %21 = vector.multi_reduction <add>, %18, %cst_18 [1] : vector<18x64xf32> to vector<18xf32>
    %22 = vector.shape_cast %21 : vector<18xf32> to vector<18x1xf32>
    %cst_19 = arith.constant 6.400000e+01 : f32
    %23 = vector.broadcast %cst_19 : f32 to vector<18x1xf32>
    %24 = arith.divf %22, %23 : vector<18x1xf32>
    %25 = vector.broadcast %24 : vector<18x1xf32> to vector<18x64xf32>
    %26 = arith.subf %18, %25 : vector<18x64xf32>
    %27 = arith.mulf %26, %26 : vector<18x64xf32>
    %cst_20 = arith.constant dense<0.000000e+00> : vector<18xf32>
    %28 = vector.multi_reduction <add>, %27, %cst_20 [1] : vector<18x64xf32> to vector<18xf32>
    %29 = vector.shape_cast %28 : vector<18xf32> to vector<18x1xf32>
    %cst_21 = arith.constant 6.400000e+01 : f32
    %30 = vector.broadcast %cst_21 : f32 to vector<18x1xf32>
    %31 = arith.divf %29, %30 : vector<18x1xf32>
    %32 = vector.broadcast %24 : vector<18x1xf32> to vector<18x64xf32>
    %33 = arith.subf %18, %32 : vector<18x64xf32>
    %cst_22 = arith.constant 9.99999996E-13 : f32
    %34 = vector.broadcast %cst_22 : f32 to vector<18x1xf32>
    %35 = arith.addf %31, %34 : vector<18x1xf32>
    %36 = math.rsqrt %35 : vector<18x1xf32>
    %37 = vector.broadcast %36 : vector<18x1xf32> to vector<18x64xf32>
    %38 = arith.mulf %33, %37 : vector<18x64xf32>
    %39 = vector.broadcast %19 : vector<1x64xf32> to vector<18x64xf32>
    %40 = arith.mulf %38, %39 : vector<18x64xf32>
    %41 = vector.broadcast %20 : vector<1x64xf32> to vector<18x64xf32>
    %42 = arith.addf %40, %41 : vector<18x64xf32>
    %c0_23 = arith.constant 0 : index
    %c0_24 = arith.constant 0 : index
    %43 = vector.load %arg4[%c0_23, %c0_24] : memref<18x18xf32, #tpu.memory_space<vmem>>, vector<18x18xf32>
    %44 = arith.truncf %42 : vector<18x64xf32> to vector<18x64xbf16>
    %c0_25 = arith.constant 0 : index
    %c0_26 = arith.constant 0 : index
    %c0_27 = arith.constant 0 : index
    %45 = vector.load %arg12[%c0_25, %c0_26, %c0_27] : memref<2x64x192xbf16, #tpu.memory_space<vmem>>, vector<1x64x192xbf16>
    %46 = vector.shape_cast %45 : vector<1x64x192xbf16> to vector<64x192xbf16>
    %cst_28 = arith.constant dense<0.000000e+00> : vector<18x192xf32>
    %47 = tpu.matmul %44, %46, %cst_28 {dimension_numbers = #tpu.dot_dimension_numbers<[1], [0], [0], [1], [0, 0, 1, 1], [], []>} : vector<18x64xbf16>, vector<64x192xbf16>, vector<18x192xf32> -> vector<18x192xf32>
    %c0_29 = arith.constant 0 : index
    %c0_30 = arith.constant 0 : index
    %c0_31 = arith.constant 0 : index
    %48 = vector.load %arg13[%c0_29, %c0_30, %c0_31] : memref<2x1x192xf32, #tpu.memory_space<vmem>>, vector<1x1x192xf32>
    %49 = vector.shape_cast %48 : vector<1x1x192xf32> to vector<1x192xf32>
    %50 = vector.broadcast %49 : vector<1x192xf32> to vector<18x192xf32>
    %51 = arith.addf %47, %50 : vector<18x192xf32>
    %52 = vector.extract_strided_slice %51 {offsets = [0, 0], sizes = [18, 64], strides = [1, 1]} : vector<18x192xf32> to vector<18x64xf32>
    %cst_32 = arith.constant 2.500000e-01 : f32
    %53 = vector.broadcast %cst_32 : f32 to vector<18x64xf32>
    %54 = arith.mulf %52, %53 : vector<18x64xf32>
    %55 = vector.extract_strided_slice %51 {offsets = [0, 64], sizes = [18, 64], strides = [1, 1]} : vector<18x192xf32> to vector<18x64xf32>
    %56 = arith.truncf %55 : vector<18x64xf32> to vector<18x64xbf16>
    %57 = vector.extract_strided_slice %51 {offsets = [0, 128], sizes = [18, 64], strides = [1, 1]} : vector<18x192xf32> to vector<18x64xf32>
    %cst_33 = arith.constant 0.000000e+00 : f32
    %58 = vector.broadcast %cst_33 : f32 to vector<18x64xf32>
    %c0_34 = arith.constant 0 : index
    %c0_35 = arith.constant 0 : index
    %c0_36 = arith.constant 0 : index
    %59 = vector.load %arg5[%c0_34, %c0_35, %c0_36] : memref<4x1x64xf32, #tpu.memory_space<vmem>>, vector<1x1x64xf32>
    %60 = vector.shape_cast %59 : vector<1x1x64xf32> to vector<1x64xf32>
    %61 = vector.broadcast %60 : vector<1x64xf32> to vector<18x64xf32>
    %62 = arith.mulf %54, %61 : vector<18x64xf32>
    %63 = arith.truncf %62 : vector<18x64xf32> to vector<18x64xbf16>
    %cst_37 = arith.constant dense<0.000000e+00> : vector<18x18xf32>
    %64 = tpu.matmul %63, %56, %cst_37 {dimension_numbers = #tpu.dot_dimension_numbers<[1], [1], [0], [0], [0, 0, 1, 0], [], []>} : vector<18x64xbf16>, vector<18x64xbf16>, vector<18x18xf32> -> vector<18x18xf32>
    %65 = arith.addf %64, %43 : vector<18x18xf32>
    %cst_38 = arith.constant dense<0xFF800000> : vector<18xf32>
    %66 = vector.multi_reduction <maximumf>, %65, %cst_38 [1] : vector<18x18xf32> to vector<18xf32>
    %67 = vector.shape_cast %66 : vector<18xf32> to vector<18x1xf32>
    %68 = vector.broadcast %67 : vector<18x1xf32> to vector<18x18xf32>
    %69 = arith.subf %65, %68 : vector<18x18xf32>
    %70 = math.exp %69 : vector<18x18xf32>
    %cst_39 = arith.constant dense<0.000000e+00> : vector<18xf32>
    %71 = vector.multi_reduction <add>, %70, %cst_39 [1] : vector<18x18xf32> to vector<18xf32>
    %72 = vector.shape_cast %71 : vector<18xf32> to vector<18x1xf32>
    %73 = tpu.reciprocal %72 {approx = true} : vector<18x1xf32> -> vector<18x1xf32>
    %74 = vector.broadcast %73 : vector<18x1xf32> to vector<18x18xf32>
    %75 = arith.mulf %70, %74 : vector<18x18xf32>
    %76 = arith.truncf %75 : vector<18x18xf32> to vector<18x18xbf16>
    %77 = vector.broadcast %60 : vector<1x64xf32> to vector<18x64xf32>
    %78 = arith.mulf %57, %77 : vector<18x64xf32>
    %79 = arith.truncf %78 : vector<18x64xf32> to vector<18x64xbf16>
    %cst_40 = arith.constant dense<0.000000e+00> : vector<18x64xf32>
    %80 = tpu.matmul %76, %79, %cst_40 {dimension_numbers = #tpu.dot_dimension_numbers<[1], [0], [0], [1], [0, 0, 1, 1], [], []>} : vector<18x18xbf16>, vector<18x64xbf16>, vector<18x64xf32> -> vector<18x64xf32>
    %81 = arith.addf %58, %80 : vector<18x64xf32>
    %c1 = arith.constant 1 : index
    %c0_41 = arith.constant 0 : index
    %c0_42 = arith.constant 0 : index
    %82 = vector.load %arg5[%c1, %c0_41, %c0_42] : memref<4x1x64xf32, #tpu.memory_space<vmem>>, vector<1x1x64xf32>
    %83 = vector.shape_cast %82 : vector<1x1x64xf32> to vector<1x64xf32>
    %84 = vector.broadcast %83 : vector<1x64xf32> to vector<18x64xf32>
    %85 = arith.mulf %54, %84 : vector<18x64xf32>
    %86 = arith.truncf %85 : vector<18x64xf32> to vector<18x64xbf16>
    %cst_43 = arith.constant dense<0.000000e+00> : vector<18x18xf32>
    %87 = tpu.matmul %86, %56, %cst_43 {dimension_numbers = #tpu.dot_dimension_numbers<[1], [1], [0], [0], [0, 0, 1, 0], [], []>} : vector<18x64xbf16>, vector<18x64xbf16>, vector<18x18xf32> -> vector<18x18xf32>
    %88 = arith.addf %87, %43 : vector<18x18xf32>
    %cst_44 = arith.constant dense<0xFF800000> : vector<18xf32>
    %89 = vector.multi_reduction <maximumf>, %88, %cst_44 [1] : vector<18x18xf32> to vector<18xf32>
    %90 = vector.shape_cast %89 : vector<18xf32> to vector<18x1xf32>
    %91 = vector.broadcast %90 : vector<18x1xf32> to vector<18x18xf32>
    %92 = arith.subf %88, %91 : vector<18x18xf32>
    %93 = math.exp %92 : vector<18x18xf32>
    %cst_45 = arith.constant dense<0.000000e+00> : vector<18xf32>
    %94 = vector.multi_reduction <add>, %93, %cst_45 [1] : vector<18x18xf32> to vector<18xf32>
    %95 = vector.shape_cast %94 : vector<18xf32> to vector<18x1xf32>
    %96 = tpu.reciprocal %95 {approx = true} : vector<18x1xf32> -> vector<18x1xf32>
    %97 = vector.broadcast %96 : vector<18x1xf32> to vector<18x18xf32>
    %98 = arith.mulf %93, %97 : vector<18x18xf32>
    %99 = arith.truncf %98 : vector<18x18xf32> to vector<18x18xbf16>
    %100 = vector.broadcast %83 : vector<1x64xf32> to vector<18x64xf32>
    %101 = arith.mulf %57, %100 : vector<18x64xf32>
    %102 = arith.truncf %101 : vector<18x64xf32> to vector<18x64xbf16>
    %cst_46 = arith.constant dense<0.000000e+00> : vector<18x64xf32>
    %103 = tpu.matmul %99, %102, %cst_46 {dimension_numbers = #tpu.dot_dimension_numbers<[1], [0], [0], [1], [0, 0, 1, 1], [], []>} : vector<18x18xbf16>, vector<18x64xbf16>, vector<18x64xf32> -> vector<18x64xf32>
    %104 = arith.addf %81, %103 : vector<18x64xf32>
    %c2 = arith.constant 2 : index
    %c0_47 = arith.constant 0 : index
    %c0_48 = arith.constant 0 : index
    %105 = vector.load %arg5[%c2, %c0_47, %c0_48] : memref<4x1x64xf32, #tpu.memory_space<vmem>>, vector<1x1x64xf32>
    %106 = vector.shape_cast %105 : vector<1x1x64xf32> to vector<1x64xf32>
    %107 = vector.broadcast %106 : vector<1x64xf32> to vector<18x64xf32>
    %108 = arith.mulf %54, %107 : vector<18x64xf32>
    %109 = arith.truncf %108 : vector<18x64xf32> to vector<18x64xbf16>
    %cst_49 = arith.constant dense<0.000000e+00> : vector<18x18xf32>
    %110 = tpu.matmul %109, %56, %cst_49 {dimension_numbers = #tpu.dot_dimension_numbers<[1], [1], [0], [0], [0, 0, 1, 0], [], []>} : vector<18x64xbf16>, vector<18x64xbf16>, vector<18x18xf32> -> vector<18x18xf32>
    %111 = arith.addf %110, %43 : vector<18x18xf32>
    %cst_50 = arith.constant dense<0xFF800000> : vector<18xf32>
    %112 = vector.multi_reduction <maximumf>, %111, %cst_50 [1] : vector<18x18xf32> to vector<18xf32>
    %113 = vector.shape_cast %112 : vector<18xf32> to vector<18x1xf32>
    %114 = vector.broadcast %113 : vector<18x1xf32> to vector<18x18xf32>
    %115 = arith.subf %111, %114 : vector<18x18xf32>
    %116 = math.exp %115 : vector<18x18xf32>
    %cst_51 = arith.constant dense<0.000000e+00> : vector<18xf32>
    %117 = vector.multi_reduction <add>, %116, %cst_51 [1] : vector<18x18xf32> to vector<18xf32>
    %118 = vector.shape_cast %117 : vector<18xf32> to vector<18x1xf32>
    %119 = tpu.reciprocal %118 {approx = true} : vector<18x1xf32> -> vector<18x1xf32>
    %120 = vector.broadcast %119 : vector<18x1xf32> to vector<18x18xf32>
    %121 = arith.mulf %116, %120 : vector<18x18xf32>
    %122 = arith.truncf %121 : vector<18x18xf32> to vector<18x18xbf16>
    %123 = vector.broadcast %106 : vector<1x64xf32> to vector<18x64xf32>
    %124 = arith.mulf %57, %123 : vector<18x64xf32>
    %125 = arith.truncf %124 : vector<18x64xf32> to vector<18x64xbf16>
    %cst_52 = arith.constant dense<0.000000e+00> : vector<18x64xf32>
    %126 = tpu.matmul %122, %125, %cst_52 {dimension_numbers = #tpu.dot_dimension_numbers<[1], [0], [0], [1], [0, 0, 1, 1], [], []>} : vector<18x18xbf16>, vector<18x64xbf16>, vector<18x64xf32> -> vector<18x64xf32>
    %127 = arith.addf %104, %126 : vector<18x64xf32>
    %c3 = arith.constant 3 : index
    %c0_53 = arith.constant 0 : index
    %c0_54 = arith.constant 0 : index
    %128 = vector.load %arg5[%c3, %c0_53, %c0_54] : memref<4x1x64xf32, #tpu.memory_space<vmem>>, vector<1x1x64xf32>
    %129 = vector.shape_cast %128 : vector<1x1x64xf32> to vector<1x64xf32>
    %130 = vector.broadcast %129 : vector<1x64xf32> to vector<18x64xf32>
    %131 = arith.mulf %54, %130 : vector<18x64xf32>
    %132 = arith.truncf %131 : vector<18x64xf32> to vector<18x64xbf16>
    %cst_55 = arith.constant dense<0.000000e+00> : vector<18x18xf32>
    %133 = tpu.matmul %132, %56, %cst_55 {dimension_numbers = #tpu.dot_dimension_numbers<[1], [1], [0], [0], [0, 0, 1, 0], [], []>} : vector<18x64xbf16>, vector<18x64xbf16>, vector<18x18xf32> -> vector<18x18xf32>
    %134 = arith.addf %133, %43 : vector<18x18xf32>
    %cst_56 = arith.constant dense<0xFF800000> : vector<18xf32>
    %135 = vector.multi_reduction <maximumf>, %134, %cst_56 [1] : vector<18x18xf32> to vector<18xf32>
    %136 = vector.shape_cast %135 : vector<18xf32> to vector<18x1xf32>
    %137 = vector.broadcast %136 : vector<18x1xf32> to vector<18x18xf32>
    %138 = arith.subf %134, %137 : vector<18x18xf32>
    %139 = math.exp %138 : vector<18x18xf32>
    %cst_57 = arith.constant dense<0.000000e+00> : vector<18xf32>
    %140 = vector.multi_reduction <add>, %139, %cst_57 [1] : vector<18x18xf32> to vector<18xf32>
    %141 = vector.shape_cast %140 : vector<18xf32> to vector<18x1xf32>
    %142 = tpu.reciprocal %141 {approx = true} : vector<18x1xf32> -> vector<18x1xf32>
    %143 = vector.broadcast %142 : vector<18x1xf32> to vector<18x18xf32>
    %144 = arith.mulf %139, %143 : vector<18x18xf32>
    %145 = arith.truncf %144 : vector<18x18xf32> to vector<18x18xbf16>
    %146 = vector.broadcast %129 : vector<1x64xf32> to vector<18x64xf32>
    %147 = arith.mulf %57, %146 : vector<18x64xf32>
    %148 = arith.truncf %147 : vector<18x64xf32> to vector<18x64xbf16>
    %cst_58 = arith.constant dense<0.000000e+00> : vector<18x64xf32>
    %149 = tpu.matmul %145, %148, %cst_58 {dimension_numbers = #tpu.dot_dimension_numbers<[1], [0], [0], [1], [0, 0, 1, 1], [], []>} : vector<18x18xbf16>, vector<18x64xbf16>, vector<18x64xf32> -> vector<18x64xf32>
    %150 = arith.addf %127, %149 : vector<18x64xf32>
    %151 = arith.truncf %150 : vector<18x64xf32> to vector<18x64xbf16>
    %c0_59 = arith.constant 0 : index
    %c0_60 = arith.constant 0 : index
    %c0_61 = arith.constant 0 : index
    %152 = vector.load %arg14[%c0_59, %c0_60, %c0_61] : memref<2x64x64xbf16, #tpu.memory_space<vmem>>, vector<1x64x64xbf16>
    %153 = vector.shape_cast %152 : vector<1x64x64xbf16> to vector<64x64xbf16>
    %cst_62 = arith.constant dense<0.000000e+00> : vector<18x64xf32>
    %154 = tpu.matmul %151, %153, %cst_62 {dimension_numbers = #tpu.dot_dimension_numbers<[1], [0], [0], [1], [0, 0, 1, 1], [], []>} : vector<18x64xbf16>, vector<64x64xbf16>, vector<18x64xf32> -> vector<18x64xf32>
    %c0_63 = arith.constant 0 : index
    %c0_64 = arith.constant 0 : index
    %c0_65 = arith.constant 0 : index
    %155 = vector.load %arg15[%c0_63, %c0_64, %c0_65] : memref<2x1x64xf32, #tpu.memory_space<vmem>>, vector<1x1x64xf32>
    %156 = vector.shape_cast %155 : vector<1x1x64xf32> to vector<1x64xf32>
    %157 = vector.broadcast %156 : vector<1x64xf32> to vector<18x64xf32>
    %158 = arith.addf %154, %157 : vector<18x64xf32>
    %159 = arith.addf %158, %42 : vector<18x64xf32>
    %c0_66 = arith.constant 0 : index
    %c0_67 = arith.constant 0 : index
    %c0_68 = arith.constant 0 : index
    %160 = vector.load %arg16[%c0_66, %c0_67, %c0_68] : memref<2x1x64xf32, #tpu.memory_space<vmem>>, vector<1x1x64xf32>
    %161 = vector.shape_cast %160 : vector<1x1x64xf32> to vector<1x64xf32>
    %c0_69 = arith.constant 0 : index
    %c0_70 = arith.constant 0 : index
    %c0_71 = arith.constant 0 : index
    %162 = vector.load %arg17[%c0_69, %c0_70, %c0_71] : memref<2x1x64xf32, #tpu.memory_space<vmem>>, vector<1x1x64xf32>
    %163 = vector.shape_cast %162 : vector<1x1x64xf32> to vector<1x64xf32>
    %cst_72 = arith.constant dense<0.000000e+00> : vector<18xf32>
    %164 = vector.multi_reduction <add>, %159, %cst_72 [1] : vector<18x64xf32> to vector<18xf32>
    %165 = vector.shape_cast %164 : vector<18xf32> to vector<18x1xf32>
    %cst_73 = arith.constant 6.400000e+01 : f32
    %166 = vector.broadcast %cst_73 : f32 to vector<18x1xf32>
    %167 = arith.divf %165, %166 : vector<18x1xf32>
    %168 = vector.broadcast %167 : vector<18x1xf32> to vector<18x64xf32>
    %169 = arith.subf %159, %168 : vector<18x64xf32>
    %170 = arith.mulf %169, %169 : vector<18x64xf32>
    %cst_74 = arith.constant dense<0.000000e+00> : vector<18xf32>
    %171 = vector.multi_reduction <add>, %170, %cst_74 [1] : vector<18x64xf32> to vector<18xf32>
    %172 = vector.shape_cast %171 : vector<18xf32> to vector<18x1xf32>
    %cst_75 = arith.constant 6.400000e+01 : f32
    %173 = vector.broadcast %cst_75 : f32 to vector<18x1xf32>
    %174 = arith.divf %172, %173 : vector<18x1xf32>
    %175 = vector.broadcast %167 : vector<18x1xf32> to vector<18x64xf32>
    %176 = arith.subf %159, %175 : vector<18x64xf32>
    %cst_76 = arith.constant 9.99999996E-13 : f32
    %177 = vector.broadcast %cst_76 : f32 to vector<18x1xf32>
    %178 = arith.addf %174, %177 : vector<18x1xf32>
    %179 = math.rsqrt %178 : vector<18x1xf32>
    %180 = vector.broadcast %179 : vector<18x1xf32> to vector<18x64xf32>
    %181 = arith.mulf %176, %180 : vector<18x64xf32>
    %182 = vector.broadcast %161 : vector<1x64xf32> to vector<18x64xf32>
    %183 = arith.mulf %181, %182 : vector<18x64xf32>
    %184 = vector.broadcast %163 : vector<1x64xf32> to vector<18x64xf32>
    %185 = arith.addf %183, %184 : vector<18x64xf32>
    %186 = arith.truncf %185 : vector<18x64xf32> to vector<18x64xbf16>
    %c0_77 = arith.constant 0 : index
    %c0_78 = arith.constant 0 : index
    %c0_79 = arith.constant 0 : index
    %187 = vector.load %arg18[%c0_77, %c0_78, %c0_79] : memref<2x64x256xbf16, #tpu.memory_space<vmem>>, vector<1x64x256xbf16>
    %188 = vector.shape_cast %187 : vector<1x64x256xbf16> to vector<64x256xbf16>
    %cst_80 = arith.constant dense<0.000000e+00> : vector<18x256xf32>
    %189 = tpu.matmul %186, %188, %cst_80 {dimension_numbers = #tpu.dot_dimension_numbers<[1], [0], [0], [1], [0, 0, 1, 1], [], []>} : vector<18x64xbf16>, vector<64x256xbf16>, vector<18x256xf32> -> vector<18x256xf32>
    %c0_81 = arith.constant 0 : index
    %c0_82 = arith.constant 0 : index
    %c0_83 = arith.constant 0 : index
    %190 = vector.load %arg19[%c0_81, %c0_82, %c0_83] : memref<2x1x256xf32, #tpu.memory_space<vmem>>, vector<1x1x256xf32>
    %191 = vector.shape_cast %190 : vector<1x1x256xf32> to vector<1x256xf32>
    %192 = vector.broadcast %191 : vector<1x256xf32> to vector<18x256xf32>
    %193 = arith.addf %189, %192 : vector<18x256xf32>
    %cst_84 = arith.constant 5.000000e-01 : f32
    %194 = vector.broadcast %cst_84 : f32 to vector<18x256xf32>
    %195 = arith.mulf %194, %193 : vector<18x256xf32>
    %cst_85 = arith.constant 4.471500e-02 : f32
    %196 = vector.broadcast %cst_85 : f32 to vector<18x256xf32>
    %197 = arith.mulf %196, %193 : vector<18x256xf32>
    %198 = arith.mulf %197, %193 : vector<18x256xf32>
    %199 = arith.mulf %198, %193 : vector<18x256xf32>
    %200 = arith.addf %193, %199 : vector<18x256xf32>
    %cst_86 = arith.constant 0.797884583 : f32
    %201 = vector.broadcast %cst_86 : f32 to vector<18x256xf32>
    %202 = arith.mulf %201, %200 : vector<18x256xf32>
    %203 = math.tanh %202 : vector<18x256xf32>
    %cst_87 = arith.constant 1.000000e+00 : f32
    %204 = vector.broadcast %cst_87 : f32 to vector<18x256xf32>
    %205 = arith.addf %204, %203 : vector<18x256xf32>
    %206 = arith.mulf %195, %205 : vector<18x256xf32>
    %207 = arith.truncf %206 : vector<18x256xf32> to vector<18x256xbf16>
    %c0_88 = arith.constant 0 : index
    %c0_89 = arith.constant 0 : index
    %c0_90 = arith.constant 0 : index
    %208 = vector.load %arg20[%c0_88, %c0_89, %c0_90] : memref<2x256x64xbf16, #tpu.memory_space<vmem>>, vector<1x256x64xbf16>
    %209 = vector.shape_cast %208 : vector<1x256x64xbf16> to vector<256x64xbf16>
    %cst_91 = arith.constant dense<0.000000e+00> : vector<18x64xf32>
    %210 = tpu.matmul %207, %209, %cst_91 {dimension_numbers = #tpu.dot_dimension_numbers<[1], [0], [0], [1], [0, 0, 1, 1], [], []>} : vector<18x256xbf16>, vector<256x64xbf16>, vector<18x64xf32> -> vector<18x64xf32>
    %c0_92 = arith.constant 0 : index
    %c0_93 = arith.constant 0 : index
    %c0_94 = arith.constant 0 : index
    %211 = vector.load %arg21[%c0_92, %c0_93, %c0_94] : memref<2x1x64xf32, #tpu.memory_space<vmem>>, vector<1x1x64xf32>
    %212 = vector.shape_cast %211 : vector<1x1x64xf32> to vector<1x64xf32>
    %213 = vector.broadcast %212 : vector<1x64xf32> to vector<18x64xf32>
    %214 = arith.addf %210, %213 : vector<18x64xf32>
    %215 = arith.addf %214, %185 : vector<18x64xf32>
    %c0_95 = arith.constant 0 : index
    %c0_96 = arith.constant 0 : index
    %c0_97 = arith.constant 0 : index
    %216 = vector.load %arg22[%c0_95, %c0_96, %c0_97] : memref<2x1x64xf32, #tpu.memory_space<vmem>>, vector<1x1x64xf32>
    %217 = vector.shape_cast %216 : vector<1x1x64xf32> to vector<1x64xf32>
    %c0_98 = arith.constant 0 : index
    %c0_99 = arith.constant 0 : index
    %c0_100 = arith.constant 0 : index
    %218 = vector.load %arg23[%c0_98, %c0_99, %c0_100] : memref<2x1x64xf32, #tpu.memory_space<vmem>>, vector<1x1x64xf32>
    %219 = vector.shape_cast %218 : vector<1x1x64xf32> to vector<1x64xf32>
    %cst_101 = arith.constant dense<0.000000e+00> : vector<18xf32>
    %220 = vector.multi_reduction <add>, %215, %cst_101 [1] : vector<18x64xf32> to vector<18xf32>
    %221 = vector.shape_cast %220 : vector<18xf32> to vector<18x1xf32>
    %cst_102 = arith.constant 6.400000e+01 : f32
    %222 = vector.broadcast %cst_102 : f32 to vector<18x1xf32>
    %223 = arith.divf %221, %222 : vector<18x1xf32>
    %224 = vector.broadcast %223 : vector<18x1xf32> to vector<18x64xf32>
    %225 = arith.subf %215, %224 : vector<18x64xf32>
    %226 = arith.mulf %225, %225 : vector<18x64xf32>
    %cst_103 = arith.constant dense<0.000000e+00> : vector<18xf32>
    %227 = vector.multi_reduction <add>, %226, %cst_103 [1] : vector<18x64xf32> to vector<18xf32>
    %228 = vector.shape_cast %227 : vector<18xf32> to vector<18x1xf32>
    %cst_104 = arith.constant 6.400000e+01 : f32
    %229 = vector.broadcast %cst_104 : f32 to vector<18x1xf32>
    %230 = arith.divf %228, %229 : vector<18x1xf32>
    %231 = vector.broadcast %223 : vector<18x1xf32> to vector<18x64xf32>
    %232 = arith.subf %215, %231 : vector<18x64xf32>
    %cst_105 = arith.constant 9.99999996E-13 : f32
    %233 = vector.broadcast %cst_105 : f32 to vector<18x1xf32>
    %234 = arith.addf %230, %233 : vector<18x1xf32>
    %235 = math.rsqrt %234 : vector<18x1xf32>
    %236 = vector.broadcast %235 : vector<18x1xf32> to vector<18x64xf32>
    %237 = arith.mulf %232, %236 : vector<18x64xf32>
    %238 = vector.broadcast %217 : vector<1x64xf32> to vector<18x64xf32>
    %239 = arith.mulf %237, %238 : vector<18x64xf32>
    %240 = vector.broadcast %219 : vector<1x64xf32> to vector<18x64xf32>
    %241 = arith.addf %239, %240 : vector<18x64xf32>
    %242 = arith.truncf %241 : vector<18x64xf32> to vector<18x64xbf16>
    %c1_106 = arith.constant 1 : index
    %c0_107 = arith.constant 0 : index
    %c0_108 = arith.constant 0 : index
    %243 = vector.load %arg12[%c1_106, %c0_107, %c0_108] : memref<2x64x192xbf16, #tpu.memory_space<vmem>>, vector<1x64x192xbf16>
    %244 = vector.shape_cast %243 : vector<1x64x192xbf16> to vector<64x192xbf16>
    %cst_109 = arith.constant dense<0.000000e+00> : vector<18x192xf32>
    %245 = tpu.matmul %242, %244, %cst_109 {dimension_numbers = #tpu.dot_dimension_numbers<[1], [0], [0], [1], [0, 0, 1, 1], [], []>} : vector<18x64xbf16>, vector<64x192xbf16>, vector<18x192xf32> -> vector<18x192xf32>
    %c1_110 = arith.constant 1 : index
    %c0_111 = arith.constant 0 : index
    %c0_112 = arith.constant 0 : index
    %246 = vector.load %arg13[%c1_110, %c0_111, %c0_112] : memref<2x1x192xf32, #tpu.memory_space<vmem>>, vector<1x1x192xf32>
    %247 = vector.shape_cast %246 : vector<1x1x192xf32> to vector<1x192xf32>
    %248 = vector.broadcast %247 : vector<1x192xf32> to vector<18x192xf32>
    %249 = arith.addf %245, %248 : vector<18x192xf32>
    %250 = vector.extract_strided_slice %249 {offsets = [0, 0], sizes = [18, 64], strides = [1, 1]} : vector<18x192xf32> to vector<18x64xf32>
    %cst_113 = arith.constant 2.500000e-01 : f32
    %251 = vector.broadcast %cst_113 : f32 to vector<18x64xf32>
    %252 = arith.mulf %250, %251 : vector<18x64xf32>
    %253 = vector.extract_strided_slice %249 {offsets = [0, 64], sizes = [18, 64], strides = [1, 1]} : vector<18x192xf32> to vector<18x64xf32>
    %254 = arith.truncf %253 : vector<18x64xf32> to vector<18x64xbf16>
    %255 = vector.extract_strided_slice %249 {offsets = [0, 128], sizes = [18, 64], strides = [1, 1]} : vector<18x192xf32> to vector<18x64xf32>
    %cst_114 = arith.constant 0.000000e+00 : f32
    %256 = vector.broadcast %cst_114 : f32 to vector<18x64xf32>
    %c0_115 = arith.constant 0 : index
    %c0_116 = arith.constant 0 : index
    %c0_117 = arith.constant 0 : index
    %257 = vector.load %arg5[%c0_115, %c0_116, %c0_117] : memref<4x1x64xf32, #tpu.memory_space<vmem>>, vector<1x1x64xf32>
    %258 = vector.shape_cast %257 : vector<1x1x64xf32> to vector<1x64xf32>
    %259 = vector.broadcast %258 : vector<1x64xf32> to vector<18x64xf32>
    %260 = arith.mulf %252, %259 : vector<18x64xf32>
    %261 = arith.truncf %260 : vector<18x64xf32> to vector<18x64xbf16>
    %cst_118 = arith.constant dense<0.000000e+00> : vector<18x18xf32>
    %262 = tpu.matmul %261, %254, %cst_118 {dimension_numbers = #tpu.dot_dimension_numbers<[1], [1], [0], [0], [0, 0, 1, 0], [], []>} : vector<18x64xbf16>, vector<18x64xbf16>, vector<18x18xf32> -> vector<18x18xf32>
    %263 = arith.addf %262, %43 : vector<18x18xf32>
    %cst_119 = arith.constant dense<0xFF800000> : vector<18xf32>
    %264 = vector.multi_reduction <maximumf>, %263, %cst_119 [1] : vector<18x18xf32> to vector<18xf32>
    %265 = vector.shape_cast %264 : vector<18xf32> to vector<18x1xf32>
    %266 = vector.broadcast %265 : vector<18x1xf32> to vector<18x18xf32>
    %267 = arith.subf %263, %266 : vector<18x18xf32>
    %268 = math.exp %267 : vector<18x18xf32>
    %cst_120 = arith.constant dense<0.000000e+00> : vector<18xf32>
    %269 = vector.multi_reduction <add>, %268, %cst_120 [1] : vector<18x18xf32> to vector<18xf32>
    %270 = vector.shape_cast %269 : vector<18xf32> to vector<18x1xf32>
    %271 = tpu.reciprocal %270 {approx = true} : vector<18x1xf32> -> vector<18x1xf32>
    %272 = vector.broadcast %271 : vector<18x1xf32> to vector<18x18xf32>
    %273 = arith.mulf %268, %272 : vector<18x18xf32>
    %274 = arith.truncf %273 : vector<18x18xf32> to vector<18x18xbf16>
    %275 = vector.broadcast %258 : vector<1x64xf32> to vector<18x64xf32>
    %276 = arith.mulf %255, %275 : vector<18x64xf32>
    %277 = arith.truncf %276 : vector<18x64xf32> to vector<18x64xbf16>
    %cst_121 = arith.constant dense<0.000000e+00> : vector<18x64xf32>
    %278 = tpu.matmul %274, %277, %cst_121 {dimension_numbers = #tpu.dot_dimension_numbers<[1], [0], [0], [1], [0, 0, 1, 1], [], []>} : vector<18x18xbf16>, vector<18x64xbf16>, vector<18x64xf32> -> vector<18x64xf32>
    %279 = arith.addf %256, %278 : vector<18x64xf32>
    %c1_122 = arith.constant 1 : index
    %c0_123 = arith.constant 0 : index
    %c0_124 = arith.constant 0 : index
    %280 = vector.load %arg5[%c1_122, %c0_123, %c0_124] : memref<4x1x64xf32, #tpu.memory_space<vmem>>, vector<1x1x64xf32>
    %281 = vector.shape_cast %280 : vector<1x1x64xf32> to vector<1x64xf32>
    %282 = vector.broadcast %281 : vector<1x64xf32> to vector<18x64xf32>
    %283 = arith.mulf %252, %282 : vector<18x64xf32>
    %284 = arith.truncf %283 : vector<18x64xf32> to vector<18x64xbf16>
    %cst_125 = arith.constant dense<0.000000e+00> : vector<18x18xf32>
    %285 = tpu.matmul %284, %254, %cst_125 {dimension_numbers = #tpu.dot_dimension_numbers<[1], [1], [0], [0], [0, 0, 1, 0], [], []>} : vector<18x64xbf16>, vector<18x64xbf16>, vector<18x18xf32> -> vector<18x18xf32>
    %286 = arith.addf %285, %43 : vector<18x18xf32>
    %cst_126 = arith.constant dense<0xFF800000> : vector<18xf32>
    %287 = vector.multi_reduction <maximumf>, %286, %cst_126 [1] : vector<18x18xf32> to vector<18xf32>
    %288 = vector.shape_cast %287 : vector<18xf32> to vector<18x1xf32>
    %289 = vector.broadcast %288 : vector<18x1xf32> to vector<18x18xf32>
    %290 = arith.subf %286, %289 : vector<18x18xf32>
    %291 = math.exp %290 : vector<18x18xf32>
    %cst_127 = arith.constant dense<0.000000e+00> : vector<18xf32>
    %292 = vector.multi_reduction <add>, %291, %cst_127 [1] : vector<18x18xf32> to vector<18xf32>
    %293 = vector.shape_cast %292 : vector<18xf32> to vector<18x1xf32>
    %294 = tpu.reciprocal %293 {approx = true} : vector<18x1xf32> -> vector<18x1xf32>
    %295 = vector.broadcast %294 : vector<18x1xf32> to vector<18x18xf32>
    %296 = arith.mulf %291, %295 : vector<18x18xf32>
    %297 = arith.truncf %296 : vector<18x18xf32> to vector<18x18xbf16>
    %298 = vector.broadcast %281 : vector<1x64xf32> to vector<18x64xf32>
    %299 = arith.mulf %255, %298 : vector<18x64xf32>
    %300 = arith.truncf %299 : vector<18x64xf32> to vector<18x64xbf16>
    %cst_128 = arith.constant dense<0.000000e+00> : vector<18x64xf32>
    %301 = tpu.matmul %297, %300, %cst_128 {dimension_numbers = #tpu.dot_dimension_numbers<[1], [0], [0], [1], [0, 0, 1, 1], [], []>} : vector<18x18xbf16>, vector<18x64xbf16>, vector<18x64xf32> -> vector<18x64xf32>
    %302 = arith.addf %279, %301 : vector<18x64xf32>
    %c2_129 = arith.constant 2 : index
    %c0_130 = arith.constant 0 : index
    %c0_131 = arith.constant 0 : index
    %303 = vector.load %arg5[%c2_129, %c0_130, %c0_131] : memref<4x1x64xf32, #tpu.memory_space<vmem>>, vector<1x1x64xf32>
    %304 = vector.shape_cast %303 : vector<1x1x64xf32> to vector<1x64xf32>
    %305 = vector.broadcast %304 : vector<1x64xf32> to vector<18x64xf32>
    %306 = arith.mulf %252, %305 : vector<18x64xf32>
    %307 = arith.truncf %306 : vector<18x64xf32> to vector<18x64xbf16>
    %cst_132 = arith.constant dense<0.000000e+00> : vector<18x18xf32>
    %308 = tpu.matmul %307, %254, %cst_132 {dimension_numbers = #tpu.dot_dimension_numbers<[1], [1], [0], [0], [0, 0, 1, 0], [], []>} : vector<18x64xbf16>, vector<18x64xbf16>, vector<18x18xf32> -> vector<18x18xf32>
    %309 = arith.addf %308, %43 : vector<18x18xf32>
    %cst_133 = arith.constant dense<0xFF800000> : vector<18xf32>
    %310 = vector.multi_reduction <maximumf>, %309, %cst_133 [1] : vector<18x18xf32> to vector<18xf32>
    %311 = vector.shape_cast %310 : vector<18xf32> to vector<18x1xf32>
    %312 = vector.broadcast %311 : vector<18x1xf32> to vector<18x18xf32>
    %313 = arith.subf %309, %312 : vector<18x18xf32>
    %314 = math.exp %313 : vector<18x18xf32>
    %cst_134 = arith.constant dense<0.000000e+00> : vector<18xf32>
    %315 = vector.multi_reduction <add>, %314, %cst_134 [1] : vector<18x18xf32> to vector<18xf32>
    %316 = vector.shape_cast %315 : vector<18xf32> to vector<18x1xf32>
    %317 = tpu.reciprocal %316 {approx = true} : vector<18x1xf32> -> vector<18x1xf32>
    %318 = vector.broadcast %317 : vector<18x1xf32> to vector<18x18xf32>
    %319 = arith.mulf %314, %318 : vector<18x18xf32>
    %320 = arith.truncf %319 : vector<18x18xf32> to vector<18x18xbf16>
    %321 = vector.broadcast %304 : vector<1x64xf32> to vector<18x64xf32>
    %322 = arith.mulf %255, %321 : vector<18x64xf32>
    %323 = arith.truncf %322 : vector<18x64xf32> to vector<18x64xbf16>
    %cst_135 = arith.constant dense<0.000000e+00> : vector<18x64xf32>
    %324 = tpu.matmul %320, %323, %cst_135 {dimension_numbers = #tpu.dot_dimension_numbers<[1], [0], [0], [1], [0, 0, 1, 1], [], []>} : vector<18x18xbf16>, vector<18x64xbf16>, vector<18x64xf32> -> vector<18x64xf32>
    %325 = arith.addf %302, %324 : vector<18x64xf32>
    %c3_136 = arith.constant 3 : index
    %c0_137 = arith.constant 0 : index
    %c0_138 = arith.constant 0 : index
    %326 = vector.load %arg5[%c3_136, %c0_137, %c0_138] : memref<4x1x64xf32, #tpu.memory_space<vmem>>, vector<1x1x64xf32>
    %327 = vector.shape_cast %326 : vector<1x1x64xf32> to vector<1x64xf32>
    %328 = vector.broadcast %327 : vector<1x64xf32> to vector<18x64xf32>
    %329 = arith.mulf %252, %328 : vector<18x64xf32>
    %330 = arith.truncf %329 : vector<18x64xf32> to vector<18x64xbf16>
    %cst_139 = arith.constant dense<0.000000e+00> : vector<18x18xf32>
    %331 = tpu.matmul %330, %254, %cst_139 {dimension_numbers = #tpu.dot_dimension_numbers<[1], [1], [0], [0], [0, 0, 1, 0], [], []>} : vector<18x64xbf16>, vector<18x64xbf16>, vector<18x18xf32> -> vector<18x18xf32>
    %332 = arith.addf %331, %43 : vector<18x18xf32>
    %cst_140 = arith.constant dense<0xFF800000> : vector<18xf32>
    %333 = vector.multi_reduction <maximumf>, %332, %cst_140 [1] : vector<18x18xf32> to vector<18xf32>
    %334 = vector.shape_cast %333 : vector<18xf32> to vector<18x1xf32>
    %335 = vector.broadcast %334 : vector<18x1xf32> to vector<18x18xf32>
    %336 = arith.subf %332, %335 : vector<18x18xf32>
    %337 = math.exp %336 : vector<18x18xf32>
    %cst_141 = arith.constant dense<0.000000e+00> : vector<18xf32>
    %338 = vector.multi_reduction <add>, %337, %cst_141 [1] : vector<18x18xf32> to vector<18xf32>
    %339 = vector.shape_cast %338 : vector<18xf32> to vector<18x1xf32>
    %340 = tpu.reciprocal %339 {approx = true} : vector<18x1xf32> -> vector<18x1xf32>
    %341 = vector.broadcast %340 : vector<18x1xf32> to vector<18x18xf32>
    %342 = arith.mulf %337, %341 : vector<18x18xf32>
    %343 = arith.truncf %342 : vector<18x18xf32> to vector<18x18xbf16>
    %344 = vector.broadcast %327 : vector<1x64xf32> to vector<18x64xf32>
    %345 = arith.mulf %255, %344 : vector<18x64xf32>
    %346 = arith.truncf %345 : vector<18x64xf32> to vector<18x64xbf16>
    %cst_142 = arith.constant dense<0.000000e+00> : vector<18x64xf32>
    %347 = tpu.matmul %343, %346, %cst_142 {dimension_numbers = #tpu.dot_dimension_numbers<[1], [0], [0], [1], [0, 0, 1, 1], [], []>} : vector<18x18xbf16>, vector<18x64xbf16>, vector<18x64xf32> -> vector<18x64xf32>
    %348 = arith.addf %325, %347 : vector<18x64xf32>
    %349 = arith.truncf %348 : vector<18x64xf32> to vector<18x64xbf16>
    %c1_143 = arith.constant 1 : index
    %c0_144 = arith.constant 0 : index
    %c0_145 = arith.constant 0 : index
    %350 = vector.load %arg14[%c1_143, %c0_144, %c0_145] : memref<2x64x64xbf16, #tpu.memory_space<vmem>>, vector<1x64x64xbf16>
    %351 = vector.shape_cast %350 : vector<1x64x64xbf16> to vector<64x64xbf16>
    %cst_146 = arith.constant dense<0.000000e+00> : vector<18x64xf32>
    %352 = tpu.matmul %349, %351, %cst_146 {dimension_numbers = #tpu.dot_dimension_numbers<[1], [0], [0], [1], [0, 0, 1, 1], [], []>} : vector<18x64xbf16>, vector<64x64xbf16>, vector<18x64xf32> -> vector<18x64xf32>
    %c1_147 = arith.constant 1 : index
    %c0_148 = arith.constant 0 : index
    %c0_149 = arith.constant 0 : index
    %353 = vector.load %arg15[%c1_147, %c0_148, %c0_149] : memref<2x1x64xf32, #tpu.memory_space<vmem>>, vector<1x1x64xf32>
    %354 = vector.shape_cast %353 : vector<1x1x64xf32> to vector<1x64xf32>
    %355 = vector.broadcast %354 : vector<1x64xf32> to vector<18x64xf32>
    %356 = arith.addf %352, %355 : vector<18x64xf32>
    %357 = arith.addf %356, %241 : vector<18x64xf32>
    %c1_150 = arith.constant 1 : index
    %c0_151 = arith.constant 0 : index
    %c0_152 = arith.constant 0 : index
    %358 = vector.load %arg16[%c1_150, %c0_151, %c0_152] : memref<2x1x64xf32, #tpu.memory_space<vmem>>, vector<1x1x64xf32>
    %359 = vector.shape_cast %358 : vector<1x1x64xf32> to vector<1x64xf32>
    %c1_153 = arith.constant 1 : index
    %c0_154 = arith.constant 0 : index
    %c0_155 = arith.constant 0 : index
    %360 = vector.load %arg17[%c1_153, %c0_154, %c0_155] : memref<2x1x64xf32, #tpu.memory_space<vmem>>, vector<1x1x64xf32>
    %361 = vector.shape_cast %360 : vector<1x1x64xf32> to vector<1x64xf32>
    %cst_156 = arith.constant dense<0.000000e+00> : vector<18xf32>
    %362 = vector.multi_reduction <add>, %357, %cst_156 [1] : vector<18x64xf32> to vector<18xf32>
    %363 = vector.shape_cast %362 : vector<18xf32> to vector<18x1xf32>
    %cst_157 = arith.constant 6.400000e+01 : f32
    %364 = vector.broadcast %cst_157 : f32 to vector<18x1xf32>
    %365 = arith.divf %363, %364 : vector<18x1xf32>
    %366 = vector.broadcast %365 : vector<18x1xf32> to vector<18x64xf32>
    %367 = arith.subf %357, %366 : vector<18x64xf32>
    %368 = arith.mulf %367, %367 : vector<18x64xf32>
    %cst_158 = arith.constant dense<0.000000e+00> : vector<18xf32>
    %369 = vector.multi_reduction <add>, %368, %cst_158 [1] : vector<18x64xf32> to vector<18xf32>
    %370 = vector.shape_cast %369 : vector<18xf32> to vector<18x1xf32>
    %cst_159 = arith.constant 6.400000e+01 : f32
    %371 = vector.broadcast %cst_159 : f32 to vector<18x1xf32>
    %372 = arith.divf %370, %371 : vector<18x1xf32>
    %373 = vector.broadcast %365 : vector<18x1xf32> to vector<18x64xf32>
    %374 = arith.subf %357, %373 : vector<18x64xf32>
    %cst_160 = arith.constant 9.99999996E-13 : f32
    %375 = vector.broadcast %cst_160 : f32 to vector<18x1xf32>
    %376 = arith.addf %372, %375 : vector<18x1xf32>
    %377 = math.rsqrt %376 : vector<18x1xf32>
    %378 = vector.broadcast %377 : vector<18x1xf32> to vector<18x64xf32>
    %379 = arith.mulf %374, %378 : vector<18x64xf32>
    %380 = vector.broadcast %359 : vector<1x64xf32> to vector<18x64xf32>
    %381 = arith.mulf %379, %380 : vector<18x64xf32>
    %382 = vector.broadcast %361 : vector<1x64xf32> to vector<18x64xf32>
    %383 = arith.addf %381, %382 : vector<18x64xf32>
    %384 = arith.truncf %383 : vector<18x64xf32> to vector<18x64xbf16>
    %c1_161 = arith.constant 1 : index
    %c0_162 = arith.constant 0 : index
    %c0_163 = arith.constant 0 : index
    %385 = vector.load %arg18[%c1_161, %c0_162, %c0_163] : memref<2x64x256xbf16, #tpu.memory_space<vmem>>, vector<1x64x256xbf16>
    %386 = vector.shape_cast %385 : vector<1x64x256xbf16> to vector<64x256xbf16>
    %cst_164 = arith.constant dense<0.000000e+00> : vector<18x256xf32>
    %387 = tpu.matmul %384, %386, %cst_164 {dimension_numbers = #tpu.dot_dimension_numbers<[1], [0], [0], [1], [0, 0, 1, 1], [], []>} : vector<18x64xbf16>, vector<64x256xbf16>, vector<18x256xf32> -> vector<18x256xf32>
    %c1_165 = arith.constant 1 : index
    %c0_166 = arith.constant 0 : index
    %c0_167 = arith.constant 0 : index
    %388 = vector.load %arg19[%c1_165, %c0_166, %c0_167] : memref<2x1x256xf32, #tpu.memory_space<vmem>>, vector<1x1x256xf32>
    %389 = vector.shape_cast %388 : vector<1x1x256xf32> to vector<1x256xf32>
    %390 = vector.broadcast %389 : vector<1x256xf32> to vector<18x256xf32>
    %391 = arith.addf %387, %390 : vector<18x256xf32>
    %cst_168 = arith.constant 5.000000e-01 : f32
    %392 = vector.broadcast %cst_168 : f32 to vector<18x256xf32>
    %393 = arith.mulf %392, %391 : vector<18x256xf32>
    %cst_169 = arith.constant 4.471500e-02 : f32
    %394 = vector.broadcast %cst_169 : f32 to vector<18x256xf32>
    %395 = arith.mulf %394, %391 : vector<18x256xf32>
    %396 = arith.mulf %395, %391 : vector<18x256xf32>
    %397 = arith.mulf %396, %391 : vector<18x256xf32>
    %398 = arith.addf %391, %397 : vector<18x256xf32>
    %cst_170 = arith.constant 0.797884583 : f32
    %399 = vector.broadcast %cst_170 : f32 to vector<18x256xf32>
    %400 = arith.mulf %399, %398 : vector<18x256xf32>
    %401 = math.tanh %400 : vector<18x256xf32>
    %cst_171 = arith.constant 1.000000e+00 : f32
    %402 = vector.broadcast %cst_171 : f32 to vector<18x256xf32>
    %403 = arith.addf %402, %401 : vector<18x256xf32>
    %404 = arith.mulf %393, %403 : vector<18x256xf32>
    %405 = arith.truncf %404 : vector<18x256xf32> to vector<18x256xbf16>
    %c1_172 = arith.constant 1 : index
    %c0_173 = arith.constant 0 : index
    %c0_174 = arith.constant 0 : index
    %406 = vector.load %arg20[%c1_172, %c0_173, %c0_174] : memref<2x256x64xbf16, #tpu.memory_space<vmem>>, vector<1x256x64xbf16>
    %407 = vector.shape_cast %406 : vector<1x256x64xbf16> to vector<256x64xbf16>
    %cst_175 = arith.constant dense<0.000000e+00> : vector<18x64xf32>
    %408 = tpu.matmul %405, %407, %cst_175 {dimension_numbers = #tpu.dot_dimension_numbers<[1], [0], [0], [1], [0, 0, 1, 1], [], []>} : vector<18x256xbf16>, vector<256x64xbf16>, vector<18x64xf32> -> vector<18x64xf32>
    %c1_176 = arith.constant 1 : index
    %c0_177 = arith.constant 0 : index
    %c0_178 = arith.constant 0 : index
    %409 = vector.load %arg21[%c1_176, %c0_177, %c0_178] : memref<2x1x64xf32, #tpu.memory_space<vmem>>, vector<1x1x64xf32>
    %410 = vector.shape_cast %409 : vector<1x1x64xf32> to vector<1x64xf32>
    %411 = vector.broadcast %410 : vector<1x64xf32> to vector<18x64xf32>
    %412 = arith.addf %408, %411 : vector<18x64xf32>
    %413 = arith.addf %412, %383 : vector<18x64xf32>
    %c1_179 = arith.constant 1 : index
    %c0_180 = arith.constant 0 : index
    %c0_181 = arith.constant 0 : index
    %414 = vector.load %arg22[%c1_179, %c0_180, %c0_181] : memref<2x1x64xf32, #tpu.memory_space<vmem>>, vector<1x1x64xf32>
    %415 = vector.shape_cast %414 : vector<1x1x64xf32> to vector<1x64xf32>
    %c1_182 = arith.constant 1 : index
    %c0_183 = arith.constant 0 : index
    %c0_184 = arith.constant 0 : index
    %416 = vector.load %arg23[%c1_182, %c0_183, %c0_184] : memref<2x1x64xf32, #tpu.memory_space<vmem>>, vector<1x1x64xf32>
    %417 = vector.shape_cast %416 : vector<1x1x64xf32> to vector<1x64xf32>
    %cst_185 = arith.constant dense<0.000000e+00> : vector<18xf32>
    %418 = vector.multi_reduction <add>, %413, %cst_185 [1] : vector<18x64xf32> to vector<18xf32>
    %419 = vector.shape_cast %418 : vector<18xf32> to vector<18x1xf32>
    %cst_186 = arith.constant 6.400000e+01 : f32
    %420 = vector.broadcast %cst_186 : f32 to vector<18x1xf32>
    %421 = arith.divf %419, %420 : vector<18x1xf32>
    %422 = vector.broadcast %421 : vector<18x1xf32> to vector<18x64xf32>
    %423 = arith.subf %413, %422 : vector<18x64xf32>
    %424 = arith.mulf %423, %423 : vector<18x64xf32>
    %cst_187 = arith.constant dense<0.000000e+00> : vector<18xf32>
    %425 = vector.multi_reduction <add>, %424, %cst_187 [1] : vector<18x64xf32> to vector<18xf32>
    %426 = vector.shape_cast %425 : vector<18xf32> to vector<18x1xf32>
    %cst_188 = arith.constant 6.400000e+01 : f32
    %427 = vector.broadcast %cst_188 : f32 to vector<18x1xf32>
    %428 = arith.divf %426, %427 : vector<18x1xf32>
    %429 = vector.broadcast %421 : vector<18x1xf32> to vector<18x64xf32>
    %430 = arith.subf %413, %429 : vector<18x64xf32>
    %cst_189 = arith.constant 9.99999996E-13 : f32
    %431 = vector.broadcast %cst_189 : f32 to vector<18x1xf32>
    %432 = arith.addf %428, %431 : vector<18x1xf32>
    %433 = math.rsqrt %432 : vector<18x1xf32>
    %434 = vector.broadcast %433 : vector<18x1xf32> to vector<18x64xf32>
    %435 = arith.mulf %430, %434 : vector<18x64xf32>
    %436 = vector.broadcast %415 : vector<1x64xf32> to vector<18x64xf32>
    %437 = arith.mulf %435, %436 : vector<18x64xf32>
    %438 = vector.broadcast %417 : vector<1x64xf32> to vector<18x64xf32>
    %439 = arith.addf %437, %438 : vector<18x64xf32>
    %c0_190 = arith.constant 0 : index
    %c0_191 = arith.constant 0 : index
    %440 = vector.load %arg24[%c0_190, %c0_191] : memref<18x64xf32, #tpu.memory_space<vmem>>, vector<18x64xf32>
    tpu.vector_store %arg24[%c0_190, %c0_191], %439 {strides = array<i32>} : memref<18x64xf32, #tpu.memory_space<vmem>>, vector<18x64xf32>,
    return
  }
  func.func @transform_0(%arg0: i32) -> (i32, i32) {
    %c0_i32 = arith.constant 0 : i32
    %c0_i32_0 = arith.constant 0 : i32
    %c0_i32_1 = arith.constant 0 : i32
    return %c0_i32, %c0_i32_0 : i32, i32
  }
  func.func @transform_1(%arg0: i32) -> (i32, i32) {
    %c0_i32 = arith.constant 0 : i32
    %c0_i32_0 = arith.constant 0 : i32
    %c0_i32_1 = arith.constant 0 : i32
    return %c0_i32, %c0_i32_0 : i32, i32
  }
  func.func @transform_2(%arg0: i32) -> (i32, i32) {
    %c0_i32 = arith.constant 0 : i32
    %c0_i32_0 = arith.constant 0 : i32
    %c0_i32_1 = arith.constant 0 : i32
    return %c0_i32, %c0_i32_0 : i32, i32
  }
  func.func @transform_3(%arg0: i32) -> (i32, i32) {
    %c0_i32 = arith.constant 0 : i32
    %c0_i32_0 = arith.constant 0 : i32
    %c0_i32_1 = arith.constant 0 : i32
    return %c0_i32, %c0_i32_0 : i32, i32
  }
  func.func @transform_4(%arg0: i32) -> (i32, i32, i32) {
    %c0_i32 = arith.constant 0 : i32
    %c0_i32_0 = arith.constant 0 : i32
    %c0_i32_1 = arith.constant 0 : i32
    %c0_i32_2 = arith.constant 0 : i32
    return %c0_i32, %c0_i32_0, %c0_i32_1 : i32, i32, i32
  }
  func.func @transform_5(%arg0: i32) -> (i32, i32) {
    %c0_i32 = arith.constant 0 : i32
    %c0_i32_0 = arith.constant 0 : i32
    %c0_i32_1 = arith.constant 0 : i32
    return %c0_i32, %c0_i32_0 : i32, i32
  }
  func.func @transform_6(%arg0: i32) -> (i32, i32) {
    %c0_i32 = arith.constant 0 : i32
    %c0_i32_0 = arith.constant 0 : i32
    %c0_i32_1 = arith.constant 0 : i32
    return %c0_i32, %c0_i32_0 : i32, i32
  }
  func.func @transform_7(%arg0: i32) -> (i32, i32) {
    %c0_i32 = arith.constant 0 : i32
    %c0_i32_0 = arith.constant 0 : i32
    %c0_i32_1 = arith.constant 0 : i32
    return %c0_i32, %c0_i32_0 : i32, i32
  }
  func.func @transform_8(%arg0: i32) -> (i32, i32) {
    %c0_i32 = arith.constant 0 : i32
    %c0_i32_0 = arith.constant 0 : i32
    %c0_i32_1 = arith.constant 0 : i32
    return %c0_i32, %c0_i32_0 : i32, i32
  }
  func.func @transform_9(%arg0: i32) -> (i32, i32) {
    %c0_i32 = arith.constant 0 : i32
    %c0_i32_0 = arith.constant 0 : i32
    %c0_i32_1 = arith.constant 0 : i32
    return %c0_i32, %c0_i32_0 : i32, i32
  }
  func.func @transform_10(%arg0: i32) -> (i32, i32) {
    %c0_i32 = arith.constant 0 : i32
    %c0_i32_0 = arith.constant 0 : i32
    %c0_i32_1 = arith.constant 0 : i32
    return %c0_i32, %c0_i32_0 : i32, i32
  }
  func.func @transform_11(%arg0: i32) -> (i32, i32, i32) {
    %c0_i32 = arith.constant 0 : i32
    %c0_i32_0 = arith.constant 0 : i32
    %c0_i32_1 = arith.constant 0 : i32
    %c0_i32_2 = arith.constant 0 : i32
    return %c0_i32, %c0_i32_0, %c0_i32_1 : i32, i32, i32
  }
  func.func @transform_12(%arg0: i32) -> (i32, i32, i32) {
    %c0_i32 = arith.constant 0 : i32
    %c0_i32_0 = arith.constant 0 : i32
    %c0_i32_1 = arith.constant 0 : i32
    %c0_i32_2 = arith.constant 0 : i32
    return %c0_i32, %c0_i32_0, %c0_i32_1 : i32, i32, i32
  }
  func.func @transform_13(%arg0: i32) -> (i32, i32, i32) {
    %c0_i32 = arith.constant 0 : i32
    %c0_i32_0 = arith.constant 0 : i32
    %c0_i32_1 = arith.constant 0 : i32
    %c0_i32_2 = arith.constant 0 : i32
    return %c0_i32, %c0_i32_0, %c0_i32_1 : i32, i32, i32
  }
  func.func @transform_14(%arg0: i32) -> (i32, i32, i32) {
    %c0_i32 = arith.constant 0 : i32
    %c0_i32_0 = arith.constant 0 : i32
    %c0_i32_1 = arith.constant 0 : i32
    %c0_i32_2 = arith.constant 0 : i32
    return %c0_i32, %c0_i32_0, %c0_i32_1 : i32, i32, i32
  }
  func.func @transform_15(%arg0: i32) -> (i32, i32, i32) {
    %c0_i32 = arith.constant 0 : i32
    %c0_i32_0 = arith.constant 0 : i32
    %c0_i32_1 = arith.constant 0 : i32
    %c0_i32_2 = arith.constant 0 : i32
    return %c0_i32, %c0_i32_0, %c0_i32_1 : i32, i32, i32
  }
  func.func @transform_16(%arg0: i32) -> (i32, i32, i32) {
    %c0_i32 = arith.constant 0 : i32
    %c0_i32_0 = arith.constant 0 : i32
    %c0_i32_1 = arith.constant 0 : i32
    %c0_i32_2 = arith.constant 0 : i32
    return %c0_i32, %c0_i32_0, %c0_i32_1 : i32, i32, i32
  }
  func.func @transform_17(%arg0: i32) -> (i32, i32, i32) {
    %c0_i32 = arith.constant 0 : i32
    %c0_i32_0 = arith.constant 0 : i32
    %c0_i32_1 = arith.constant 0 : i32
    %c0_i32_2 = arith.constant 0 : i32
    return %c0_i32, %c0_i32_0, %c0_i32_1 : i32, i32, i32
  }
  func.func @transform_18(%arg0: i32) -> (i32, i32, i32) {
    %c0_i32 = arith.constant 0 : i32
    %c0_i32_0 = arith.constant 0 : i32
    %c0_i32_1 = arith.constant 0 : i32
    %c0_i32_2 = arith.constant 0 : i32
    return %c0_i32, %c0_i32_0, %c0_i32_1 : i32, i32, i32
  }
  func.func @transform_19(%arg0: i32) -> (i32, i32, i32) {
    %c0_i32 = arith.constant 0 : i32
    %c0_i32_0 = arith.constant 0 : i32
    %c0_i32_1 = arith.constant 0 : i32
    %c0_i32_2 = arith.constant 0 : i32
    return %c0_i32, %c0_i32_0, %c0_i32_1 : i32, i32, i32
  }
  func.func @transform_20(%arg0: i32) -> (i32, i32, i32) {
    %c0_i32 = arith.constant 0 : i32
    %c0_i32_0 = arith.constant 0 : i32
    %c0_i32_1 = arith.constant 0 : i32
    %c0_i32_2 = arith.constant 0 : i32
    return %c0_i32, %c0_i32_0, %c0_i32_1 : i32, i32, i32
  }
  func.func @transform_21(%arg0: i32) -> (i32, i32, i32) {
    %c0_i32 = arith.constant 0 : i32
    %c0_i32_0 = arith.constant 0 : i32
    %c0_i32_1 = arith.constant 0 : i32
    %c0_i32_2 = arith.constant 0 : i32
    return %c0_i32, %c0_i32_0, %c0_i32_1 : i32, i32, i32
  }
  func.func @transform_22(%arg0: i32) -> (i32, i32, i32) {
    %c0_i32 = arith.constant 0 : i32
    %c0_i32_0 = arith.constant 0 : i32
    %c0_i32_1 = arith.constant 0 : i32
    %c0_i32_2 = arith.constant 0 : i32
    return %c0_i32, %c0_i32_0, %c0_i32_1 : i32, i32, i32
  }
  func.func @transform_23(%arg0: i32) -> (i32, i32) {
    %c0_i32 = arith.constant 0 : i32
    %c0_i32_0 = arith.constant 0 : i32
    %c0_i32_1 = arith.constant 0 : i32
    return %c0_i32, %c0_i32_0 : i32, i32
  }
}

</mosaic_0001>

<bundles_post_ra>
// kernel: eq.17
= control target key start
LH: loop header
LB: loop body
LE: loop exit
PB: predicated region body
PF: predicated region fallthrough
CT: control target
= control target key end

     0   :  { %vm7_vm0 = vcmask 72704   ;;  %vm13_vm1 = vcmask 146504   ;;  %s39_s0 = inlined_call_operand.vmem [shape: s32[2,9], index: 0, kind: input, shape index: {}]   ;;  %s40_s1 = inlined_call_operand.vmem [shape: s32[18], index: 1, kind: output, shape index: {}]  }
   0x1   :  { %v4_v0 = vld [vmem:[%s39_s0] sm:$0x3]  ;;  %s22_s0 = smov 9  }
   0x2   :  { %5 = vst [vmem:[#allocation1] sm:$0x3] %v4_v0 }
   0x9   :  { %v10_v1 = vld [vmem:[#allocation1 + $0x1] sm:$0x1]   ;;  %v6_v2 = vld [vmem:[#allocation1] sm:$0x1]  }
   0xa   :  { %11 = vrot.lane.b32.xlu0 %v10_v1, %s22_s0  ;;  %8 = vst.msk [vmem:[#allocation0] sm:$0x1] %vm7_vm0, %v6_v2  }
  0x7c   :  { %v12_v3 = vpop.permute.xlu0 %11  }
  0x7d   :  { %14 = vst.msk [vmem:[#allocation0] sm:$0x1] %vm13_vm1, %v12_v3  }
  0x84   :  { %v17_v4 = vld [vmem:[#allocation0] sm:$0x1] }
  0x85   :  { %20 = vst [vmem:[%s40_s1] sm:$0x1] %v17_v4 }

// kernel: forward.1
= control target key start
LH: loop header
LB: loop body
LE: loop exit
PB: predicated region body
PF: predicated region fallthrough
CT: control target
= control target key end

     0   :  { %vm100_vm0 = vcmask 261120   ;;  %v3219_v16 = vmov 0   ;;  %vm245_vm1 = vcmask 523264   ;;  %vm252_vm2 = vcmask 517120   ;;  %s4320_s5 = inlined_call_operand.vmem [shape: bf16[32,128], index: 5, kind: input, shape index: {}]   ;;  %s4321_s0 = inlined_call_operand.vmem [shape: f32[18,32], index: 0, kind: input, shape index: {}]   ;;  %s4322_s7 = inlined_call_operand.vmem [shape: bf16[128,64], index: 7, kind: input, shape index: {}]   ;;  %s4323_s6 = inlined_call_operand.vmem [shape: f32[1,128], index: 6, kind: input, shape index: {}]   ;;  %s4324_s8 = inlined_call_operand.vmem [shape: f32[1,64], index: 8, kind: input, shape index: {}]   ;;  %s4325_s2 = inlined_call_operand.vmem [shape: f32[18,1], index: 2, kind: input, shape index: {}]   ;;  %s4326_s1 = inlined_call_operand.vmem [shape: f32[18,64], index: 1, kind: input, shape index: {}]   ;;  %s4327_s9 = inlined_call_operand.vmem [shape: f32[1,64], index: 9, kind: input, shape index: {}]   ;;  %s4328_s10 = inlined_call_operand.vmem [shape: f32[1,64], index: 10, kind: input, shape index: {}]   ;;  %s4329_s4 = inlined_call_operand.vmem [shape: f32[4,1,64], index: 4, kind: input, shape index: {}]   ;;  %s4330_s11 = inlined_call_operand.vmem [shape: bf16[2,64,192], index: 11, kind: input, shape index: {}]   ;;  %s4331_s12 = inlined_call_operand.vmem [shape: f32[2,1,192], index: 12, kind: input, shape index: {}]   ;;  %s4332_s3 = inlined_call_operand.vmem [shape: f32[18,18], index: 3, kind: input, shape index: {}]   ;;  %s4333_s13 = inlined_call_operand.vmem [shape: bf16[2,64,64], index: 13, kind: input, shape index: {}]   ;;  %s4334_s14 = inlined_call_operand.vmem [shape: f32[2,1,64], index: 14, kind: input, shape index: {}]   ;;  %s4335_s15 = inlined_call_operand.vmem [shape: f32[2,1,64], index: 15, kind: input, shape index: {}]   ;;  %s4336_s16 = inlined_call_operand.vmem [shape: f32[2,1,64], index: 16, kind: input, shape index: {}]   ;;  %s4337_s17 = inlined_call_operand.vmem [shape: bf16[2,64,256], index: 17, kind: input, shape index: {}]   ;;  %s4338_s20 = inlined_call_operand.vmem [shape: f32[2,1,64], index: 20, kind: input, shape index: {}]   ;;  %s4339_s19 = inlined_call_operand.vmem [shape: bf16[2,256,64], index: 19, kind: input, shape index: {}]   ;;  %s4340_s18 = inlined_call_operand.vmem [shape: f32[2,1,256], index: 18, kind: input, shape index: {}]   ;;  %s4341_s21 = inlined_call_operand.vmem [shape: f32[2,1,64], index: 21, kind: input, shape index: {}]   ;;  %s4342_s22 = inlined_call_operand.vmem [shape: f32[2,1,64], index: 22, kind: input, shape index: {}]   ;;  %s4343_s23 = inlined_call_operand.vmem [shape: f32[18,64], index: 23, kind: output, shape index: {}]  }
   0x1   :  { %4349 = sst [smem:[#allocation2_spill]] %s4320_s5  ;;  %3032 = vset.pattern.permute.xlu0 %v3219_v16  ;;  %3033 = vset.pattern.permute.xlu1 %v3219_v16  ;;  %v3220_v55 = vmov 64.0   ;;  %vm605_vm13 = vcmask 1040384   ;;  %vm483_vm14 = vcmask 146432   ;;  %vm490_vm15 = vcmask 140288  }
   0x2   :  { %4350 = sst [smem:[#allocation3_spill]] %s4321_s0 }
   0x3   :  { %4351 = sst [smem:[#allocation4_spill]] %s4322_s7 }
   0x4   :  { %4352 = sst [smem:[#allocation5_spill]] %s4323_s6 }
   0x5   :  { %4353 = sst [smem:[#allocation6_spill]] %s4324_s8 }
   0x6   :  { %4354 = sst [smem:[#allocation7_spill]] %s4325_s2 }
   0x7   :  { %4355 = sst [smem:[#allocation8_spill]] %s4326_s1  ;;  %s3221_s1 = smov 64  }
   0x8   :  { %4356 = sst [smem:[#allocation9_spill]] %s4327_s9 }
   0x9   :  { %s4357_s24 = sld [smem:[#allocation2_spill]] }
   0xa   :  { %s4358_s26 = sld [smem:[#allocation4_spill]] }
   0xb   :  { %s4359_s9 = sld [smem:[#allocation3_spill]] }
   0xc   :  { %s4361_s27 = sld [smem:[#allocation5_spill]] }
   0xd   :  { %s4362_s29 = sld [smem:[#allocation6_spill]] }
   0xe   :  { %s4363_s8 = sld [smem:[#allocation8_spill]] }
   0xf   :  { %v2940_v0 = vld [vmem:[%s4357_s24 + $0x8] sm:$0xff]  ;;  %v2939_v1 = vld [vmem:[%s4357_s24] sm:$0xff]  ;;  %s4360_s24 = sld [smem:[#allocation7_spill]] }
  0x10   :  { %v2948_v2 = vld [vmem:[%s4358_s26 + $0x38] sm:$0xff]  ;;  %113 = vmatpush.bf16.msra.mxu0 %v2940_v0  ;;  %v2947_v6 = vld [vmem:[%s4358_s26 + $0x30] sm:$0xff]  ;;  %v2946_v7 = vld [vmem:[%s4358_s26 + $0x28] sm:$0xff] }
  0x11   :  { %v75_v3 = vld [vmem:[%s4359_s9] sm:$0xff]  ;;  %v76_v4 = vld [vmem:[%s4359_s9 + $0x8] sm:$0xff]  ;;  %3021 = vmatpush.bf16.msra.mxu1 %v2948_v2  ;;  %v77_v8 = vld [vmem:[%s4359_s9 + $0x10] sm:$0x3] }
  0x12   :  { %v78_v5 = vpack.c.bf16 %v76_v4, %v75_v3  ;;  %v79_v9 = vpack.c.bf16 %v77_v8, %v77_v8  ;;  %v2945_v10 = vld [vmem:[%s4358_s26 + $0x20] sm:$0xff]  ;;  %v2944_v11 = vld [vmem:[%s4358_s26 + $0x18] sm:$0xff]  ;;  %v2943_v12 = vld [vmem:[%s4358_s26 + $0x10] sm:$0xff] }
  0x13   :  { %v2942_v13 = vld [vmem:[%s4358_s26 + $0x8] sm:$0xff]  ;;  %v2941_v14 = vld [vmem:[%s4358_s26] sm:$0xff] }
  0x14   :  { %114 = vmatpush.bf16.msra.mxu0 %v2939_v1  ;;  %v3034_v20 = vld [vmem:[%s4361_s27] ss:$0 sm:$0xff]  ;;  %v238_v45 = vld [vmem:[%s4363_s8 + $0x8] sm:$0xff]  ;;  %v239_v50 = vld [vmem:[%s4363_s8 + $0x10] sm:$0x3]  ;;  %s4364_s27 = sld [smem:[#allocation9_spill]] }
  0x15   :  { %3022 = vmatpush.bf16.msra.mxu1 %v2947_v6  ;;  %v216_v15 = vld [vmem:[%s4360_s24] sm:$0xff]  ;;  %v217_v17 = vld [vmem:[%s4360_s24 + $0x8] sm:$0xff]  ;;  %v218_v18 = vld [vmem:[%s4360_s24 + $0x10] sm:$0x3] }
  0x16   :  { %221 = vperm.xlu0 %3032, %v216_v15   ;;  %231 = vperm.xlu1 %3033, %v218_v18   ;;  %v3035_v32 = vld [vmem:[%s4362_s29] ss:$0 sm:$0xff]  ;;  %v2955_v15 = vld [vmem:[%s4330_s11 + $0x34] sm:$0xf] }
  0x17   :  { %2498 = vmatmul.msk.bf16.vlgmr.msra.gmra.mxu0 %vm100_vm0, %v78_v5  ;;  %v237_v36 = vld [vmem:[%s4363_s8] sm:$0xff] }
  0x18   :  { %198 = vmatpush.bf16.msrb.mxu0 %v2948_v2 }
  0x19   :  { %3023 = vmatpush.bf16.msra.mxu1 %v2946_v7 }
  0x1c   :  { %199 = vmatpush.bf16.msrb.mxu0 %v2947_v6 }
  0x1d   :  { %3024 = vmatpush.bf16.msra.mxu1 %v2945_v10 }
  0x1e   :  { %226 = vperm.xlu0 %3032, %v217_v17   ;;  %v2560_v17 = vld [vmem:[%s4330_s11 + $0x38] sm:$0xf0] }
  0x1f   :  { %v2563_v18 = vor.u32 %v2955_v15, %v2560_v17 }
  0x20   :  { %200 = vmatpush.bf16.msrb.mxu0 %v2946_v7 }
  0x21   :  { %3025 = vmatpush.bf16.msra.mxu1 %v2944_v11  ;;  %419 = vmatpush.bf16.msra.mxu3 %v2563_v18  ;;  %v345_v18 = vld [vmem:[%s4331_s12] sm:$0x3] }
  0x24   :  { %201 = vmatpush.bf16.msrb.mxu0 %v2945_v10 }
  0x25   :  { %3026 = vmatpush.bf16.msra.mxu1 %v2943_v12 }
  0x27   :  { %2499 = vmatmul.msk.bf16.gmra.mxu0 %vm100_vm0, %v79_v9 }
  0x28   :  { %202 = vmatpush.bf16.msrb.mxu0 %v2944_v11 }
  0x29   :  { %3027 = vmatpush.bf16.msra.mxu1 %v2942_v13 }
  0x2c   :  { %203 = vmatpush.bf16.msrb.mxu0 %v2943_v12 }
  0x2d   :  { %3028 = vmatpush.bf16.msra.mxu1 %v2941_v14 }
  0x30   :  { %204 = vmatpush.bf16.msrb.mxu0 %v2942_v13  ;;  %v2558_v13 = vld [vmem:[%s4330_s11 + $0x30] sm:$0xf] }
  0x34   :  { %205 = vmatpush.bf16.msrb.mxu0 %v2941_v14  ;;  %v2956_v14 = vld [vmem:[%s4330_s11 + $0x34] sm:$0xf0] }
  0x35   :  { %v2559_v16 = vor.u32 %v2956_v14, %v2558_v13 }
  0x37   :  { %401 = vmatpush.bf16.msra.mxu2 %v2559_v16 }
  0x88   :  { %v222_v33 = vpop.permute.xlu0 %221  ;;  %v232_v46 = vpop.permute.xlu1 %231 }
  0x90   :  { %v227_v44 = vpop.permute.xlu0 %226 }
  0x94   :  { %v116_v19 = vpop.f32.mrf.mxu0 }
  0x95   :  { %v117_v21 = vadd.f32 %v3034_v20, %v116_v19  ;;  %v2550_v19 = vld [vmem:[%s4330_s11 + $0x20] sm:$0xf] }
  0x97   :  { %3054 = vtanh.f32 %v117_v21  ;;  %v2953_v21 = vld [vmem:[%s4330_s11 + $0x24] sm:$0xf] }
  0x9c   :  { %v118_v22 = vpop.f32.mrf.mxu0 }
  0x9d   :  { %v119_v23 = vadd.f32 %v3034_v20, %v118_v22  ;;  %v3055_v24 = vpop.eup %3054 }
  0x9f   :  { %3056 = vtanh.f32 %v119_v23  ;;  %v2552_v23 = vld [vmem:[%s4330_s11 + $0x28] sm:$0xf0] }
  0xa4   :  { %v121_v25 = vpop.f32.mrf.mxu0 }
  0xa5   :  { %v3057_v26 = vpop.eup %3056  ;;  %v122_v27 = vadd.f32 %v3034_v20, %v121_v25  ;;  %v2954_v20 = vld [vmem:[%s4330_s11 + $0x24] sm:$0xf0]  ;;  %v2542_v25 = vld [vmem:[%s4330_s11 + $0x10] sm:$0xf] }
  0xa6   :  { %v128_v28 = vpack.c.bf16 %v3057_v26, %v3055_v24  ;;  %v2551_v22 = vor.u32 %v2954_v20, %v2550_v19  ;;  %v2555_v24 = vor.u32 %v2953_v21, %v2552_v23  ;;  %v2952_v26 = vld [vmem:[%s4330_s11 + $0x14] sm:$0xf0]  ;;  %v347_v19 = vperm.slane %v345_v18, 0 }
  0xa7   :  { %3058 = vtanh.f32 %v122_v27  ;;  %v2951_v27 = vld [vmem:[%s4330_s11 + $0x14] sm:$0xf]  ;;  %v348_v23 = vperm.slane %v345_v18, 1 }
  0xa8   :  { %206 = vmatmul.bf16.vlgmr.msrb.gmra.mxu0 %v128_v28  ;;  %3060 = vrcp.f32 %v3220_v55  ;;  %402 = vmatpush.bf16.msra.mxu2 %v2551_v22  ;;  %v2543_v28 = vor.u32 %v2952_v26, %v2542_v25 }
  0xa9   :  { %420 = vmatpush.bf16.msra.mxu3 %v2555_v24  ;;  %v3508_v24 = vld [vmem:[%s4329_s4 + $0x2] ss:$0 sm:$0xff] }
  0xac   :  { %v123_v29 = vpop.f32.mrf.mxu0  ;;  %403 = vmatpush.bf16.msra.mxu2 %v2543_v28 }
  0xad   :  { %v3059_v30 = vpop.eup %3058  ;;  %v2544_v29 = vld [vmem:[%s4330_s11 + $0x18] sm:$0xf0] }
  0xae   :  { %v129_v31 = vpack.c.bf16 %v3059_v30, %v3059_v30  ;;  %v3061_v56 = vpop.eup %3060  ;;  %v2547_v30 = vor.u32 %v2951_v27, %v2544_v29 }
  0xaf   :  { %v257_v57 = vmul.f32 64.0, %v3061_v56  ;;  %vm261_vm3 = vweird.f32 %v3061_v56 }
  0xb0   :  { %211 = vmatmul.bf16.vlgmr.msra.gmra.mxu1 %v129_v31  ;;  %421 = vmatpush.bf16.msra.mxu3 %v2547_v30  ;;  %v3513_v30 = vld [vmem:[%s4329_s4] ss:$0 sm:$0xff] }
  0xb1   :  { %v258_v58 = vsub.f32 1.0, %v257_v57 }
  0xb3   :  { %v259_v59 = vmul.f32 %v3061_v56, %v258_v58 }
  0xb5   :  { %v260_v60 = vadd.f32 %v3061_v56, %v259_v59 }
  0xb7   :  { %v3408_v61 = vsel %vm261_vm3, %v3061_v56, %v260_v60  ;;  %v3036_v60 = vld [vmem:[%s4364_s27] ss:$0 sm:$0xff] }
 0x125   :  { %v207_v34 = vpop.f32.mrf.mxu0 }
 0x126   :  { %v208_v35 = vadd.f32 %v3035_v32, %v207_v34  ;;  %v2950_v34 = vld [vmem:[%s4330_s11 + $0x4] sm:$0xf0] }
 0x128   :  { %v234_v37 = vmul.f32 %v222_v33, %v208_v35  ;;  %v2534_v33 = vld [vmem:[%s4330_s11] sm:$0xf]  ;;  %v2949_v35 = vld [vmem:[%s4330_s11 + $0x4] sm:$0xf] }
 0x12a   :  { %v240_v38 = vadd.f32 %v237_v36, %v234_v37  ;;  %v2535_v36 = vor.u32 %v2950_v34, %v2534_v33  ;;  %v2536_v37 = vld [vmem:[%s4330_s11 + $0x8] sm:$0xf0] }
 0x12c   :  { %v246_v39 = vsel %vm245_vm1, %v240_v38, 0.0  ;;  %404 = vmatpush.bf16.msra.mxu2 %v2535_v36  ;;  %v3529_v36 = vld [vmem:[%s4329_s4 + $0x1] ss:$0 sm:$0xff] }
 0x12d   :  { %v209_v40 = vpop.f32.mrf.mxu0  ;;  %247 = vadd.xlane.f32.xlu1 %v246_v39  ;;  %v212_v41 = vpop.f32.mrf.mxu1  ;;  %v2539_v39 = vor.u32 %v2949_v35, %v2536_v37 }
 0x12e   :  { %v210_v42 = vadd.f32 %v3035_v32, %v209_v40  ;;  %v213_v43 = vadd.f32 %v3035_v32, %v212_v41 }
 0x12f   :  { %422 = vmatpush.bf16.msra.mxu3 %v2539_v39 }
 0x130   :  { %v235_v47 = vmul.f32 %v227_v44, %v210_v42  ;;  %v236_v49 = vmul.f32 %v232_v46, %v213_v43 }
 0x132   :  { %v241_v48 = vadd.f32 %v238_v45, %v235_v47  ;;  %v242_v53 = vadd.f32 %v239_v50, %v236_v49 }
 0x134   :  { %v249_v51 = vsel %vm245_vm1, %v241_v48, 0.0  ;;  %v253_v54 = vsel %vm252_vm2, %v242_v53, 0.0 }
 0x135   :  { %250 = vadd.xlane.f32.xlu2 %v249_v51  ;;  %v214_v52 = vpop.f32.mrf.mxu1 }
 0x13d   :  { %254 = vadd.xlane.f32.xlu2 %v253_v54 }
 0x1a0   :  { %v248_v62 = vpop.xlane.xlu1 %247 }
 0x1a1   :  { %v263_v63 = vmul.f32 %v3408_v61, %v248_v62 }
 0x1a3   :  { %v3411_v0 = vsub.f32 %v240_v38, %v263_v63 }
 0x1a5   :  { %v269_v1 = vmul.f32 %v3411_v0, %v3411_v0 }
 0x1a7   :  { %v272_v2 = vsel %vm245_vm1, %v269_v1, 0.0 }
 0x1a8   :  { %v251_v3 = vpop.xlane.xlu2 %250  ;;  %273 = vadd.xlane.f32.xlu0 %v272_v2 }
 0x1a9   :  { %v264_v4 = vmul.f32 %v3408_v61, %v251_v3 }
 0x1ab   :  { %v3417_v5 = vsub.f32 %v241_v48, %v264_v4 }
 0x1ad   :  { %v270_v6 = vmul.f32 %v3417_v5, %v3417_v5 }
 0x1af   :  { %v275_v7 = vsel %vm245_vm1, %v270_v6, 0.0  ;;  %v3037_v6 = vld [vmem:[%s4328_s10] ss:$0 sm:$0xff] }
 0x1b0   :  { %276 = vadd.xlane.f32.xlu2 %v275_v7  ;;  %v255_v8 = vpop.xlane.xlu2 %254 }
 0x1b1   :  { %v265_v9 = vmul.f32 %v3408_v61, %v255_v8 }
 0x1b3   :  { %v3423_v10 = vsub.f32 %v242_v53, %v265_v9 }
 0x1b5   :  { %v271_v11 = vmul.f32 %v3423_v10, %v3423_v10 }
 0x1b7   :  { %v278_v12 = vsel %vm252_vm2, %v271_v11, 0.0 }
 0x1b8   :  { %279 = vadd.xlane.f32.xlu2 %v278_v12 }
 0x21b   :  { %v274_v31 = vpop.xlane.xlu0 %273 }
 0x21c   :  { %v281_v32 = vmul.f32 %v274_v31, %v3408_v61  ;;  %v3518_v31 = vld [vmem:[%s4329_s4 + $0x3] ss:$0 sm:$0xff] }
 0x21e   :  { %v284_v38 = vadd.f32 1e-12, %v281_v32 }
 0x220   :  { %3062 = vrsqrt.f32 %v284_v38  ;;  %vm293_vm5 = vweird.f32 %v284_v38 }
 0x223   :  { %v277_v40 = vpop.xlane.xlu2 %276 }
 0x224   :  { %v282_v41 = vmul.f32 %v277_v40, %v3408_v61 }
 0x226   :  { %v3063_v42 = vpop.eup %3062  ;;  %v285_v43 = vadd.f32 1e-12, %v282_v41 }
 0x227   :  { %v288_v44 = vmul.f32 %v3063_v42, %v284_v38  ;;  %vm294_vm4 = vweird.f32 %v3063_v42 }
 0x228   :  { %3064 = vrsqrt.f32 %v285_v43  ;;  %vm295_vm6 = vmor %vm293_vm5, %vm294_vm4  ;;  %vm303_vm8 = vweird.f32 %v285_v43 }
 0x229   :  { %v289_v45 = vmul.f32 %v3063_v42, %v288_v44 }
 0x22b   :  { %v290_v46 = vmul.f32 0.5, %v289_v45  ;;  %v280_v47 = vpop.xlane.xlu2 %279 }
 0x22c   :  { %v283_v48 = vmul.f32 %v280_v47, %v3408_v61 }
 0x22d   :  { %v291_v49 = vsub.f32 1.5, %v290_v46 }
 0x22e   :  { %v3065_v50 = vpop.eup %3064  ;;  %v286_v51 = vadd.f32 1e-12, %v283_v48 }
 0x22f   :  { %v292_v52 = vmul.f32 %v3063_v42, %v291_v49  ;;  %v298_v53 = vmul.f32 %v3065_v50, %v285_v43  ;;  %vm304_vm7 = vweird.f32 %v3065_v50 }
 0x230   :  { %3066 = vrsqrt.f32 %v286_v51  ;;  %vm305_vm9 = vmor %vm303_vm8, %vm304_vm7  ;;  %vm313_vm11 = vweird.f32 %v286_v51 }
 0x231   :  { %v299_v54 = vmul.f32 %v3065_v50, %v298_v53  ;;  %v296_v55 = vsel %vm295_vm6, %v3063_v42, %v292_v52 }
 0x232   :  { %v317_v59 = vmul.f32 %v296_v55, %v3411_v0 }
 0x233   :  { %v300_v56 = vmul.f32 0.5, %v299_v54 }
 0x234   :  { %v323_v4 = vmul.f32 %v3036_v60, %v317_v59 }
 0x235   :  { %v301_v57 = vsub.f32 1.5, %v300_v56 }
 0x236   :  { %v3067_v58 = vpop.eup %3066  ;;  %v3487_v9 = vadd.f32 %v3037_v6, %v323_v4 }
 0x237   :  { %v302_v62 = vmul.f32 %v3065_v50, %v301_v57  ;;  %v308_v63 = vmul.f32 %v3067_v58, %v286_v51  ;;  %vm314_vm10 = vweird.f32 %v3067_v58 }
 0x238   :  { %vm315_vm12 = vmor %vm313_vm11, %vm314_vm10 }
 0x239   :  { %v306_v1 = vsel %vm305_vm9, %v3065_v50, %v302_v62  ;;  %v309_v2 = vmul.f32 %v3067_v58, %v308_v63 }
 0x23a   :  { %v318_v3 = vmul.f32 %v306_v1, %v3417_v5 }
 0x23b   :  { %v310_v7 = vmul.f32 0.5, %v309_v2 }
 0x23c   :  { %v324_v8 = vmul.f32 %v3036_v60, %v318_v3 }
 0x23d   :  { %v311_v0 = vsub.f32 1.5, %v310_v7 }
 0x23e   :  { %v3489_v11 = vadd.f32 %v3037_v6, %v324_v8 }
 0x23f   :  { %v312_v12 = vmul.f32 %v3067_v58, %v311_v0 }
 0x240   :  { %v335_v13 = vpack.c.bf16 %v3489_v11, %v3487_v9 }
 0x241   :  { %v316_v5 = vsel %vm315_vm12, %v3067_v58, %v312_v12 }
 0x242   :  { %2564 = vmatmul.msk.bf16.vlgmr.msra.gmra.mxu2 %vm245_vm1, %v335_v13  ;;  %2566 = vmatmul.msk.bf16.vlgmr.msra.gmra.mxu3 %vm245_vm1, %v335_v13  ;;  %v319_v14 = vmul.f32 %v316_v5, %v3423_v10 }
 0x244   :  { %v325_v15 = vmul.f32 %v3036_v60, %v319_v14 }
 0x246   :  { %v3496_v16 = vadd.f32 %v3037_v6, %v325_v15 }
 0x248   :  { %v336_v17 = vpack.c.bf16 %v3496_v16, %v3496_v16 }
 0x252   :  { %2565 = vmatmul.msk.bf16.gmra.mxu2 %vm245_vm1, %v336_v17  ;;  %2567 = vmatmul.msk.bf16.gmra.mxu3 %vm245_vm1, %v336_v17 }
 0x2c5   :  { %v406_v20 = vpop.f32.mrf.mxu2  ;;  %v424_v21 = vpop.f32.mrf.mxu3 }
 0x2c6   :  { %v407_v22 = vadd.f32 %v406_v20, %v347_v19  ;;  %v425_v25 = vadd.f32 %v424_v21, %v348_v23 }
 0x2c8   :  { %v433_v10 = vmul.f32 0.25, %v407_v22  ;;  %v3532_v37 = vmul.f32 %v3508_v24, %v425_v25  ;;  %v594_v4 = vmul.f32 %v3529_v36, %v425_v25  ;;  %v520_v6 = vmul.f32 %v3513_v30, %v425_v25 }
 0x2c9   :  { %v827_v5 = vmul.f32 %v3518_v31, %v425_v25 }
 0x2ca   :  { %v3521_v34 = vmul.f32 %v3513_v30, %v433_v10  ;;  %v3524_v35 = vmul.f32 %v3508_v24, %v433_v10  ;;  %v3536_v39 = vmul.f32 %v3518_v31, %v433_v10  ;;  %v530_v44 = vmul.f32 %v3529_v36, %v433_v10 }
 0x2cd   :  { %v408_v26 = vpop.f32.mrf.mxu2  ;;  %v426_v27 = vpop.f32.mrf.mxu3 }
 0x2ce   :  { %v409_v28 = vadd.f32 %v408_v26, %v347_v19  ;;  %v427_v29 = vadd.f32 %v426_v27, %v348_v23 }
 0x2d0   :  { %v434_v32 = vmul.f32 0.25, %v409_v28  ;;  %v436_v33 = vpack.c.bf16 %v409_v28, %v407_v22  ;;  %v724_v38 = vmul.f32 %v3508_v24, %v427_v29  ;;  %v595_v60 = vmul.f32 %v3529_v36, %v427_v29 }
 0x2d1   :  { %v521_v62 = vmul.f32 %v3513_v30, %v427_v29  ;;  %v828_v12 = vmul.f32 %v3518_v31, %v427_v29 }
 0x2d2   :  { %v443_v40 = vmul.f32 %v3513_v30, %v434_v32  ;;  %v3540_v41 = vmul.f32 %v3508_v24, %v434_v32  ;;  %v3543_v42 = vmul.f32 %v3518_v31, %v434_v32  ;;  %449 = vrot.lane.b32.xlu1 %v436_v33, %s3221_s1  ;;  %v726_v43 = vpack.c.bf16 %v724_v38, %v3532_v37 }
 0x2d3   :  { %v531_v45 = vmul.f32 %v3529_v36, %v434_v32  ;;  %v597_v8 = vpack.c.bf16 %v595_v60, %v594_v4  ;;  %v523_v0 = vpack.c.bf16 %v521_v62, %v520_v6  ;;  %v830_v14 = vpack.c.bf16 %v828_v12, %v827_v5 }
 0x2d4   :  { %v445_v46 = vpack.c.bf16 %v443_v40, %v3521_v34  ;;  %v662_v47 = vpack.c.bf16 %v3540_v41, %v3524_v35  ;;  %v766_v48 = vpack.c.bf16 %v3543_v42, %v3536_v39 }
 0x2d5   :  { %v411_v49 = vpop.f32.mrf.mxu2  ;;  %v429_v50 = vpop.f32.mrf.mxu3  ;;  %v533_v51 = vpack.c.bf16 %v531_v45, %v530_v44  ;;  %v3607_v45 = vld [vmem:[%s4332_s3 + $0x10] sm:$0x3] }
 0x2d6   :  { %v412_v52 = vadd.f32 %v411_v49, %v347_v19  ;;  %v430_v53 = vadd.f32 %v429_v50, %v348_v23 }
 0x2d8   :  { %v437_v54 = vpack.c.bf16 %v412_v52, %v412_v52  ;;  %v596_v55 = vmul.f32 %v3529_v36, %v430_v53  ;;  %v522_v56 = vmul.f32 %v3513_v30, %v430_v53  ;;  %v829_v57 = vmul.f32 %v3518_v31, %v430_v53 }
 0x2d9   :  { %v725_v18 = vmul.f32 %v3508_v24, %v430_v53  ;;  %v3573_v23 = vmul.f32 0.25, %v412_v52 }
 0x2da   :  { %451 = vrot.lane.b32.xlu2 %v437_v54, %s3221_s1  ;;  %v598_v58 = vpack.c.bf16 %v596_v55, %v596_v55  ;;  %v524_v59 = vpack.c.bf16 %v522_v56, %v522_v56  ;;  %v831_v7 = vpack.c.bf16 %v829_v57, %v829_v57 }
 0x2db   :  { %v727_v19 = vpack.c.bf16 %v725_v18, %v725_v18  ;;  %v444_v10 = vmul.f32 %v3513_v30, %v3573_v23  ;;  %v532_v25 = vmul.f32 %v3529_v36, %v3573_v23  ;;  %v661_v28 = vmul.f32 %v3508_v24, %v3573_v23  ;;  %v3588_v30 = vld [vmem:[%s4332_s3] sm:$0xff]  ;;  %v3595_v24 = vld [vmem:[%s4332_s3 + $0x8] sm:$0xff] }
 0x2dc   :  { %v607_v63 = vsel %vm605_vm13, %v598_v58, 0  ;;  %v634_v1 = vsel %vm605_vm13, %v524_v59, 0  ;;  %v839_v13 = vsel %vm605_vm13, %v831_v7, 0 }
 0x2dd   :  { %v413_v2 = vpop.f32.mrf.mxu2  ;;  %v431_v3 = vpop.f32.mrf.mxu3  ;;  %615 = vmatpush.bf16.msrb.mxu3 %v607_v63  ;;  %642 = vmatpush.bf16.msrb.mxu1 %v634_v1  ;;  %v735_v22 = vsel %vm605_vm13, %v727_v19, 0  ;;  %v446_v26 = vpack.c.bf16 %v444_v10, %v444_v10  ;;  %v534_v27 = vpack.c.bf16 %v532_v25, %v532_v25  ;;  %v663_v29 = vpack.c.bf16 %v661_v28, %v661_v28 }
 0x2e1   :  { %616 = vmatpush.bf16.msrb.mxu3 %v597_v8  ;;  %643 = vmatpush.bf16.msrb.mxu1 %v523_v0 }
 0x2e5   :  { %847 = vmatpush.bf16.msra.mxu1 %v839_v13 }
 0x2e9   :  { %848 = vmatpush.bf16.msra.mxu1 %v830_v14 }
 0x334   :  { %v452_v15 = vpop.permute.xlu2 %451 }
 0x335   :  { %v463_v17 = vsel %vm245_vm1, %v452_v15, 0 }
 0x336   :  { %471 = vmatpush.bf16.xpose.msra.mxu0 %v463_v17  ;;  %547 = vmatpush.bf16.xpose.msrb.mxu2 %v463_v17 }
 0x337   :  { %780 = vmatpush.bf16.xpose.msra.mxu3 %v463_v17 }
 0x344   :  { %v450_v20 = vpop.permute.xlu1 %449 }
 0x345   :  { %v460_v21 = vsel %vm245_vm1, %v450_v20, 0 }
 0x346   :  { %472 = vmatpush.bf16.xpose.msra.mxu0 %v460_v21  ;;  %548 = vmatpush.bf16.xpose.msrb.mxu2 %v460_v21 }
 0x347   :  { %781 = vmatpush.bf16.xpose.msra.mxu3 %v460_v21 }
 0x34d   :  { %2568 = vmatmul.msk.bf16.vlgmr.msra.gmra.mxu0 %vm245_vm1, %v445_v46  ;;  %2571 = vmatmul.msk.bf16.vlgmr.msrb.gmra.mxu2 %vm245_vm1, %v533_v51 }
 0x34e   :  { %676 = vmatpush.bf16.xpose.msrb.mxu0 %v463_v17  ;;  %743 = vmatpush.bf16.msra.mxu2 %v735_v22 }
 0x352   :  { %744 = vmatpush.bf16.msra.mxu2 %v726_v43 }
 0x356   :  { %677 = vmatpush.bf16.xpose.msrb.mxu0 %v460_v21 }
 0x35d   :  { %2569 = vmatmul.msk.bf16.gmra.mxu0 %vm245_vm1, %v446_v26  ;;  %2572 = vmatmul.msk.bf16.gmra.mxu2 %vm245_vm1, %v534_v27 }
 0x36d   :  { %2578 = vmatmul.msk.bf16.vlgmr.msrb.gmra.mxu0 %vm245_vm1, %v662_v47 }
 0x37d   :  { %2579 = vmatmul.msk.bf16.gmra.mxu0 %vm245_vm1, %v663_v29 }
 0x3ca   :  { %v474_v32 = vpop.f32.mrf.mxu0 }
 0x3cb   :  { %v475_v5 = vadd.f32 %v474_v32, %v3588_v30 }
 0x3cd   :  { %v484_v14 = vsel %vm483_vm14, %v475_v5, -inf }
 0x3d0   :  { %v550_v33 = vpop.f32.mrf.mxu2 }
 0x3d1   :  { %v551_v34 = vadd.f32 %v550_v33, %v3588_v30 }
 0x3d2   :  { %v476_v35 = vpop.f32.mrf.mxu0 }
 0x3d3   :  { %v559_v36 = vsel %vm483_vm14, %v551_v34, -inf  ;;  %v3598_v37 = vadd.f32 %v476_v35, %v3595_v24 }
 0x3d4   :  { %560 = vmax.xlane.f32.xlu2 %v559_v36 }
 0x3d5   :  { %v487_v44 = vsel %vm483_vm14, %v3598_v37, -inf }
 0x3d8   :  { %v552_v38 = vpop.f32.mrf.mxu2 }
 0x3d9   :  { %v553_v40 = vadd.f32 %v552_v38, %v3595_v24 }
 0x3da   :  { %v479_v41 = vpop.f32.mrf.mxu0 }
 0x3db   :  { %v562_v43 = vsel %vm483_vm14, %v553_v40, -inf  ;;  %v480_v15 = vadd.f32 %v479_v41, %v3607_v45 }
 0x3dc   :  { %563 = vmax.xlane.f32.xlu0 %v562_v43  ;;  %488 = vmax.xlane.f32.xlu2 %v487_v44  ;;  %v765_v44 = vmul.f32 %v3518_v31, %v3573_v23 }
 0x3dd   :  { %v491_v17 = vsel %vm490_vm15, %v480_v15, -inf }
 0x3e0   :  { %v555_v46 = vpop.f32.mrf.mxu2 }
 0x3e1   :  { %v556_v47 = vadd.f32 %v555_v46, %v3607_v45  ;;  %v767_v46 = vpack.c.bf16 %v765_v44, %v765_v44 }
 0x3e2   :  { %v481_v49 = vpop.f32.mrf.mxu0 }
 0x3e3   :  { %v565_v50 = vsel %vm490_vm15, %v556_v47, -inf }
 0x3e4   :  { %566 = vmax.xlane.f32.xlu0 %v565_v50 }
 0x3e8   :  { %v557_v51 = vpop.f32.mrf.mxu2 }
 0x3ea   :  { %v679_v52 = vpop.f32.mrf.mxu0 }
 0x3eb   :  { %v3612_v53 = vadd.f32 %v679_v52, %v3588_v30 }
 0x3ed   :  { %v688_v54 = vsel %vm483_vm14, %v3612_v53, -inf }
 0x3ee   :  { %689 = vmax.xlane.f32.xlu2 %v688_v54 }
 0x3f2   :  { %v681_v55 = vpop.f32.mrf.mxu0 }
 0x3f3   :  { %v3624_v18 = vadd.f32 %v681_v55, %v3595_v24 }
 0x3f5   :  { %v691_v19 = vsel %vm483_vm14, %v3624_v18, -inf }
 0x3fa   :  { %v684_v56 = vpop.f32.mrf.mxu0 }
 0x3fb   :  { %v685_v41 = vadd.f32 %v684_v56, %v3607_v45 }
 0x3fd   :  { %v694_v43 = vsel %vm490_vm15, %v685_v41, -inf }
 0x402   :  { %v686_v57 = vpop.f32.mrf.mxu0 }
 0x447   :  { %v561_v58 = vpop.xlane.xlu2 %560 }
 0x448   :  { %v568_v59 = vsub.f32 %v551_v34, %v561_v58 }
 0x44a   :  { %v571_v60 = vmul.f32 1.442695, %v568_v59 }
 0x44c   :  { %3068 = vpow2.f32 %v571_v60 }
 0x44f   :  { %v564_v62 = vpop.xlane.xlu0 %563  ;;  %v489_v51 = vpop.xlane.xlu2 %488 }
 0x450   :  { %v569_v63 = vsub.f32 %v553_v40, %v564_v62  ;;  %v495_v54 = vsub.f32 %v3598_v37, %v489_v51 }
 0x452   :  { %v3069_v1 = vpop.eup %3068  ;;  %v573_v2 = vmul.f32 1.442695, %v569_v63  ;;  %v499_v39 = vmul.f32 1.442695, %v495_v54 }
 0x453   :  { %v577_v3 = vsel %vm483_vm14, %v3069_v1, 0.0 }
 0x454   :  { %3070 = vpow2.f32 %v573_v2  ;;  %578 = vadd.xlane.f32.xlu0 %v577_v3 }
 0x457   :  { %v567_v4 = vpop.xlane.xlu0 %566 }
 0x458   :  { %v570_v6 = vsub.f32 %v556_v47, %v567_v4 }
 0x45a   :  { %v3071_v7 = vpop.eup %3070  ;;  %v575_v8 = vmul.f32 1.442695, %v570_v6 }
 0x45b   :  { %v580_v0 = vsel %vm483_vm14, %v3071_v7, 0.0 }
 0x45c   :  { %3072 = vpow2.f32 %v575_v8  ;;  %581 = vadd.xlane.f32.xlu1 %v580_v0 }
 0x462   :  { %v3073_v12 = vpop.eup %3072 }
 0x463   :  { %v583_v13 = vsel %vm490_vm15, %v3073_v12, 0.0 }
 0x464   :  { %584 = vadd.xlane.f32.xlu0 %v583_v13 }
 0x46c   :  { %485 = vmax.xlane.f32.xlu0 %v484_v14 }
 0x474   :  { %492 = vmax.xlane.f32.xlu0 %v491_v17 }
 0x47c   :  { %692 = vmax.xlane.f32.xlu0 %v691_v19 }
 0x4c7   :  { %v579_v20 = vpop.xlane.xlu0 %578 }
 0x4c8   :  { %3074 = vrcp.f32 %v579_v20 }
 0x4ce   :  { %v3075_v22 = vpop.eup %3074 }
 0x4cf   :  { %v582_v21 = vpop.xlane.xlu1 %581  ;;  %v589_v25 = vmul.f32 %v3075_v22, %v3069_v1 }
 0x4d0   :  { %3076 = vrcp.f32 %v582_v21 }
 0x4d6   :  { %v3077_v10 = vpop.eup %3076 }
 0x4d7   :  { %v590_v26 = vmul.f32 %v3077_v10, %v3071_v7  ;;  %v585_v27 = vpop.xlane.xlu0 %584 }
 0x4d8   :  { %3078 = vrcp.f32 %v585_v27 }
 0x4d9   :  { %v592_v28 = vpack.c.bf16 %v590_v26, %v589_v25 }
 0x4db   :  { %2573 = vmatmul.msk.bf16.vlgmr.msrb.gmra.mxu3 %vm483_vm14, %v592_v28 }
 0x4de   :  { %v3079_v33 = vpop.eup %3078 }
 0x4df   :  { %v486_v29 = vpop.xlane.xlu0 %485  ;;  %v591_v35 = vmul.f32 %v3079_v33, %v3073_v12 }
 0x4e0   :  { %v494_v32 = vsub.f32 %v475_v5, %v486_v29 }
 0x4e1   :  { %v593_v36 = vpack.c.bf16 %v591_v35, %v591_v35 }
 0x4e2   :  { %v497_v34 = vmul.f32 1.442695, %v494_v32 }
 0x4e4   :  { %3080 = vpow2.f32 %v497_v34 }
 0x4e5   :  { %3082 = vpow2.f32 %v499_v39 }
 0x4e7   :  { %v493_v42 = vpop.xlane.xlu0 %492 }
 0x4e8   :  { %v496_v57 = vsub.f32 %v480_v15, %v493_v42 }
 0x4ea   :  { %v3629_v38 = vpop.eup %3080  ;;  %v501_v60 = vmul.f32 1.442695, %v496_v57 }
 0x4eb   :  { %2574 = vmatmul.msk.bf16.gmra.mxu3 %vm483_vm14, %v593_v36  ;;  %v503_v40 = vsel %vm483_vm14, %v3629_v38, 0.0  ;;  %v3083_v63 = vpop.eup %3082 }
 0x4ec   :  { %504 = vadd.xlane.f32.xlu1 %v503_v40  ;;  %v506_v4 = vsel %vm483_vm14, %v3083_v63, 0.0 }
 0x4ef   :  { %v693_v1 = vpop.xlane.xlu0 %692 }
 0x4f4   :  { %695 = vmax.xlane.f32.xlu1 %v694_v43 }
 0x4fb   :  { %2583 = vmatmul.msk.bf16.vlgmr.msra.gmra.mxu3 %vm245_vm1, %v766_v48  ;;  %v690_v48 = vpop.xlane.xlu2 %689 }
 0x4fc   :  { %v697_v23 = vsub.f32 %v3612_v53, %v690_v48 }
 0x4fe   :  { %v700_v59 = vmul.f32 1.442695, %v697_v23 }
 0x500   :  { %3084 = vpow2.f32 %v700_v59 }
 0x501   :  { %3086 = vpow2.f32 %v501_v60 }
 0x506   :  { %v3085_v8 = vpop.eup %3084 }
 0x507   :  { %v3087_v12 = vpop.eup %3086 }
 0x508   :  { %v509_v14 = vsel %vm490_vm15, %v3087_v12, 0.0 }
 0x50b   :  { %2584 = vmatmul.msk.bf16.gmra.mxu3 %vm245_vm1, %v767_v46 }
 0x55e   :  { %v3643_v47 = vpop.f32.mrf.mxu3 }
 0x55f   :  { %v505_v55 = vpop.xlane.xlu1 %504 }
 0x566   :  { %v3645_v49 = vpop.f32.mrf.mxu3 }
 0x567   :  { %v696_v62 = vpop.xlane.xlu1 %695 }
 0x568   :  { %v699_v3 = vsub.f32 %v685_v41, %v696_v62 }
 0x56a   :  { %v704_v6 = vmul.f32 1.442695, %v699_v3 }
 0x56c   :  { %3088 = vpow2.f32 %v704_v6 }
 0x56e   :  { %v3647_v50 = vpop.f32.mrf.mxu3 }
 0x572   :  { %v3089_v15 = vpop.eup %3088 }
 0x573   :  { %v712_v19 = vsel %vm490_vm15, %v3089_v15, 0.0 }
 0x576   :  { %v625_v52 = vpop.f32.mrf.mxu3 }
 0x57e   :  { %v783_v56 = vpop.f32.mrf.mxu3 }
 0x57f   :  { %v784_v31 = vadd.f32 %v783_v56, %v3588_v30  ;;  %v698_v30 = vsub.f32 %v3624_v18, %v693_v1 }
 0x581   :  { %v792_v58 = vsel %vm483_vm14, %v784_v31, -inf  ;;  %v702_v7 = vmul.f32 1.442695, %v698_v30 }
 0x582   :  { %793 = vmax.xlane.f32.xlu2 %v792_v58 }
 0x583   :  { %3090 = vpow2.f32 %v702_v7 }
 0x586   :  { %v785_v37 = vpop.f32.mrf.mxu3 }
 0x587   :  { %v786_v2 = vadd.f32 %v785_v37, %v3595_v24  ;;  %v706_v24 = vsel %vm483_vm14, %v3085_v8, 0.0 }
 0x589   :  { %v795_v53 = vsel %vm483_vm14, %v786_v2, -inf  ;;  %v3091_v18 = vpop.eup %3090 }
 0x58a   :  { %507 = vadd.xlane.f32.xlu2 %v506_v4  ;;  %796 = vmax.xlane.f32.xlu0 %v795_v53  ;;  %v709_v20 = vsel %vm483_vm14, %v3091_v18, 0.0 }
 0x58e   :  { %v788_v0 = vpop.f32.mrf.mxu3 }
 0x58f   :  { %v789_v13 = vadd.f32 %v788_v0, %v3607_v45 }
 0x591   :  { %v798_v5 = vsel %vm490_vm15, %v789_v13, -inf }
 0x592   :  { %707 = vadd.xlane.f32.xlu2 %v706_v24  ;;  %799 = vmax.xlane.f32.xlu1 %v798_v5 }
 0x593   :  { %510 = vadd.xlane.f32.xlu0 %v509_v14 }
 0x596   :  { %v790_v17 = vpop.f32.mrf.mxu3 }
 0x59a   :  { %713 = vadd.xlane.f32.xlu1 %v712_v19 }
 0x59b   :  { %710 = vadd.xlane.f32.xlu0 %v709_v20 }
 0x5f5   :  { %v794_v45 = vpop.xlane.xlu2 %793 }
 0x5f6   :  { %v801_v21 = vsub.f32 %v784_v31, %v794_v45 }
 0x5f8   :  { %v804_v22 = vmul.f32 1.442695, %v801_v21 }
 0x5fa   :  { %3092 = vpow2.f32 %v804_v22 }
 0x5fb   :  { %3094 = vrcp.f32 %v505_v55 }
 0x5fd   :  { %v508_v10 = vpop.xlane.xlu2 %507  ;;  %v797_v25 = vpop.xlane.xlu0 %796 }
 0x5fe   :  { %3096 = vrcp.f32 %v508_v10  ;;  %v802_v26 = vsub.f32 %v786_v2, %v797_v25  ;;  %v2959_v10 = vld [vmem:[%s4333_s13 + $0x10] sm:$0xff]  ;;  %v2958_v25 = vld [vmem:[%s4333_s13 + $0x8] sm:$0xff] }
 0x600   :  { %v3093_v27 = vpop.eup %3092  ;;  %v806_v28 = vmul.f32 1.442695, %v802_v26 }
 0x601   :  { %v810_v29 = vsel %vm483_vm14, %v3093_v27, 0.0  ;;  %v3095_v32 = vpop.eup %3094 }
 0x602   :  { %3098 = vpow2.f32 %v806_v28  ;;  %811 = vadd.xlane.f32.xlu2 %v810_v29  ;;  %v515_v34 = vmul.f32 %v3095_v32, %v3629_v38 }
 0x604   :  { %v3097_v33 = vpop.eup %3096 }
 0x605   :  { %v516_v35 = vmul.f32 %v3097_v33, %v3083_v63  ;;  %v800_v36 = vpop.xlane.xlu1 %799  ;;  %v708_v52 = vpop.xlane.xlu2 %707 }
 0x606   :  { %v803_v40 = vsub.f32 %v789_v13, %v800_v36  ;;  %v511_v41 = vpop.xlane.xlu0 %510  ;;  %v2960_v13 = vld [vmem:[%s4333_s13 + $0x18] sm:$0xff] }
 0x607   :  { %v518_v43 = vpack.c.bf16 %v516_v35, %v515_v34  ;;  %3100 = vrcp.f32 %v511_v41  ;;  %910 = vmatpush.bf16.msra.mxu0 %v2960_v13  ;;  %v3042_v41 = vld [vmem:[%s4334_s14] ss:$0 sm:$0xff]  ;;  %v2965_v13 = vld [vmem:[%s4337_s17 + $0x24] sm:$0xf] }
 0x608   :  { %v3099_v44 = vpop.eup %3098  ;;  %v808_v46 = vmul.f32 1.442695, %v803_v40 }
 0x609   :  { %2575 = vmatmul.msk.bf16.vlgmr.msrb.gmra.mxu1 %vm483_vm14, %v518_v43  ;;  %v813_v51 = vsel %vm483_vm14, %v3099_v44, 0.0 }
 0x60a   :  { %3102 = vpow2.f32 %v808_v46  ;;  %814 = vadd.xlane.f32.xlu0 %v813_v51 }
 0x60b   :  { %3104 = vrcp.f32 %v708_v52  ;;  %911 = vmatpush.bf16.msra.mxu0 %v2959_v10  ;;  %v2607_v10 = vld [vmem:[%s4337_s17] sm:$0xf] }
 0x60d   :  { %v3101_v55 = vpop.eup %3100  ;;  %v714_v58 = vpop.xlane.xlu1 %713 }
 0x60e   :  { %v711_v54 = vpop.xlane.xlu0 %710  ;;  %v517_v48 = vmul.f32 %v3101_v55, %v3087_v12 }
 0x60f   :  { %3106 = vrcp.f32 %v711_v54  ;;  %912 = vmatpush.bf16.msra.mxu0 %v2958_v25  ;;  %v2962_v25 = vld [vmem:[%s4337_s17 + $0x4] sm:$0xf0] }
 0x610   :  { %v3103_v38 = vpop.eup %3102  ;;  %v519_v57 = vpack.c.bf16 %v517_v48, %v517_v48  ;;  %3108 = vrcp.f32 %v714_v58 }
 0x611   :  { %v816_v39 = vsel %vm490_vm15, %v3103_v38, 0.0  ;;  %v3105_v42 = vpop.eup %3104 }
 0x612   :  { %817 = vadd.xlane.f32.xlu2 %v816_v39  ;;  %v718_v31 = vmul.f32 %v3105_v42, %v3085_v8 }
 0x615   :  { %v3107_v56 = vpop.eup %3106 }
 0x616   :  { %v719_v23 = vmul.f32 %v3107_v56, %v3091_v18  ;;  %v3109_v60 = vpop.eup %3108 }
 0x617   :  { %v720_v62 = vmul.f32 %v3109_v60, %v3089_v15 }
 0x618   :  { %v721_v59 = vpack.c.bf16 %v719_v23, %v718_v31 }
 0x619   :  { %2576 = vmatmul.msk.bf16.gmra.mxu1 %vm483_vm14, %v519_v57  ;;  %v722_v63 = vpack.c.bf16 %v720_v62, %v720_v62 }
 0x61a   :  { %2580 = vmatmul.msk.bf16.vlgmr.msra.gmra.mxu2 %vm483_vm14, %v721_v59 }
 0x62a   :  { %2581 = vmatmul.msk.bf16.gmra.mxu2 %vm483_vm14, %v722_v63 }
 0x675   :  { %v812_v1 = vpop.xlane.xlu2 %811 }
 0x676   :  { %3110 = vrcp.f32 %v812_v1 }
 0x67c   :  { %v3111_v2 = vpop.eup %3110 }
 0x67d   :  { %v815_v37 = vpop.xlane.xlu0 %814  ;;  %v822_v30 = vmul.f32 %v3111_v2, %v3093_v27 }
 0x67e   :  { %3112 = vrcp.f32 %v815_v37 }
 0x684   :  { %v3113_v3 = vpop.eup %3112 }
 0x685   :  { %v823_v4 = vmul.f32 %v3113_v3, %v3099_v44  ;;  %v818_v7 = vpop.xlane.xlu2 %817 }
 0x686   :  { %v645_v53 = vpop.f32.mrf.mxu1  ;;  %3114 = vrcp.f32 %v818_v7  ;;  %v2633_v7 = vld [vmem:[%s4337_s17 + $0x38] sm:$0xf0] }
 0x687   :  { %v825_v6 = vpack.c.bf16 %v823_v4, %v822_v30  ;;  %v646_v14 = vadd.f32 %v645_v53, %v3643_v47  ;;  %v2957_v47 = vld [vmem:[%s4333_s13] sm:$0xff]  ;;  %v2631_v30 = vld [vmem:[%s4337_s17 + $0x30] sm:$0xf]  ;;  %v2968_v4 = vld [vmem:[%s4337_s17 + $0x34] sm:$0xf0] }
 0x688   :  { %913 = vmatpush.bf16.msra.mxu0 %v2957_v47  ;;  %v2967_v53 = vld [vmem:[%s4337_s17 + $0x34] sm:$0xf]  ;;  %v2961_v47 = vld [vmem:[%s4337_s17 + $0x4] sm:$0xf] }
 0x689   :  { %2585 = vmatmul.msk.bf16.vlgmr.msra.gmra.mxu1 %vm483_vm14, %v825_v6  ;;  %v2632_v6 = vor.u32 %v2968_v4, %v2631_v30 }
 0x68b   :  { %1073 = vmatpush.bf16.msrb.mxu2 %v2632_v6 }
 0x68c   :  { %v3115_v0 = vpop.eup %3114 }
 0x68d   :  { %v824_v12 = vmul.f32 %v3115_v0, %v3103_v38  ;;  %v2623_v0 = vld [vmem:[%s4337_s17 + $0x20] sm:$0xf] }
 0x68e   :  { %v647_v8 = vpop.f32.mrf.mxu1 }
 0x68f   :  { %v826_v5 = vpack.c.bf16 %v824_v12, %v824_v12  ;;  %v2966_v12 = vld [vmem:[%s4337_s17 + $0x24] sm:$0xf0] }
 0x696   :  { %v650_v24 = vpop.f32.mrf.mxu1 }
 0x697   :  { %v651_v20 = vadd.f32 %v650_v24, %v3647_v50  ;;  %v648_v50 = vadd.f32 %v647_v8, %v3645_v49  ;;  %v2636_v8 = vor.u32 %v2967_v53, %v2633_v7  ;;  %v2624_v24 = vor.u32 %v2966_v12, %v2623_v0  ;;  %v2984_v0 = vld [vmem:[%s4339_s19 + $0x78] sm:$0xff]  ;;  %v2983_v12 = vld [vmem:[%s4339_s19 + $0x70] sm:$0xff] }
 0x698   :  { %1313 = vmatpush.bf16.msrb.mxu0 %v2984_v0 }
 0x699   :  { %2586 = vmatmul.msk.bf16.gmra.mxu1 %vm483_vm14, %v826_v5  ;;  %1091 = vmatpush.bf16.msrb.mxu3 %v2636_v8  ;;  %v2625_v5 = vld [vmem:[%s4337_s17 + $0x28] sm:$0xf0]  ;;  %v2976_v8 = vld [vmem:[%s4339_s19 + $0x38] sm:$0xff] }
 0x69a   :  { %1074 = vmatpush.bf16.msrb.mxu2 %v2624_v24  ;;  %1295 = vmatpush.bf16.msrb.mxu1 %v2976_v8  ;;  %v2982_v24 = vld [vmem:[%s4339_s19 + $0x68] sm:$0xff] }
 0x69c   :  { %1314 = vmatpush.bf16.msrb.mxu0 %v2983_v12 }
 0x69d   :  { %v746_v15 = vpop.f32.mrf.mxu2 }
 0x69e   :  { %v755_v17 = vadd.f32 %v746_v15, %v646_v14  ;;  %v652_v18 = vpop.f32.mrf.mxu1  ;;  %v2628_v14 = vor.u32 %v2965_v13, %v2625_v5  ;;  %v2615_v15 = vld [vmem:[%s4337_s17 + $0x10] sm:$0xf]  ;;  %v2974_v13 = vld [vmem:[%s4339_s19 + $0x28] sm:$0xff]  ;;  %v2973_v5 = vld [vmem:[%s4339_s19 + $0x20] sm:$0xff] }
 0x69f   :  { %v2963_v18 = vld [vmem:[%s4337_s17 + $0x14] sm:$0xf] }
 0x6a0   :  { %1092 = vmatpush.bf16.msrb.mxu3 %v2628_v14  ;;  %1315 = vmatpush.bf16.msrb.mxu0 %v2982_v24  ;;  %v2981_v14 = vld [vmem:[%s4339_s19 + $0x60] sm:$0xff] }
 0x6a4   :  { %1316 = vmatpush.bf16.msrb.mxu0 %v2981_v14 }
 0x6a5   :  { %v748_v19 = vpop.f32.mrf.mxu2 }
 0x6a6   :  { %v756_v27 = vadd.f32 %v748_v19, %v648_v50  ;;  %v2608_v50 = vor.u32 %v2962_v25, %v2607_v10  ;;  %v2977_v10 = vld [vmem:[%s4339_s19 + $0x40] sm:$0xff] }
 0x6ad   :  { %v751_v45 = vpop.f32.mrf.mxu2 }
 0x6ae   :  { %v757_v21 = vadd.f32 %v751_v45, %v651_v20  ;;  %v2617_v20 = vld [vmem:[%s4337_s17 + $0x18] sm:$0xf0] }
 0x6b5   :  { %v753_v22 = vpop.f32.mrf.mxu2 }
 0x706   :  { %v850_v26 = vpop.f32.mrf.mxu1 }
 0x707   :  { %v859_v29 = vadd.f32 %v850_v26, %v755_v17  ;;  %v2964_v17 = vld [vmem:[%s4337_s17 + $0x14] sm:$0xf0] }
 0x708   :  { %v2616_v19 = vor.u32 %v2964_v17, %v2615_v15  ;;  %v2972_v15 = vld [vmem:[%s4339_s19 + $0x18] sm:$0xff] }
 0x709   :  { %v2980_v17 = vld [vmem:[%s4339_s19 + $0x58] sm:$0xff] }
 0x70a   :  { %1075 = vmatpush.bf16.msrb.mxu2 %v2616_v19  ;;  %1317 = vmatpush.bf16.msrb.mxu0 %v2980_v17  ;;  %v2979_v19 = vld [vmem:[%s4339_s19 + $0x50] sm:$0xff] }
 0x70e   :  { %v852_v28 = vpop.f32.mrf.mxu1  ;;  %1076 = vmatpush.bf16.msrb.mxu2 %v2608_v50  ;;  %1318 = vmatpush.bf16.msrb.mxu0 %v2979_v19 }
 0x70f   :  { %v860_v32 = vadd.f32 %v852_v28, %v756_v27  ;;  %v2609_v27 = vld [vmem:[%s4337_s17 + $0x8] sm:$0xf0] }
 0x710   :  { %v2612_v28 = vor.u32 %v2961_v47, %v2609_v27 }
 0x711   :  { %v862_v33 = vpack.c.bf16 %v860_v32, %v859_v29 }
 0x713   :  { %2603 = vmatmul.msk.bf16.vlgmr.msra.gmra.mxu0 %vm245_vm1, %v862_v33 }
 0x716   :  { %v855_v34 = vpop.f32.mrf.mxu1 }
 0x717   :  { %v861_v35 = vadd.f32 %v855_v34, %v757_v21  ;;  %v2620_v21 = vor.u32 %v2963_v18, %v2617_v20  ;;  %v2971_v18 = vld [vmem:[%s4339_s19 + $0x10] sm:$0xff]  ;;  %v2970_v20 = vld [vmem:[%s4339_s19 + $0x8] sm:$0xff] }
 0x719   :  { %v863_v40 = vpack.c.bf16 %v861_v35, %v861_v35  ;;  %1093 = vmatpush.bf16.msrb.mxu3 %v2620_v21  ;;  %v1017_v21 = vld [vmem:[%s4340_s18] sm:$0x3] }
 0x71a   :  { %v1019_v25 = vperm.slane %v1017_v21, 0  ;;  %v1020_v47 = vperm.slane %v1017_v21, 1 }
 0x71d   :  { %1094 = vmatpush.bf16.msrb.mxu3 %v2612_v28 }
 0x71e   :  { %v857_v36 = vpop.f32.mrf.mxu1 }
 0x723   :  { %2604 = vmatmul.msk.bf16.gmra.mxu0 %vm245_vm1, %v863_v40 }
 0x790   :  { %v915_v43 = vpop.f32.mrf.mxu0 }
 0x791   :  { %v916_v44 = vadd.f32 %v3042_v41, %v915_v43 }
 0x793   :  { %v924_v49 = vadd.f32 %v916_v44, %v3487_v9 }
 0x795   :  { %v929_v46 = vsel %vm245_vm1, %v924_v49, 0.0 }
 0x796   :  { %930 = vadd.xlane.f32.xlu0 %v929_v46 }
 0x798   :  { %v917_v51 = vpop.f32.mrf.mxu0 }
 0x799   :  { %v918_v52 = vadd.f32 %v3042_v41, %v917_v51 }
 0x79b   :  { %v925_v54 = vadd.f32 %v918_v52, %v3489_v11 }
 0x79d   :  { %v932_v55 = vsel %vm245_vm1, %v925_v54, 0.0 }
 0x79e   :  { %933 = vadd.xlane.f32.xlu1 %v932_v55 }
 0x7a0   :  { %v920_v38 = vpop.f32.mrf.mxu0 }
 0x7a1   :  { %v921_v39 = vadd.f32 %v3042_v41, %v920_v38 }
 0x7a3   :  { %v926_v42 = vadd.f32 %v921_v39, %v3496_v16 }
 0x7a5   :  { %v935_v48 = vsel %vm252_vm2, %v926_v42, 0.0 }
 0x7a6   :  { %936 = vadd.xlane.f32.xlu2 %v935_v48  ;;  %v3043_v48 = vld [vmem:[%s4335_s15] ss:$0 sm:$0xff] }
 0x7a8   :  { %v922_v56 = vpop.f32.mrf.mxu0 }
 0x809   :  { %v931_v31 = vpop.xlane.xlu0 %930 }
 0x80a   :  { %v938_v9 = vmul.f32 %v931_v31, %v3408_v61 }
 0x80c   :  { %v3700_v23 = vsub.f32 %v924_v49, %v938_v9 }
 0x80e   :  { %v944_v57 = vmul.f32 %v3700_v23, %v3700_v23 }
 0x810   :  { %v947_v11 = vsel %vm245_vm1, %v944_v57, 0.0 }
 0x811   :  { %v934_v58 = vpop.xlane.xlu1 %933  ;;  %948 = vadd.xlane.f32.xlu0 %v947_v11 }
 0x812   :  { %v939_v59 = vmul.f32 %v934_v58, %v3408_v61  ;;  %v3044_v58 = vld [vmem:[%s4336_s16] ss:$0 sm:$0xff] }
 0x814   :  { %v3706_v60 = vsub.f32 %v925_v54, %v939_v59 }
 0x816   :  { %v945_v16 = vmul.f32 %v3706_v60, %v3706_v60 }
 0x818   :  { %v950_v62 = vsel %vm245_vm1, %v945_v16, 0.0 }
 0x819   :  { %951 = vadd.xlane.f32.xlu1 %v950_v62  ;;  %v937_v63 = vpop.xlane.xlu2 %936 }
 0x81a   :  { %v940_v1 = vmul.f32 %v937_v63, %v3408_v61 }
 0x81c   :  { %v3712_v37 = vsub.f32 %v926_v42, %v940_v1 }
 0x81e   :  { %v946_v2 = vmul.f32 %v3712_v37, %v3712_v37 }
 0x820   :  { %v953_v3 = vsel %vm252_vm2, %v946_v2, 0.0 }
 0x821   :  { %954 = vadd.xlane.f32.xlu2 %v953_v3 }
 0x884   :  { %v949_v45 = vpop.xlane.xlu0 %948 }
 0x885   :  { %v956_v22 = vmul.f32 %v949_v45, %v3408_v61  ;;  %v2978_v45 = vld [vmem:[%s4339_s19 + $0x48] sm:$0xff] }
 0x886   :  { %1319 = vmatpush.bf16.msrb.mxu0 %v2978_v45 }
 0x887   :  { %v959_v26 = vadd.f32 1e-12, %v956_v22  ;;  %v2969_v22 = vld [vmem:[%s4339_s19] sm:$0xff] }
 0x889   :  { %3116 = vrsqrt.f32 %v959_v26  ;;  %vm968_vm3 = vweird.f32 %v959_v26 }
 0x88a   :  { %1320 = vmatpush.bf16.msrb.mxu0 %v2977_v10 }
 0x88c   :  { %v952_v29 = vpop.xlane.xlu1 %951 }
 0x88d   :  { %v957_v32 = vmul.f32 %v952_v29, %v3408_v61 }
 0x88f   :  { %v3117_v33 = vpop.eup %3116  ;;  %v960_v34 = vadd.f32 1e-12, %v957_v32 }
 0x890   :  { %v963_v35 = vmul.f32 %v3117_v33, %v959_v26  ;;  %vm969_vm0 = vweird.f32 %v3117_v33 }
 0x891   :  { %3118 = vrsqrt.f32 %v960_v34  ;;  %vm970_vm4 = vmor %vm968_vm3, %vm969_vm0  ;;  %vm978_vm6 = vweird.f32 %v960_v34 }
 0x892   :  { %v964_v36 = vmul.f32 %v3117_v33, %v963_v35 }
 0x894   :  { %v965_v40 = vmul.f32 0.5, %v964_v36  ;;  %v955_v41 = vpop.xlane.xlu2 %954 }
 0x895   :  { %v958_v43 = vmul.f32 %v955_v41, %v3408_v61 }
 0x896   :  { %v966_v44 = vsub.f32 1.5, %v965_v40 }
 0x897   :  { %v3119_v49 = vpop.eup %3118  ;;  %v961_v46 = vadd.f32 1e-12, %v958_v43 }
 0x898   :  { %v967_v51 = vmul.f32 %v3117_v33, %v966_v44  ;;  %v973_v52 = vmul.f32 %v3119_v49, %v960_v34  ;;  %vm979_vm5 = vweird.f32 %v3119_v49 }
 0x899   :  { %3120 = vrsqrt.f32 %v961_v46  ;;  %vm980_vm7 = vmor %vm978_vm6, %vm979_vm5  ;;  %vm988_vm9 = vweird.f32 %v961_v46 }
 0x89a   :  { %v974_v54 = vmul.f32 %v3119_v49, %v973_v52  ;;  %v971_v55 = vsel %vm970_vm4, %v3117_v33, %v967_v51 }
 0x89b   :  { %v992_v56 = vmul.f32 %v971_v55, %v3700_v23 }
 0x89c   :  { %v975_v38 = vmul.f32 0.5, %v974_v54 }
 0x89d   :  { %v998_v59 = vmul.f32 %v3043_v48, %v992_v56 }
 0x89e   :  { %v976_v39 = vsub.f32 1.5, %v975_v38 }
 0x89f   :  { %v3121_v42 = vpop.eup %3120  ;;  %v3776_v2 = vadd.f32 %v3044_v58, %v998_v59 }
 0x8a0   :  { %v977_v31 = vmul.f32 %v3119_v49, %v976_v39  ;;  %v983_v9 = vmul.f32 %v3121_v42, %v961_v46  ;;  %vm989_vm8 = vweird.f32 %v3121_v42 }
 0x8a1   :  { %vm990_vm10 = vmor %vm988_vm9, %vm989_vm8 }
 0x8a2   :  { %v981_v57 = vsel %vm980_vm7, %v3119_v49, %v977_v31  ;;  %v984_v11 = vmul.f32 %v3121_v42, %v983_v9 }
 0x8a3   :  { %v993_v16 = vmul.f32 %v981_v57, %v3706_v60 }
 0x8a4   :  { %v985_v62 = vmul.f32 0.5, %v984_v11 }
 0x8a5   :  { %v999_v63 = vmul.f32 %v3043_v48, %v993_v16 }
 0x8a6   :  { %v986_v1 = vsub.f32 1.5, %v985_v62 }
 0x8a7   :  { %v3778_v23 = vadd.f32 %v3044_v58, %v999_v63 }
 0x8a8   :  { %v987_v3 = vmul.f32 %v3121_v42, %v986_v1 }
 0x8a9   :  { %v1007_v30 = vpack.c.bf16 %v3778_v23, %v3776_v2 }
 0x8aa   :  { %v991_v4 = vsel %vm990_vm10, %v3121_v42, %v987_v3 }
 0x8ab   :  { %2637 = vmatmul.msk.bf16.vlgmr.msrb.gmra.mxu2 %vm245_vm1, %v1007_v30  ;;  %2639 = vmatmul.msk.bf16.vlgmr.msrb.gmra.mxu3 %vm245_vm1, %v1007_v30  ;;  %v994_v60 = vmul.f32 %v991_v4, %v3712_v37  ;;  %v2975_v37 = vld [vmem:[%s4339_s19 + $0x30] sm:$0xff] }
 0x8ac   :  { %1296 = vmatpush.bf16.msrb.mxu1 %v2975_v37 }
 0x8ad   :  { %v1000_v53 = vmul.f32 %v3043_v48, %v994_v60 }
 0x8af   :  { %v3785_v6 = vadd.f32 %v3044_v58, %v1000_v53 }
 0x8b0   :  { %1297 = vmatpush.bf16.msrb.mxu1 %v2974_v13 }
 0x8b1   :  { %v1008_v7 = vpack.c.bf16 %v3785_v6, %v3785_v6 }
 0x8b4   :  { %1298 = vmatpush.bf16.msrb.mxu1 %v2973_v5 }
 0x8b8   :  { %1299 = vmatpush.bf16.msrb.mxu1 %v2972_v15 }
 0x8bb   :  { %2638 = vmatmul.msk.bf16.gmra.mxu2 %vm245_vm1, %v1008_v7  ;;  %2640 = vmatmul.msk.bf16.gmra.mxu3 %vm245_vm1, %v1008_v7 }
 0x8bc   :  { %1300 = vmatpush.bf16.msrb.mxu1 %v2971_v18 }
 0x8c0   :  { %1301 = vmatpush.bf16.msrb.mxu1 %v2970_v20 }
 0x8c4   :  { %1302 = vmatpush.bf16.msrb.mxu1 %v2969_v22 }
 0x92e   :  { %v1078_v26 = vpop.f32.mrf.mxu2  ;;  %v1096_v50 = vpop.f32.mrf.mxu3 }
 0x92f   :  { %v1079_v27 = vadd.f32 %v1078_v26, %v1019_v25  ;;  %v1097_v28 = vadd.f32 %v1096_v50, %v1020_v47 }
 0x931   :  { %v1111_v29 = vmul.f32 0.044715, %v1079_v27  ;;  %v1112_v32 = vmul.f32 0.044715, %v1097_v28  ;;  %v1105_v15 = vmul.f32 0.5, %v1079_v27  ;;  %v1106_v20 = vmul.f32 0.5, %v1097_v28 }
 0x933   :  { %v1117_v33 = vmul.f32 %v1111_v29, %v1079_v27  ;;  %v1118_v34 = vmul.f32 %v1112_v32, %v1097_v28 }
 0x935   :  { %v1123_v35 = vmul.f32 %v1117_v33, %v1079_v27  ;;  %v1124_v36 = vmul.f32 %v1118_v34, %v1097_v28 }
 0x936   :  { %v1080_v40 = vpop.f32.mrf.mxu2  ;;  %v1098_v41 = vpop.f32.mrf.mxu3 }
 0x937   :  { %v1129_v43 = vadd.f32 %v1123_v35, %v1079_v27  ;;  %v1081_v44 = vadd.f32 %v1080_v40, %v1019_v25  ;;  %v1099_v49 = vadd.f32 %v1098_v41, %v1020_v47  ;;  %v1130_v46 = vadd.f32 %v1124_v36, %v1097_v28 }
 0x939   :  { %v1113_v51 = vmul.f32 0.044715, %v1081_v44  ;;  %v1114_v52 = vmul.f32 0.044715, %v1099_v49  ;;  %v1135_v54 = vmul.f32 0.7978846, %v1129_v43 }
 0x93a   :  { %v1136_v38 = vmul.f32 0.7978846, %v1130_v46  ;;  %v1107_v17 = vmul.f32 0.5, %v1081_v44  ;;  %v1108_v45 = vmul.f32 0.5, %v1099_v49  ;;  %v3045_v43 = vld [vmem:[%s4338_s20] ss:$0 sm:$0xff] }
 0x93b   :  { %v1119_v55 = vmul.f32 %v1113_v51, %v1081_v44  ;;  %v1120_v39 = vmul.f32 %v1114_v52, %v1099_v49  ;;  %3122 = vtanh.f32 %v1135_v54 }
 0x93c   :  { %3124 = vtanh.f32 %v1136_v38 }
 0x93d   :  { %v1125_v42 = vmul.f32 %v1119_v55, %v1081_v44  ;;  %v1126_v48 = vmul.f32 %v1120_v39, %v1099_v49 }
 0x93e   :  { %v1083_v56 = vpop.f32.mrf.mxu2  ;;  %v1101_v31 = vpop.f32.mrf.mxu3 }
 0x93f   :  { %v1131_v9 = vadd.f32 %v1125_v42, %v1081_v44  ;;  %v1084_v57 = vadd.f32 %v1083_v56, %v1019_v25  ;;  %v1102_v11 = vadd.f32 %v1101_v31, %v1020_v47  ;;  %v1132_v58 = vadd.f32 %v1126_v48, %v1099_v49 }
 0x941   :  { %v1137_v59 = vmul.f32 0.7978846, %v1131_v9  ;;  %v1115_v16 = vmul.f32 0.044715, %v1084_v57  ;;  %v1138_v62 = vmul.f32 0.7978846, %v1132_v58  ;;  %v3123_v30 = vpop.eup %3122 }
 0x942   :  { %v1116_v63 = vmul.f32 0.044715, %v1102_v11  ;;  %v3125_v60 = vpop.eup %3124  ;;  %v1147_v37 = vadd.f32 1.0, %v3123_v30  ;;  %v1109_v34 = vmul.f32 0.5, %v1084_v57  ;;  %v1110_v35 = vmul.f32 0.5, %v1102_v11 }
 0x943   :  { %3126 = vtanh.f32 %v1137_v59  ;;  %v1121_v1 = vmul.f32 %v1115_v16, %v1084_v57  ;;  %v1148_v24 = vadd.f32 1.0, %v3125_v60 }
 0x944   :  { %3128 = vtanh.f32 %v1138_v62  ;;  %v1122_v3 = vmul.f32 %v1116_v63, %v1102_v11  ;;  %v1153_v22 = vmul.f32 %v1147_v37, %v1105_v15  ;;  %v2742_v15 = vld [vmem:[%s4330_s11 + $0x78] sm:$0xf0] }
 0x945   :  { %v1127_v4 = vmul.f32 %v1121_v1, %v1084_v57  ;;  %v1154_v25 = vmul.f32 %v1148_v24, %v1106_v20  ;;  %v2992_v24 = vld [vmem:[%s4330_s11 + $0x74] sm:$0xf0]  ;;  %v2989_v20 = vld [vmem:[%s4330_s11 + $0x64] sm:$0xf] }
 0x946   :  { %v1085_v53 = vpop.f32.mrf.mxu2  ;;  %v1103_v7 = vpop.f32.mrf.mxu3  ;;  %v1128_v8 = vmul.f32 %v1122_v3, %v1102_v11 }
 0x947   :  { %v1133_v0 = vadd.f32 %v1127_v4, %v1084_v57 }
 0x948   :  { %v1134_v12 = vadd.f32 %v1128_v8, %v1102_v11 }
 0x949   :  { %v3127_v13 = vpop.eup %3126  ;;  %v1139_v5 = vmul.f32 0.7978846, %v1133_v0 }
 0x94a   :  { %v3129_v14 = vpop.eup %3128  ;;  %v1149_v18 = vadd.f32 1.0, %v3127_v13  ;;  %v1140_v19 = vmul.f32 0.7978846, %v1134_v12  ;;  %v2740_v13 = vld [vmem:[%s4330_s11 + $0x70] sm:$0xf] }
 0x94b   :  { %v1150_v21 = vadd.f32 1.0, %v3129_v14  ;;  %3130 = vtanh.f32 %v1139_v5  ;;  %v2991_v5 = vld [vmem:[%s4330_s11 + $0x74] sm:$0xf]  ;;  %v2741_v14 = vor.u32 %v2992_v24, %v2740_v13 }
 0x94c   :  { %v1155_v10 = vmul.f32 %v1149_v18, %v1107_v17  ;;  %3132 = vtanh.f32 %v1140_v19  ;;  %v2745_v17 = vor.u32 %v2991_v5, %v2742_v15  ;;  %v2732_v18 = vld [vmem:[%s4330_s11 + $0x60] sm:$0xf]  ;;  %v2990_v19 = vld [vmem:[%s4330_s11 + $0x64] sm:$0xf0] }
 0x94d   :  { %v1156_v47 = vmul.f32 %v1150_v21, %v1108_v45  ;;  %1482 = vmatpush.bf16.msra.mxu2 %v2741_v14  ;;  %v2733_v45 = vor.u32 %v2990_v19, %v2732_v18  ;;  %v2734_v21 = vld [vmem:[%s4330_s11 + $0x68] sm:$0xf0] }
 0x94e   :  { %v1159_v26 = vpack.c.bf16 %v1155_v10, %v1153_v22  ;;  %1500 = vmatpush.bf16.msra.mxu3 %v2745_v17  ;;  %v2737_v22 = vor.u32 %v2989_v20, %v2734_v21  ;;  %v2724_v10 = vld [vmem:[%s4330_s11 + $0x50] sm:$0xf]  ;;  %v2713_v17 = vld [vmem:[%s4331_s12 + $0x2] sm:$0x3] }
 0x94f   :  { %v1160_v50 = vpack.c.bf16 %v1156_v47, %v1154_v25  ;;  %v2988_v25 = vld [vmem:[%s4330_s11 + $0x54] sm:$0xf0]  ;;  %v2987_v47 = vld [vmem:[%s4330_s11 + $0x54] sm:$0xf]  ;;  %v1428_v18 = vperm.slane %v2713_v17, 0  ;;  %v1429_v21 = vperm.slane %v2713_v17, 1 }
 0x950   :  { %1303 = vmatmul.bf16.vlgmr.msrb.gmra.mxu1 %v1159_v26  ;;  %v2725_v26 = vor.u32 %v2988_v25, %v2724_v10 }
 0x951   :  { %1321 = vmatmul.bf16.vlgmr.msrb.gmra.mxu0 %v1160_v50  ;;  %v3131_v29 = vpop.eup %3130  ;;  %1483 = vmatpush.bf16.msra.mxu2 %v2733_v45  ;;  %v2726_v50 = vld [vmem:[%s4330_s11 + $0x58] sm:$0xf0] }
 0x952   :  { %v3133_v32 = vpop.eup %3132  ;;  %v1151_v33 = vadd.f32 1.0, %v3131_v29  ;;  %1501 = vmatpush.bf16.msra.mxu3 %v2737_v22 }
 0x953   :  { %v1152_v27 = vadd.f32 1.0, %v3133_v32  ;;  %v2729_v32 = vor.u32 %v2987_v47, %v2726_v50  ;;  %v3949_v50 = vld [vmem:[%s4329_s4] ss:$0 sm:$0xff] }
 0x954   :  { %v1157_v36 = vmul.f32 %v1151_v33, %v1109_v34  ;;  %v2986_v34 = vld [vmem:[%s4330_s11 + $0x44] sm:$0xf0] }
 0x955   :  { %v1158_v28 = vmul.f32 %v1152_v27, %v1110_v35  ;;  %1484 = vmatpush.bf16.msra.mxu2 %v2725_v26  ;;  %v2716_v27 = vld [vmem:[%s4330_s11 + $0x40] sm:$0xf]  ;;  %v2985_v35 = vld [vmem:[%s4330_s11 + $0x44] sm:$0xf] }
 0x956   :  { %v1161_v40 = vpack.c.bf16 %v1157_v36, %v1157_v36  ;;  %1502 = vmatpush.bf16.msra.mxu3 %v2729_v32 }
 0x957   :  { %v1162_v41 = vpack.c.bf16 %v1158_v28, %v1158_v28  ;;  %v2717_v28 = vor.u32 %v2986_v34, %v2716_v27  ;;  %v3957_v27 = vld [vmem:[%s4329_s4 + $0x2] ss:$0 sm:$0xff] }
 0x959   :  { %1485 = vmatpush.bf16.msra.mxu2 %v2717_v28 }
 0x960   :  { %1308 = vmatmul.bf16.gmra.mxu1 %v1161_v40  ;;  %v2718_v40 = vld [vmem:[%s4330_s11 + $0x48] sm:$0xf0] }
 0x961   :  { %1326 = vmatmul.bf16.gmra.mxu0 %v1162_v41  ;;  %v2721_v41 = vor.u32 %v2985_v35, %v2718_v40  ;;  %v3965_v35 = vld [vmem:[%s4329_s4 + $0x1] ss:$0 sm:$0xff]  ;;  %v3976_v40 = vld [vmem:[%s4329_s4 + $0x3] ss:$0 sm:$0xff] }
 0x963   :  { %1503 = vmatpush.bf16.msra.mxu3 %v2721_v41 }
 0x9cd   :  { %v1304_v44 = vpop.f32.mrf.mxu1 }
 0x9ce   :  { %v1305_v49 = vadd.f32 %v3045_v43, %v1304_v44  ;;  %v1322_v46 = vpop.f32.mrf.mxu0 }
 0x9d0   :  { %v1323_v51 = vadd.f32 %v1322_v46, %v1305_v49 }
 0x9d2   :  { %v1331_v52 = vadd.f32 %v1323_v51, %v3776_v2 }
 0x9d4   :  { %v1336_v54 = vsel %vm245_vm1, %v1331_v52, 0.0 }
 0x9d5   :  { %v1306_v55 = vpop.f32.mrf.mxu1  ;;  %1337 = vadd.xlane.f32.xlu0 %v1336_v54 }
 0x9d6   :  { %v1307_v38 = vadd.f32 %v3045_v43, %v1306_v55  ;;  %v1324_v39 = vpop.f32.mrf.mxu0 }
 0x9d8   :  { %v1325_v42 = vadd.f32 %v1324_v39, %v1307_v38 }
 0x9da   :  { %v1332_v48 = vadd.f32 %v1325_v42, %v3778_v23 }
 0x9dc   :  { %v1339_v56 = vsel %vm245_vm1, %v1332_v48, 0.0 }
 0x9dd   :  { %v1309_v31 = vpop.f32.mrf.mxu1  ;;  %1340 = vadd.xlane.f32.xlu1 %v1339_v56 }
 0x9de   :  { %v1310_v9 = vadd.f32 %v3045_v43, %v1309_v31  ;;  %v1327_v57 = vpop.f32.mrf.mxu0 }
 0x9e0   :  { %v1328_v11 = vadd.f32 %v1327_v57, %v1310_v9 }
 0x9e2   :  { %v1333_v58 = vadd.f32 %v1328_v11, %v3785_v6 }
 0x9e4   :  { %v1342_v2 = vsel %vm252_vm2, %v1333_v58, 0.0 }
 0x9e5   :  { %v1311_v59 = vpop.f32.mrf.mxu1  ;;  %1343 = vadd.xlane.f32.xlu2 %v1342_v2 }
 0x9e6   :  { %v1329_v16 = vpop.f32.mrf.mxu0  ;;  %v3046_v59 = vld [vmem:[%s4341_s21] ss:$0 sm:$0xff] }
 0xa48   :  { %v1338_v62 = vpop.xlane.xlu0 %1337 }
 0xa49   :  { %v1345_v63 = vmul.f32 %v1338_v62, %v3408_v61 }
 0xa4b   :  { %v3852_v1 = vsub.f32 %v1331_v52, %v1345_v63 }
 0xa4d   :  { %v1351_v23 = vmul.f32 %v3852_v1, %v3852_v1 }
 0xa4f   :  { %v1354_v3 = vsel %vm245_vm1, %v1351_v23, 0.0 }
 0xa50   :  { %v1341_v30 = vpop.xlane.xlu1 %1340  ;;  %1355 = vadd.xlane.f32.xlu0 %v1354_v3 }
 0xa51   :  { %v1346_v4 = vmul.f32 %v1341_v30, %v3408_v61  ;;  %v3047_v30 = vld [vmem:[%s4342_s22] ss:$0 sm:$0xff] }
 0xa53   :  { %v3858_v6 = vsub.f32 %v1332_v48, %v1346_v4 }
 0xa55   :  { %v1352_v60 = vmul.f32 %v3858_v6, %v3858_v6 }
 0xa57   :  { %v1357_v53 = vsel %vm245_vm1, %v1352_v60, 0.0 }
 0xa58   :  { %v1344_v7 = vpop.xlane.xlu2 %1343  ;;  %1358 = vadd.xlane.f32.xlu1 %v1357_v53 }
 0xa59   :  { %v1347_v8 = vmul.f32 %v1344_v7, %v3408_v61 }
 0xa5b   :  { %v3864_v0 = vsub.f32 %v1333_v58, %v1347_v8 }
 0xa5d   :  { %v1353_v37 = vmul.f32 %v3864_v0, %v3864_v0 }
 0xa5f   :  { %v1360_v12 = vsel %vm252_vm2, %v1353_v37, 0.0 }
 0xa60   :  { %1361 = vadd.xlane.f32.xlu2 %v1360_v12 }
 0xac3   :  { %v1356_v29 = vpop.xlane.xlu0 %1355 }
 0xac4   :  { %v1363_v33 = vmul.f32 %v1356_v29, %v3408_v61 }
 0xac6   :  { %v1366_v36 = vadd.f32 1e-12, %v1363_v33 }
 0xac8   :  { %3134 = vrsqrt.f32 %v1366_v36  ;;  %vm1375_vm12 = vweird.f32 %v1366_v36 }
 0xacb   :  { %v1359_v43 = vpop.xlane.xlu1 %1358 }
 0xacc   :  { %v1364_v44 = vmul.f32 %v1359_v43, %v3408_v61 }
 0xace   :  { %v3135_v49 = vpop.eup %3134  ;;  %v1367_v46 = vadd.f32 1e-12, %v1364_v44 }
 0xacf   :  { %v1370_v51 = vmul.f32 %v3135_v49, %v1366_v36  ;;  %vm1376_vm11 = vweird.f32 %v3135_v49 }
 0xad0   :  { %3136 = vrsqrt.f32 %v1367_v46  ;;  %vm1377_vm0 = vmor %vm1375_vm12, %vm1376_vm11  ;;  %vm1385_vm4 = vweird.f32 %v1367_v46 }
 0xad1   :  { %v1371_v52 = vmul.f32 %v3135_v49, %v1370_v51 }
 0xad3   :  { %v1372_v54 = vmul.f32 0.5, %v1371_v52  ;;  %v1362_v55 = vpop.xlane.xlu2 %1361 }
 0xad4   :  { %v1365_v38 = vmul.f32 %v1362_v55, %v3408_v61 }
 0xad5   :  { %v1373_v39 = vsub.f32 1.5, %v1372_v54 }
 0xad6   :  { %v3137_v42 = vpop.eup %3136  ;;  %v1368_v48 = vadd.f32 1e-12, %v1365_v38 }
 0xad7   :  { %v1374_v56 = vmul.f32 %v3135_v49, %v1373_v39  ;;  %v1380_v31 = vmul.f32 %v3137_v42, %v1367_v46  ;;  %vm1386_vm3 = vweird.f32 %v3137_v42 }
 0xad8   :  { %3138 = vrsqrt.f32 %v1368_v48  ;;  %vm1387_vm5 = vmor %vm1385_vm4, %vm1386_vm3  ;;  %vm1395_vm7 = vweird.f32 %v1368_v48 }
 0xad9   :  { %v1381_v9 = vmul.f32 %v3137_v42, %v1380_v31  ;;  %v1378_v57 = vsel %vm1377_vm0, %v3135_v49, %v1374_v56 }
 0xada   :  { %v1399_v16 = vmul.f32 %v1378_v57, %v3852_v1 }
 0xadb   :  { %v1382_v11 = vmul.f32 0.5, %v1381_v9 }
 0xadc   :  { %v1405_v4 = vmul.f32 %v3046_v59, %v1399_v16 }
 0xadd   :  { %v1383_v58 = vsub.f32 1.5, %v1382_v11 }
 0xade   :  { %v3139_v2 = vpop.eup %3138  ;;  %v3928_v37 = vadd.f32 %v3047_v30, %v1405_v4 }
 0xadf   :  { %v1384_v62 = vmul.f32 %v3137_v42, %v1383_v58  ;;  %v1390_v63 = vmul.f32 %v3139_v2, %v1368_v48  ;;  %vm1396_vm6 = vweird.f32 %v3139_v2 }
 0xae0   :  { %vm1397_vm8 = vmor %vm1395_vm7, %vm1396_vm6 }
 0xae1   :  { %v1388_v23 = vsel %vm1387_vm5, %v3137_v42, %v1384_v62  ;;  %v1391_v3 = vmul.f32 %v3139_v2, %v1390_v63 }
 0xae2   :  { %v1400_v60 = vmul.f32 %v1388_v23, %v3858_v6 }
 0xae3   :  { %v1392_v53 = vmul.f32 0.5, %v1391_v3 }
 0xae4   :  { %v1406_v7 = vmul.f32 %v3046_v59, %v1400_v60 }
 0xae5   :  { %v1393_v8 = vsub.f32 1.5, %v1392_v53 }
 0xae6   :  { %v3930_v1 = vadd.f32 %v3047_v30, %v1406_v7 }
 0xae7   :  { %v1394_v12 = vmul.f32 %v3139_v2, %v1393_v8 }
 0xae8   :  { %v1414_v13 = vpack.c.bf16 %v3930_v1, %v3928_v37 }
 0xae9   :  { %v1398_v24 = vsel %vm1397_vm8, %v3139_v2, %v1394_v12 }
 0xaea   :  { %2746 = vmatmul.msk.bf16.vlgmr.msra.gmra.mxu2 %vm245_vm1, %v1414_v13  ;;  %2748 = vmatmul.msk.bf16.vlgmr.msra.gmra.mxu3 %vm245_vm1, %v1414_v13  ;;  %v1401_v6 = vmul.f32 %v1398_v24, %v3864_v0 }
 0xaec   :  { %v1407_v5 = vmul.f32 %v3046_v59, %v1401_v6 }
 0xaee   :  { %v3937_v14 = vadd.f32 %v3047_v30, %v1407_v5 }
 0xaf0   :  { %v1415_v15 = vpack.c.bf16 %v3937_v14, %v3937_v14 }
 0xafa   :  { %2747 = vmatmul.msk.bf16.gmra.mxu2 %vm245_vm1, %v1415_v15  ;;  %2749 = vmatmul.msk.bf16.gmra.mxu3 %vm245_vm1, %v1415_v15 }
 0xb6d   :  { %v1487_v19 = vpop.f32.mrf.mxu2  ;;  %v1505_v20 = vpop.f32.mrf.mxu3 }
 0xb6e   :  { %v1488_v45 = vadd.f32 %v1487_v19, %v1428_v18  ;;  %v1506_v22 = vadd.f32 %v1505_v20, %v1429_v21 }
 0xb70   :  { %v1514_v0 = vmul.f32 0.25, %v1488_v45  ;;  %v3960_v34 = vmul.f32 %v3957_v27, %v1506_v22  ;;  %v1664_v4 = vmul.f32 %v3965_v35, %v1506_v22  ;;  %v1595_v60 = vmul.f32 %v3949_v50, %v1506_v22 }
 0xb71   :  { %v1886_v24 = vmul.f32 %v3976_v40, %v1506_v22 }
 0xb72   :  { %v3952_v29 = vmul.f32 %v3949_v50, %v1514_v0  ;;  %v3968_v36 = vmul.f32 %v3965_v35, %v1514_v0  ;;  %v3971_v28 = vmul.f32 %v3957_v27, %v1514_v0  ;;  %v3979_v41 = vmul.f32 %v3976_v40, %v1514_v0 }
 0xb75   :  { %v1489_v10 = vpop.f32.mrf.mxu2  ;;  %v1507_v25 = vpop.f32.mrf.mxu3 }
 0xb76   :  { %v1490_v47 = vadd.f32 %v1489_v10, %v1428_v18  ;;  %v1508_v26 = vadd.f32 %v1507_v25, %v1429_v21 }
 0xb78   :  { %v1515_v32 = vmul.f32 0.25, %v1490_v47  ;;  %v1517_v33 = vpack.c.bf16 %v1490_v47, %v1488_v45  ;;  %v1788_v43 = vmul.f32 %v3957_v27, %v1508_v26  ;;  %v1665_v16 = vmul.f32 %v3965_v35, %v1508_v26 }
 0xb79   :  { %v1596_v62 = vmul.f32 %v3949_v50, %v1508_v26  ;;  %v1887_v12 = vmul.f32 %v3976_v40, %v1508_v26 }
 0xb7a   :  { %v1520_v44 = vmul.f32 %v3949_v50, %v1515_v32  ;;  %v1601_v49 = vmul.f32 %v3965_v35, %v1515_v32  ;;  %v3985_v46 = vmul.f32 %v3957_v27, %v1515_v32  ;;  %v3988_v51 = vmul.f32 %v3976_v40, %v1515_v32  ;;  %1526 = vrot.lane.b32.xlu1 %v1517_v33, %s3221_s1 }
 0xb7b   :  { %v1790_v52 = vpack.c.bf16 %v1788_v43, %v3960_v34  ;;  %v1667_v7 = vpack.c.bf16 %v1665_v16, %v1664_v4  ;;  %v1598_v8 = vpack.c.bf16 %v1596_v62, %v1595_v60  ;;  %v1889_v6 = vpack.c.bf16 %v1887_v12, %v1886_v24 }
 0xb7c   :  { %v1825_v54 = vpack.c.bf16 %v3988_v51, %v3979_v41  ;;  %v1522_v55 = vpack.c.bf16 %v1520_v44, %v3952_v29  ;;  %v1603_v38 = vpack.c.bf16 %v1601_v49, %v3968_v36  ;;  %v1726_v39 = vpack.c.bf16 %v3985_v46, %v3971_v28  ;;  %v4046_v46 = vld [vmem:[%s4332_s3 + $0x10] sm:$0x3] }
 0xb7d   :  { %v1492_v42 = vpop.f32.mrf.mxu2  ;;  %v1510_v48 = vpop.f32.mrf.mxu3 }
 0xb7e   :  { %v1493_v56 = vadd.f32 %v1492_v42, %v1428_v18  ;;  %v1511_v31 = vadd.f32 %v1510_v48, %v1429_v21 }
 0xb80   :  { %v1518_v9 = vpack.c.bf16 %v1493_v56, %v1493_v56  ;;  %v1666_v57 = vmul.f32 %v3965_v35, %v1511_v31  ;;  %v1597_v11 = vmul.f32 %v3949_v50, %v1511_v31  ;;  %v1888_v58 = vmul.f32 %v3976_v40, %v1511_v31 }
 0xb81   :  { %v1789_v17 = vmul.f32 %v3957_v27, %v1511_v31  ;;  %v4017_v21 = vmul.f32 0.25, %v1493_v56 }
 0xb82   :  { %1528 = vrot.lane.b32.xlu0 %v1518_v9, %s3221_s1  ;;  %v1668_v2 = vpack.c.bf16 %v1666_v57, %v1666_v57  ;;  %v1599_v59 = vpack.c.bf16 %v1597_v11, %v1597_v11  ;;  %v1890_v53 = vpack.c.bf16 %v1888_v58, %v1888_v58 }
 0xb83   :  { %v1791_v19 = vpack.c.bf16 %v1789_v17, %v1789_v17  ;;  %v1521_v0 = vmul.f32 %v3949_v50, %v4017_v21  ;;  %v1602_v22 = vmul.f32 %v3965_v35, %v4017_v21  ;;  %v1725_v47 = vmul.f32 %v3957_v27, %v4017_v21  ;;  %v4032_v50 = vld [vmem:[%s4332_s3] sm:$0xff]  ;;  %v4039_v27 = vld [vmem:[%s4332_s3 + $0x8] sm:$0xff] }
 0xb84   :  { %v1676_v63 = vsel %vm605_vm13, %v1668_v2, 0  ;;  %v1703_v23 = vsel %vm605_vm13, %v1599_v59, 0  ;;  %v1898_v13 = vsel %vm605_vm13, %v1890_v53, 0 }
 0xb85   :  { %v1494_v3 = vpop.f32.mrf.mxu2  ;;  %v1512_v30 = vpop.f32.mrf.mxu3  ;;  %1684 = vmatpush.bf16.msrb.mxu2 %v1676_v63  ;;  %1711 = vmatpush.bf16.msrb.mxu3 %v1703_v23  ;;  %v1799_v45 = vsel %vm605_vm13, %v1791_v19, 0  ;;  %v1523_v10 = vpack.c.bf16 %v1521_v0, %v1521_v0  ;;  %v1604_v25 = vpack.c.bf16 %v1602_v22, %v1602_v22  ;;  %v1727_v26 = vpack.c.bf16 %v1725_v47, %v1725_v47 }
 0xb89   :  { %1685 = vmatpush.bf16.msrb.mxu2 %v1667_v7  ;;  %1712 = vmatpush.bf16.msrb.mxu3 %v1598_v8 }
 0xb8d   :  { %1906 = vmatpush.bf16.msra.mxu3 %v1898_v13 }
 0xb91   :  { %1907 = vmatpush.bf16.msra.mxu3 %v1889_v6 }
 0xbec   :  { %v1527_v18 = vpop.permute.xlu1 %1526 }
 0xbed   :  { %v1537_v20 = vsel %vm245_vm1, %v1527_v18, 0 }
 0xbf4   :  { %v1529_v5 = vpop.permute.xlu0 %1528 }
 0xbf5   :  { %v1540_v15 = vsel %vm245_vm1, %v1529_v5, 0 }
 0xbf6   :  { %1548 = vmatpush.bf16.xpose.msra.mxu1 %v1540_v15  ;;  %1617 = vmatpush.bf16.xpose.msra.mxu0 %v1540_v15 }
 0xbf7   :  { %1839 = vmatpush.bf16.xpose.msra.mxu2 %v1540_v15 }
 0xbfe   :  { %1549 = vmatpush.bf16.xpose.msra.mxu1 %v1537_v20  ;;  %1618 = vmatpush.bf16.xpose.msra.mxu0 %v1537_v20 }
 0xbff   :  { %1840 = vmatpush.bf16.xpose.msra.mxu2 %v1537_v20 }
 0xc05   :  { %2750 = vmatmul.msk.bf16.vlgmr.msra.gmra.mxu1 %vm245_vm1, %v1522_v55  ;;  %2752 = vmatmul.msk.bf16.vlgmr.msra.gmra.mxu0 %vm245_vm1, %v1603_v38 }
 0xc06   :  { %1740 = vmatpush.bf16.xpose.msrb.mxu1 %v1540_v15  ;;  %1807 = vmatpush.bf16.msrb.mxu0 %v1799_v45 }
 0xc0a   :  { %1808 = vmatpush.bf16.msrb.mxu0 %v1790_v52 }
 0xc0e   :  { %1741 = vmatpush.bf16.xpose.msrb.mxu1 %v1537_v20 }
 0xc15   :  { %2751 = vmatmul.msk.bf16.gmra.mxu1 %vm245_vm1, %v1523_v10  ;;  %2753 = vmatmul.msk.bf16.gmra.mxu0 %vm245_vm1, %v1604_v25 }
 0xc25   :  { %2758 = vmatmul.msk.bf16.vlgmr.msrb.gmra.mxu1 %vm245_vm1, %v1726_v39 }
 0xc35   :  { %2759 = vmatmul.msk.bf16.gmra.mxu1 %vm245_vm1, %v1727_v26 }
 0xc82   :  { %v1551_v29 = vpop.f32.mrf.mxu1  ;;  %v1620_v32 = vpop.f32.mrf.mxu0 }
 0xc83   :  { %v1621_v33 = vadd.f32 %v4032_v50, %v1620_v32  ;;  %v1552_v12 = vadd.f32 %v4032_v50, %v1551_v29 }
 0xc85   :  { %v1629_v34 = vsel %vm483_vm14, %v1621_v33, -inf  ;;  %v1560_v13 = vsel %vm483_vm14, %v1552_v12, -inf }
 0xc86   :  { %1630 = vmax.xlane.f32.xlu2 %v1629_v34 }
 0xc8a   :  { %v1553_v35 = vpop.f32.mrf.mxu1  ;;  %v1622_v36 = vpop.f32.mrf.mxu0 }
 0xc8b   :  { %v1623_v28 = vadd.f32 %v4039_v27, %v1622_v36  ;;  %v1554_v24 = vadd.f32 %v4039_v27, %v1553_v35 }
 0xc8d   :  { %v1632_v43 = vsel %vm483_vm14, %v1623_v28, -inf  ;;  %v1563_v6 = vsel %vm483_vm14, %v1554_v24, -inf }
 0xc8e   :  { %1633 = vmax.xlane.f32.xlu2 %v1632_v43  ;;  %v1824_v43 = vmul.f32 %v3976_v40, %v4017_v21 }
 0xc92   :  { %v1556_v44 = vpop.f32.mrf.mxu1  ;;  %v1625_v49 = vpop.f32.mrf.mxu0 }
 0xc93   :  { %v1626_v52 = vadd.f32 %v4046_v46, %v1625_v49  ;;  %v1557_v5 = vadd.f32 %v4046_v46, %v1556_v44  ;;  %v1826_v44 = vpack.c.bf16 %v1824_v43, %v1824_v43 }
 0xc95   :  { %v1635_v55 = vsel %vm490_vm15, %v1626_v52, -inf  ;;  %v1566_v15 = vsel %vm490_vm15, %v1557_v5, -inf }
 0xc96   :  { %1636 = vmax.xlane.f32.xlu0 %v1635_v55 }
 0xc9a   :  { %v1558_v38 = vpop.f32.mrf.mxu1  ;;  %v1627_v39 = vpop.f32.mrf.mxu0 }
 0xca2   :  { %v4050_v42 = vpop.f32.mrf.mxu1 }
 0xca3   :  { %v1744_v21 = vadd.f32 %v4032_v50, %v4050_v42 }
 0xcaa   :  { %v1745_v48 = vpop.f32.mrf.mxu1 }
 0xcab   :  { %v4057_v60 = vadd.f32 %v4039_v27, %v1745_v48 }
 0xcad   :  { %v1755_v8 = vsel %vm483_vm14, %v4057_v60, -inf }
 0xcb2   :  { %v4052_v56 = vpop.f32.mrf.mxu1 }
 0xcba   :  { %v1750_v31 = vpop.f32.mrf.mxu1 }
 0xcf9   :  { %v1631_v9 = vpop.xlane.xlu2 %1630 }
 0xcfa   :  { %v1638_v57 = vsub.f32 %v1621_v33, %v1631_v9 }
 0xcfc   :  { %v1641_v11 = vmul.f32 1.442695, %v1638_v57 }
 0xcfe   :  { %3140 = vpow2.f32 %v1641_v11  ;;  %v1752_v11 = vsel %vm483_vm14, %v1744_v21, -inf }
 0xd01   :  { %v1634_v58 = vpop.xlane.xlu2 %1633 }
 0xd02   :  { %v1639_v2 = vsub.f32 %v1623_v28, %v1634_v58 }
 0xd04   :  { %v3141_v59 = vpop.eup %3140  ;;  %v1643_v16 = vmul.f32 1.442695, %v1639_v2 }
 0xd05   :  { %v1647_v62 = vsel %vm483_vm14, %v3141_v59, 0.0 }
 0xd06   :  { %3142 = vpow2.f32 %v1643_v16  ;;  %1648 = vadd.xlane.f32.xlu2 %v1647_v62 }
 0xd09   :  { %v1637_v63 = vpop.xlane.xlu0 %1636 }
 0xd0a   :  { %v1640_v23 = vsub.f32 %v1626_v52, %v1637_v63 }
 0xd0c   :  { %v3143_v3 = vpop.eup %3142  ;;  %v1645_v30 = vmul.f32 1.442695, %v1640_v23 }
 0xd0d   :  { %v1650_v4 = vsel %vm483_vm14, %v3143_v3, 0.0 }
 0xd0e   :  { %3144 = vpow2.f32 %v1645_v30  ;;  %1651 = vadd.xlane.f32.xlu1 %v1650_v4 }
 0xd14   :  { %v3145_v53 = vpop.eup %3144 }
 0xd15   :  { %v1653_v7 = vsel %vm490_vm15, %v3145_v53, 0.0 }
 0xd16   :  { %1654 = vadd.xlane.f32.xlu2 %v1653_v7  ;;  %1756 = vmax.xlane.f32.xlu1 %v1755_v8 }
 0xd1e   :  { %1561 = vmax.xlane.f32.xlu2 %v1560_v13 }
 0xd26   :  { %1564 = vmax.xlane.f32.xlu2 %v1563_v6 }
 0xd2e   :  { %1567 = vmax.xlane.f32.xlu2 %v1566_v15 }
 0xd79   :  { %v1649_v17 = vpop.xlane.xlu2 %1648 }
 0xd7a   :  { %3146 = vrcp.f32 %v1649_v17 }
 0xd80   :  { %v3147_v19 = vpop.eup %3146 }
 0xd81   :  { %v1652_v18 = vpop.xlane.xlu1 %1651  ;;  %v1659_v45 = vmul.f32 %v3147_v19, %v3141_v59 }
 0xd82   :  { %3148 = vrcp.f32 %v1652_v18 }
 0xd88   :  { %v3149_v20 = vpop.eup %3148 }
 0xd89   :  { %v1660_v0 = vmul.f32 %v3149_v20, %v3143_v3  ;;  %v1655_v22 = vpop.xlane.xlu2 %1654  ;;  %v1757_v30 = vpop.xlane.xlu1 %1756 }
 0xd8a   :  { %3150 = vrcp.f32 %v1655_v22  ;;  %v1762_v7 = vsub.f32 %v4057_v60, %v1757_v30 }
 0xd8b   :  { %v1662_v10 = vpack.c.bf16 %v1660_v0, %v1659_v45 }
 0xd8d   :  { %2754 = vmatmul.msk.bf16.vlgmr.msrb.gmra.mxu2 %vm483_vm14, %v1662_v10 }
 0xd90   :  { %v3151_v47 = vpop.eup %3150 }
 0xd91   :  { %v1562_v25 = vpop.xlane.xlu2 %1561  ;;  %v1661_v26 = vmul.f32 %v3151_v47, %v3145_v53 }
 0xd92   :  { %v1569_v51 = vsub.f32 %v1552_v12, %v1562_v25  ;;  %v1766_v12 = vmul.f32 1.442695, %v1762_v7 }
 0xd93   :  { %v1663_v32 = vpack.c.bf16 %v1661_v26, %v1661_v26 }
 0xd94   :  { %v1572_v31 = vmul.f32 1.442695, %v1569_v51 }
 0xd99   :  { %v1565_v29 = vpop.xlane.xlu2 %1564 }
 0xd9a   :  { %v1570_v39 = vsub.f32 %v1554_v24, %v1565_v29 }
 0xd9c   :  { %v1574_v40 = vmul.f32 1.442695, %v1570_v39 }
 0xd9d   :  { %2755 = vmatmul.msk.bf16.gmra.mxu2 %vm483_vm14, %v1663_v32 }
 0xda1   :  { %v1568_v33 = vpop.xlane.xlu2 %1567 }
 0xda2   :  { %v1571_v34 = vsub.f32 %v1557_v5, %v1568_v33 }
 0xda4   :  { %v1576_v35 = vmul.f32 1.442695, %v1571_v34 }
 0xda6   :  { %3152 = vpow2.f32 %v1576_v35 }
 0xda7   :  { %3154 = vpow2.f32 %v1572_v31 }
 0xda8   :  { %3156 = vpow2.f32 %v1574_v40 }
 0xdac   :  { %v4070_v36 = vpop.eup %3152 }
 0xdad   :  { %2762 = vmatmul.msk.bf16.vlgmr.msra.gmra.mxu2 %vm245_vm1, %v1825_v54  ;;  %v1584_v28 = vsel %vm490_vm15, %v4070_v36, 0.0  ;;  %v3155_v2 = vpop.eup %3154 }
 0xdae   :  { %1585 = vadd.xlane.f32.xlu1 %v1584_v28  ;;  %v3157_v59 = vpop.eup %3156  ;;  %v1578_v62 = vsel %vm483_vm14, %v3155_v2, 0.0 }
 0xdaf   :  { %v1581_v63 = vsel %vm483_vm14, %v3157_v59, 0.0 }
 0xdbd   :  { %2763 = vmatmul.msk.bf16.gmra.mxu2 %vm245_vm1, %v1826_v44 }
 0xe10   :  { %v4081_v49 = vpop.f32.mrf.mxu2 }
 0xe18   :  { %v4083_v52 = vpop.f32.mrf.mxu2 }
 0xe20   :  { %v4085_v55 = vpop.f32.mrf.mxu2 }
 0xe21   :  { %v1586_v33 = vpop.xlane.xlu1 %1585 }
 0xe28   :  { %v1694_v38 = vpop.f32.mrf.mxu2 }
 0xe30   :  { %v1842_v41 = vpop.f32.mrf.mxu2 }
 0xe31   :  { %v1843_v54 = vadd.f32 %v4032_v50, %v1842_v41  ;;  %v1749_v50 = vadd.f32 %v4046_v46, %v4052_v56 }
 0xe33   :  { %v1851_v48 = vsel %vm483_vm14, %v1843_v54, -inf  ;;  %v1758_v3 = vsel %vm490_vm15, %v1749_v50, -inf }
 0xe34   :  { %1852 = vmax.xlane.f32.xlu0 %v1851_v48 }
 0xe38   :  { %v1844_v9 = vpop.f32.mrf.mxu2 }
 0xe39   :  { %v1845_v57 = vadd.f32 %v4039_v27, %v1844_v9 }
 0xe3b   :  { %v1854_v58 = vsel %vm483_vm14, %v1845_v57, -inf }
 0xe3c   :  { %1753 = vmax.xlane.f32.xlu0 %v1752_v11  ;;  %1855 = vmax.xlane.f32.xlu2 %v1854_v58 }
 0xe40   :  { %v1847_v16 = vpop.f32.mrf.mxu2 }
 0xe41   :  { %v1848_v27 = vadd.f32 %v4046_v46, %v1847_v16 }
 0xe43   :  { %v1857_v23 = vsel %vm490_vm15, %v1848_v27, -inf }
 0xe44   :  { %1579 = vadd.xlane.f32.xlu2 %v1578_v62  ;;  %1582 = vadd.xlane.f32.xlu0 %v1581_v63 }
 0xe48   :  { %v1849_v42 = vpop.f32.mrf.mxu2 }
 0xe4c   :  { %1858 = vmax.xlane.f32.xlu2 %v1857_v23  ;;  %1759 = vmax.xlane.f32.xlu0 %v1758_v3 }
 0xea7   :  { %v1853_v4 = vpop.xlane.xlu0 %1852 }
 0xea8   :  { %v1860_v53 = vsub.f32 %v1843_v54, %v1853_v4 }
 0xeaa   :  { %v1863_v8 = vmul.f32 1.442695, %v1860_v53 }
 0xeac   :  { %3158 = vpow2.f32 %v1863_v8 }
 0xead   :  { %3160 = vpow2.f32 %v1766_v12 }
 0xeaf   :  { %v1754_v13 = vpop.xlane.xlu0 %1753  ;;  %v1856_v24 = vpop.xlane.xlu2 %1855 }
 0xeb0   :  { %v1761_v56 = vsub.f32 %v1744_v21, %v1754_v13  ;;  %v1861_v6 = vsub.f32 %v1845_v57, %v1856_v24 }
 0xeb2   :  { %v3159_v46 = vpop.eup %3158  ;;  %v1764_v5 = vmul.f32 1.442695, %v1761_v56  ;;  %v1865_v15 = vmul.f32 1.442695, %v1861_v6 }
 0xeb3   :  { %v1869_v17 = vsel %vm483_vm14, %v3159_v46, 0.0  ;;  %v3161_v20 = vpop.eup %3160 }
 0xeb4   :  { %3162 = vpow2.f32 %v1764_v5  ;;  %1870 = vadd.xlane.f32.xlu1 %v1869_v17  ;;  %v1773_v22 = vsel %vm483_vm14, %v3161_v20, 0.0  ;;  %v2995_v5 = vld [vmem:[%s4333_s13 + $0x30] sm:$0xff]  ;;  %v2993_v17 = vld [vmem:[%s4333_s13 + $0x20] sm:$0xff] }
 0xeb5   :  { %3164 = vpow2.f32 %v1865_v15  ;;  %v2994_v15 = vld [vmem:[%s4333_s13 + $0x28] sm:$0xff] }
 0xeb7   :  { %v1583_v18 = vpop.xlane.xlu0 %1582  ;;  %v1580_v19 = vpop.xlane.xlu2 %1579 }
 0xeb8   :  { %3166 = vrcp.f32 %v1583_v18 }
 0xeb9   :  { %3168 = vrcp.f32 %v1580_v19 }
 0xeba   :  { %v3163_v60 = vpop.eup %3162  ;;  %3170 = vrcp.f32 %v1586_v33 }
 0xebb   :  { %v3165_v45 = vpop.eup %3164  ;;  %v1770_v0 = vsel %vm483_vm14, %v3163_v60, 0.0 }
 0xebc   :  { %1771 = vadd.xlane.f32.xlu0 %v1770_v0  ;;  %1774 = vadd.xlane.f32.xlu1 %v1773_v22  ;;  %v1872_v10 = vsel %vm483_vm14, %v3165_v45, 0.0 }
 0xebd   :  { %1873 = vadd.xlane.f32.xlu2 %v1872_v10 }
 0xebe   :  { %v3167_v25 = vpop.eup %3166 }
 0xebf   :  { %v3169_v47 = vpop.eup %3168  ;;  %v1591_v26 = vmul.f32 %v3167_v25, %v3157_v59  ;;  %v1760_v29 = vpop.xlane.xlu0 %1759 }
 0xec0   :  { %v1859_v32 = vpop.xlane.xlu2 %1858  ;;  %v1590_v34 = vmul.f32 %v3169_v47, %v3155_v2  ;;  %v1763_v35 = vsub.f32 %v1749_v50, %v1760_v29  ;;  %v3171_v41 = vpop.eup %3170 }
 0xec1   :  { %v1862_v28 = vsub.f32 %v1848_v27, %v1859_v32  ;;  %v1592_v31 = vmul.f32 %v3171_v41, %v4070_v36 }
 0xec2   :  { %v1593_v43 = vpack.c.bf16 %v1591_v26, %v1590_v34  ;;  %v1768_v44 = vmul.f32 1.442695, %v1763_v35 }
 0xec3   :  { %v1867_v38 = vmul.f32 1.442695, %v1862_v28  ;;  %v1594_v40 = vpack.c.bf16 %v1592_v31, %v1592_v31 }
 0xec4   :  { %3172 = vpow2.f32 %v1768_v44  ;;  %2756 = vmatmul.msk.bf16.vlgmr.msrb.gmra.mxu3 %vm483_vm14, %v1593_v43 }
 0xec5   :  { %3174 = vpow2.f32 %v1867_v38 }
 0xeca   :  { %v3173_v51 = vpop.eup %3172 }
 0xecb   :  { %v3175_v54 = vpop.eup %3174  ;;  %v1776_v39 = vsel %vm490_vm15, %v3173_v51, 0.0 }
 0xecc   :  { %1777 = vadd.xlane.f32.xlu0 %v1776_v39  ;;  %v1875_v48 = vsel %vm490_vm15, %v3175_v54, 0.0 }
 0xecd   :  { %1876 = vadd.xlane.f32.xlu2 %v1875_v48 }
 0xed4   :  { %2757 = vmatmul.msk.bf16.gmra.mxu3 %vm483_vm14, %v1594_v40 }
 0xf27   :  { %v1871_v21 = vpop.xlane.xlu1 %1870 }
 0xf28   :  { %3176 = vrcp.f32 %v1871_v21 }
 0xf2e   :  { %v3177_v58 = vpop.eup %3176 }
 0xf2f   :  { %v1772_v9 = vpop.xlane.xlu0 %1771  ;;  %v1775_v57 = vpop.xlane.xlu1 %1774  ;;  %v1881_v50 = vmul.f32 %v3177_v58, %v3159_v46  ;;  %v2996_v46 = vld [vmem:[%s4333_s13 + $0x38] sm:$0xff] }
 0xf30   :  { %3178 = vrcp.f32 %v1772_v9  ;;  %v1874_v11 = vpop.xlane.xlu2 %1873  ;;  %1971 = vmatpush.bf16.msra.mxu1 %v2996_v46 }
 0xf31   :  { %3180 = vrcp.f32 %v1775_v57 }
 0xf32   :  { %3182 = vrcp.f32 %v1874_v11 }
 0xf34   :  { %1972 = vmatpush.bf16.msra.mxu1 %v2995_v5  ;;  %v2814_v5 = vld [vmem:[%s4337_s17 + $0x50] sm:$0xf] }
 0xf36   :  { %v3179_v2 = vpop.eup %3178 }
 0xf37   :  { %v3181_v59 = vpop.eup %3180  ;;  %v1782_v16 = vmul.f32 %v3179_v2, %v3163_v60 }
 0xf38   :  { %v3183_v62 = vpop.eup %3182  ;;  %v1783_v63 = vmul.f32 %v3181_v59, %v3161_v20  ;;  %1973 = vmatpush.bf16.msra.mxu1 %v2994_v15  ;;  %v3000_v15 = vld [vmem:[%s4337_s17 + $0x54] sm:$0xf0] }
 0xf39   :  { %v1882_v27 = vmul.f32 %v3183_v62, %v3165_v45 }
 0xf3a   :  { %v1785_v36 = vpack.c.bf16 %v1783_v63, %v1782_v16 }
 0xf3b   :  { %v1884_v42 = vpack.c.bf16 %v1882_v27, %v1881_v50 }
 0xf3c   :  { %2760 = vmatmul.msk.bf16.vlgmr.msrb.gmra.mxu0 %vm483_vm14, %v1785_v36  ;;  %1974 = vmatpush.bf16.msra.mxu1 %v2993_v17  ;;  %v2999_v17 = vld [vmem:[%s4337_s17 + $0x54] sm:$0xf] }
 0xf3d   :  { %2764 = vmatmul.msk.bf16.vlgmr.msra.gmra.mxu3 %vm483_vm14, %v1884_v42 }
 0xf3f   :  { %v1778_v23 = vpop.xlane.xlu0 %1777 }
 0xf40   :  { %3184 = vrcp.f32 %v1778_v23  ;;  %v1877_v3 = vpop.xlane.xlu2 %1876 }
 0xf41   :  { %3186 = vrcp.f32 %v1877_v3  ;;  %v2830_v3 = vld [vmem:[%s4337_s17 + $0x70] sm:$0xf] }
 0xf46   :  { %v3185_v30 = vpop.eup %3184 }
 0xf47   :  { %v3187_v4 = vpop.eup %3186  ;;  %v1784_v53 = vmul.f32 %v3185_v30, %v3173_v51  ;;  %v1714_v7 = vpop.f32.mrf.mxu3  ;;  %v3004_v30 = vld [vmem:[%s4337_s17 + $0x74] sm:$0xf0] }
 0xf48   :  { %v1883_v8 = vmul.f32 %v3187_v4, %v3175_v54  ;;  %v1715_v60 = vadd.f32 %v1714_v7, %v4081_v49  ;;  %v3048_v49 = vld [vmem:[%s4334_s14 + $0x1] ss:$0 sm:$0xff]  ;;  %v3003_v4 = vld [vmem:[%s4337_s17 + $0x74] sm:$0xf]  ;;  %v2832_v7 = vld [vmem:[%s4337_s17 + $0x78] sm:$0xf0] }
 0xf49   :  { %v1786_v12 = vpack.c.bf16 %v1784_v53, %v1784_v53  ;;  %v2831_v53 = vor.u32 %v3004_v30, %v2830_v3 }
 0xf4a   :  { %v1885_v13 = vpack.c.bf16 %v1883_v8, %v1883_v8  ;;  %v2835_v8 = vor.u32 %v3003_v4, %v2832_v7 }
 0xf4b   :  { %2138 = vmatpush.bf16.msra.mxu0 %v2831_v53 }
 0xf4c   :  { %2761 = vmatmul.msk.bf16.gmra.mxu0 %vm483_vm14, %v1786_v12  ;;  %2156 = vmatpush.bf16.msrb.mxu2 %v2835_v8  ;;  %v2822_v12 = vld [vmem:[%s4337_s17 + $0x60] sm:$0xf]  ;;  %v3012_v8 = vld [vmem:[%s4339_s19 + $0xb8] sm:$0xff] }
 0xf4d   :  { %2765 = vmatmul.msk.bf16.gmra.mxu3 %vm483_vm14, %v1885_v13  ;;  %v3002_v13 = vld [vmem:[%s4337_s17 + $0x64] sm:$0xf0] }
 0xf4e   :  { %2362 = vmatpush.bf16.msrb.mxu3 %v3012_v8 }
 0xf4f   :  { %v1716_v24 = vpop.f32.mrf.mxu3 }
 0xf50   :  { %v1717_v45 = vadd.f32 %v1716_v24, %v4083_v52  ;;  %v3001_v24 = vld [vmem:[%s4337_s17 + $0x64] sm:$0xf] }
 0xf57   :  { %v1719_v56 = vpop.f32.mrf.mxu3 }
 0xf58   :  { %v1720_v34 = vadd.f32 %v1719_v56, %v4085_v55  ;;  %v2823_v56 = vor.u32 %v3002_v13, %v2822_v12  ;;  %v3011_v12 = vld [vmem:[%s4339_s19 + $0xb0] sm:$0xff]  ;;  %v3010_v13 = vld [vmem:[%s4339_s19 + $0xa8] sm:$0xff] }
 0xf59   :  { %2363 = vmatpush.bf16.msrb.mxu3 %v3011_v12 }
 0xf5a   :  { %2139 = vmatpush.bf16.msra.mxu0 %v2823_v56  ;;  %v3009_v56 = vld [vmem:[%s4339_s19 + $0xa0] sm:$0xff] }
 0xf5d   :  { %2364 = vmatpush.bf16.msrb.mxu3 %v3010_v13 }
 0xf5f   :  { %v1721_v6 = vpop.f32.mrf.mxu3 }
 0xf60   :  { %v2824_v6 = vld [vmem:[%s4337_s17 + $0x68] sm:$0xf0] }
 0xf61   :  { %v2827_v46 = vor.u32 %v3001_v24, %v2824_v6  ;;  %v3019_v24 = vld [vmem:[%s4339_s19 + $0xf0] sm:$0xff]  ;;  %2365 = vmatpush.bf16.msrb.mxu3 %v3009_v56  ;;  %v3018_v6 = vld [vmem:[%s4339_s19 + $0xe8] sm:$0xff] }
 0xf63   :  { %2157 = vmatpush.bf16.msrb.mxu2 %v2827_v46  ;;  %v3008_v46 = vld [vmem:[%s4339_s19 + $0x98] sm:$0xff] }
 0xf65   :  { %2366 = vmatpush.bf16.msrb.mxu3 %v3008_v46 }
 0xfb9   :  { %v1810_v18 = vpop.f32.mrf.mxu0 }
 0xfba   :  { %v1819_v0 = vadd.f32 %v1810_v18, %v1715_v60  ;;  %v2815_v18 = vor.u32 %v3000_v15, %v2814_v5  ;;  %v3017_v5 = vld [vmem:[%s4339_s19 + $0xe0] sm:$0xff]  ;;  %v3007_v15 = vld [vmem:[%s4339_s19 + $0x90] sm:$0xff] }
 0xfbb   :  { %2367 = vmatpush.bf16.msrb.mxu3 %v3007_v15 }
 0xfbc   :  { %2140 = vmatpush.bf16.msra.mxu0 %v2815_v18  ;;  %v2803_v18 = vld [vmem:[%s4340_s18 + $0x2] sm:$0x3] }
 0xfc0   :  { %v1909_v19 = vpop.f32.mrf.mxu3 }
 0xfc1   :  { %v1812_v20 = vpop.f32.mrf.mxu0  ;;  %v1918_v25 = vadd.f32 %v1909_v19, %v1819_v0  ;;  %v2816_v19 = vld [vmem:[%s4337_s17 + $0x58] sm:$0xf0]  ;;  %v2806_v0 = vld [vmem:[%s4337_s17 + $0x40] sm:$0xf] }
 0xfc2   :  { %v1820_v22 = vadd.f32 %v1812_v20, %v1717_v45  ;;  %v2819_v20 = vor.u32 %v2999_v17, %v2816_v19  ;;  %v3016_v17 = vld [vmem:[%s4339_s19 + $0xd8] sm:$0xff]  ;;  %v3006_v19 = vld [vmem:[%s4339_s19 + $0x88] sm:$0xff] }
 0xfc3   :  { %2368 = vmatpush.bf16.msrb.mxu3 %v3006_v19 }
 0xfc4   :  { %2158 = vmatpush.bf16.msrb.mxu2 %v2819_v20  ;;  %v3015_v20 = vld [vmem:[%s4339_s19 + $0xd0] sm:$0xff] }
 0xfc8   :  { %v1911_v10 = vpop.f32.mrf.mxu3 }
 0xfc9   :  { %v1919_v47 = vadd.f32 %v1911_v10, %v1820_v22  ;;  %v1815_v26 = vpop.f32.mrf.mxu0  ;;  %v2998_v22 = vld [vmem:[%s4337_s17 + $0x44] sm:$0xf0]  ;;  %v2997_v10 = vld [vmem:[%s4337_s17 + $0x44] sm:$0xf] }
 0xfca   :  { %v1821_v35 = vadd.f32 %v1815_v26, %v1720_v34 }
 0xfcb   :  { %v1921_v29 = vpack.c.bf16 %v1919_v47, %v1918_v25  ;;  %v2807_v25 = vor.u32 %v2998_v22, %v2806_v0  ;;  %v2808_v47 = vld [vmem:[%s4337_s17 + $0x48] sm:$0xf0] }
 0xfcc   :  { %v3014_v22 = vld [vmem:[%s4339_s19 + $0xc8] sm:$0xff] }
 0xfcd   :  { %2791 = vmatmul.msk.bf16.vlgmr.msra.gmra.mxu1 %vm245_vm1, %v1921_v29  ;;  %v2811_v29 = vor.u32 %v2997_v10, %v2808_v47  ;;  %2141 = vmatpush.bf16.msra.mxu0 %v2807_v25  ;;  %v3013_v25 = vld [vmem:[%s4339_s19 + $0xc0] sm:$0xff] }
 0xfcf   :  { %2159 = vmatpush.bf16.msrb.mxu2 %v2811_v29 }
 0xfd0   :  { %v1914_v32 = vpop.f32.mrf.mxu3 }
 0xfd1   :  { %v1817_v33 = vpop.f32.mrf.mxu0  ;;  %v1920_v28 = vadd.f32 %v1914_v32, %v1821_v35 }
 0xfd3   :  { %v1922_v44 = vpack.c.bf16 %v1920_v28, %v1920_v28 }
 0xfd8   :  { %v1916_v43 = vpop.f32.mrf.mxu3 }
 0xfdd   :  { %2792 = vmatmul.msk.bf16.gmra.mxu1 %vm245_vm1, %v1922_v44 }
0x104a   :  { %v1976_v52 = vpop.f32.mrf.mxu1 }
0x104b   :  { %v1977_v38 = vadd.f32 %v3048_v49, %v1976_v52 }
0x104d   :  { %v1985_v41 = vadd.f32 %v1977_v38, %v3928_v37 }
0x104f   :  { %v1992_v51 = vsel %vm245_vm1, %v1985_v41, 0.0 }
0x1050   :  { %1993 = vadd.xlane.f32.xlu1 %v1992_v51 }
0x1052   :  { %v1978_v54 = vpop.f32.mrf.mxu1 }
0x1053   :  { %v1979_v39 = vadd.f32 %v3048_v49, %v1978_v54 }
0x1055   :  { %v1986_v55 = vadd.f32 %v1979_v39, %v3930_v1 }
0x1057   :  { %v1995_v48 = vsel %vm245_vm1, %v1986_v55, 0.0 }
0x1058   :  { %1996 = vadd.xlane.f32.xlu2 %v1995_v48 }
0x105a   :  { %v1981_v31 = vpop.f32.mrf.mxu1 }
0x105b   :  { %v1982_v40 = vadd.f32 %v3048_v49, %v1981_v31 }
0x105d   :  { %v1987_v21 = vadd.f32 %v1982_v40, %v3937_v14 }
0x105f   :  { %v1998_v9 = vsel %vm252_vm2, %v1987_v21, 0.0 }
0x1060   :  { %1999 = vadd.xlane.f32.xlu0 %v1998_v9  ;;  %v3049_v9 = vld [vmem:[%s4335_s15 + $0x1] ss:$0 sm:$0xff] }
0x1062   :  { %v1983_v57 = vpop.f32.mrf.mxu1 }
0x10c3   :  { %v1994_v11 = vpop.xlane.xlu1 %1993 }
0x10c4   :  { %v2001_v37 = vmul.f32 %v1994_v11, %v3408_v61 }
0x10c6   :  { %v4142_v58 = vsub.f32 %v1985_v41, %v2001_v37 }
0x10c8   :  { %v2007_v2 = vmul.f32 %v4142_v58, %v4142_v58 }
0x10ca   :  { %v2010_v1 = vsel %vm245_vm1, %v2007_v2, 0.0 }
0x10cb   :  { %2011 = vadd.xlane.f32.xlu1 %v2010_v1  ;;  %v1997_v59 = vpop.xlane.xlu2 %1996 }
0x10cc   :  { %v2002_v16 = vmul.f32 %v1997_v59, %v3408_v61  ;;  %v3050_v59 = vld [vmem:[%s4336_s16 + $0x1] ss:$0 sm:$0xff] }
0x10ce   :  { %v4148_v62 = vsub.f32 %v1986_v55, %v2002_v16 }
0x10d0   :  { %v2008_v14 = vmul.f32 %v4148_v62, %v4148_v62 }
0x10d2   :  { %v2013_v63 = vsel %vm245_vm1, %v2008_v14, 0.0 }
0x10d3   :  { %v2000_v50 = vpop.xlane.xlu0 %1999  ;;  %2014 = vadd.xlane.f32.xlu2 %v2013_v63 }
0x10d4   :  { %v2003_v27 = vmul.f32 %v2000_v50, %v3408_v61 }
0x10d6   :  { %v4154_v36 = vsub.f32 %v1987_v21, %v2003_v27 }
0x10d8   :  { %v2009_v42 = vmul.f32 %v4154_v36, %v4154_v36 }
0x10da   :  { %v2016_v23 = vsel %vm252_vm2, %v2009_v42, 0.0 }
0x10db   :  { %2017 = vadd.xlane.f32.xlu0 %v2016_v23 }
0x113e   :  { %v2012_v60 = vpop.xlane.xlu1 %2011 }
0x113f   :  { %v2019_v45 = vmul.f32 %v2012_v60, %v3408_v61  ;;  %v2084_v60 = vperm.slane %v2803_v18, 0 }
0x1141   :  { %v2022_v26 = vadd.f32 1e-12, %v2019_v45  ;;  %v3005_v45 = vld [vmem:[%s4339_s19 + $0x80] sm:$0xff] }
0x1142   :  { %2369 = vmatpush.bf16.msrb.mxu3 %v3005_v45 }
0x1143   :  { %3188 = vrsqrt.f32 %v2022_v26  ;;  %vm2031_vm14 = vweird.f32 %v2022_v26 }
0x1146   :  { %v2015_v32 = vpop.xlane.xlu2 %2014 }
0x1147   :  { %v2020_v33 = vmul.f32 %v2015_v32, %v3408_v61 }
0x1149   :  { %v3189_v34 = vpop.eup %3188  ;;  %v2023_v35 = vadd.f32 1e-12, %v2020_v33 }
0x114a   :  { %v2026_v28 = vmul.f32 %v3189_v34, %v2022_v26  ;;  %vm2032_vm13 = vweird.f32 %v3189_v34  ;;  %v2085_v26 = vperm.slane %v2803_v18, 1 }
0x114b   :  { %3190 = vrsqrt.f32 %v2023_v35  ;;  %vm2033_vm15 = vmor %vm2031_vm14, %vm2032_vm13  ;;  %vm2041_vm10 = vweird.f32 %v2023_v35 }
0x114c   :  { %v2027_v43 = vmul.f32 %v3189_v34, %v2026_v28 }
0x114e   :  { %v2028_v44 = vmul.f32 0.5, %v2027_v43  ;;  %v2018_v49 = vpop.xlane.xlu0 %2017 }
0x114f   :  { %v2021_v52 = vmul.f32 %v2018_v49, %v3408_v61 }
0x1150   :  { %v2029_v38 = vsub.f32 1.5, %v2028_v44 }
0x1151   :  { %v3191_v41 = vpop.eup %3190  ;;  %v2024_v51 = vadd.f32 1e-12, %v2021_v52 }
0x1152   :  { %v2030_v54 = vmul.f32 %v3189_v34, %v2029_v38  ;;  %v2036_v39 = vmul.f32 %v3191_v41, %v2023_v35  ;;  %vm2042_vm9 = vweird.f32 %v3191_v41 }
0x1153   :  { %3192 = vrsqrt.f32 %v2024_v51  ;;  %vm2043_vm11 = vmor %vm2041_vm10, %vm2042_vm9  ;;  %vm2051_vm0 = vweird.f32 %v2024_v51 }
0x1154   :  { %v2037_v55 = vmul.f32 %v3191_v41, %v2036_v39  ;;  %v2034_v48 = vsel %vm2033_vm15, %v3189_v34, %v2030_v54 }
0x1155   :  { %v2055_v57 = vmul.f32 %v2034_v48, %v4142_v58 }
0x1156   :  { %v2038_v31 = vmul.f32 0.5, %v2037_v55 }
0x1157   :  { %v2061_v16 = vmul.f32 %v3049_v9, %v2055_v57 }
0x1158   :  { %v2039_v40 = vsub.f32 1.5, %v2038_v31 }
0x1159   :  { %v3193_v21 = vpop.eup %3192  ;;  %v4218_v42 = vadd.f32 %v3050_v59, %v2061_v16 }
0x115a   :  { %v2040_v11 = vmul.f32 %v3191_v41, %v2039_v40  ;;  %v2046_v37 = vmul.f32 %v3193_v21, %v2024_v51  ;;  %vm2052_vm12 = vweird.f32 %v3193_v21 }
0x115b   :  { %vm2053_vm3 = vmor %vm2051_vm0, %vm2052_vm12 }
0x115c   :  { %v2044_v2 = vsel %vm2043_vm11, %v3191_v41, %v2040_v11  ;;  %v2047_v1 = vmul.f32 %v3193_v21, %v2046_v37 }
0x115d   :  { %v2056_v14 = vmul.f32 %v2044_v2, %v4148_v62 }
0x115e   :  { %v2048_v63 = vmul.f32 0.5, %v2047_v1 }
0x115f   :  { %v2062_v50 = vmul.f32 %v3049_v9, %v2056_v14 }
0x1160   :  { %v2049_v27 = vsub.f32 1.5, %v2048_v63 }
0x1161   :  { %v4220_v58 = vadd.f32 %v3050_v59, %v2062_v50 }
0x1162   :  { %v2050_v23 = vmul.f32 %v3193_v21, %v2049_v27 }
0x1163   :  { %v2070_v3 = vpack.c.bf16 %v4220_v58, %v4218_v42 }
0x1164   :  { %v2054_v30 = vsel %vm2053_vm3, %v3193_v21, %v2050_v23 }
0x1165   :  { %2836 = vmatmul.msk.bf16.vlgmr.msra.gmra.mxu0 %vm245_vm1, %v2070_v3  ;;  %2838 = vmatmul.msk.bf16.vlgmr.msrb.gmra.mxu2 %vm245_vm1, %v2070_v3  ;;  %v2057_v62 = vmul.f32 %v2054_v30, %v4154_v36  ;;  %v3020_v36 = vld [vmem:[%s4339_s19 + $0xf8] sm:$0xff] }
0x1166   :  { %2380 = vmatpush.bf16.msrb.mxu1 %v3020_v36 }
0x1167   :  { %v2063_v4 = vmul.f32 %v3049_v9, %v2057_v62 }
0x1169   :  { %v4227_v53 = vadd.f32 %v3050_v59, %v2063_v4 }
0x116a   :  { %2381 = vmatpush.bf16.msrb.mxu1 %v3019_v24 }
0x116b   :  { %v2071_v7 = vpack.c.bf16 %v4227_v53, %v4227_v53 }
0x116e   :  { %2382 = vmatpush.bf16.msrb.mxu1 %v3018_v6 }
0x1172   :  { %2383 = vmatpush.bf16.msrb.mxu1 %v3017_v5 }
0x1175   :  { %2837 = vmatmul.msk.bf16.gmra.mxu0 %vm245_vm1, %v2071_v7  ;;  %2839 = vmatmul.msk.bf16.gmra.mxu2 %vm245_vm1, %v2071_v7 }
0x1176   :  { %2384 = vmatpush.bf16.msrb.mxu1 %v3016_v17 }
0x117a   :  { %2385 = vmatpush.bf16.msrb.mxu1 %v3015_v20 }
0x117e   :  { %2386 = vmatpush.bf16.msrb.mxu1 %v3014_v22 }
0x1182   :  { %2387 = vmatpush.bf16.msrb.mxu1 %v3013_v25 }
0x11e2   :  { %v2143_v0 = vpop.f32.mrf.mxu0 }
0x11e3   :  { %v2144_v10 = vadd.f32 %v2143_v0, %v2084_v60 }
0x11e5   :  { %v2176_v47 = vmul.f32 0.044715, %v2144_v10  ;;  %v2170_v12 = vmul.f32 0.5, %v2144_v10 }
0x11e7   :  { %v2182_v29 = vmul.f32 %v2176_v47, %v2144_v10 }
0x11e8   :  { %v2161_v32 = vpop.f32.mrf.mxu2 }
0x11e9   :  { %v2188_v33 = vmul.f32 %v2182_v29, %v2144_v10  ;;  %v2162_v34 = vadd.f32 %v2161_v32, %v2085_v26 }
0x11ea   :  { %v2145_v35 = vpop.f32.mrf.mxu0 }
0x11eb   :  { %v2194_v28 = vadd.f32 %v2188_v33, %v2144_v10  ;;  %v2177_v43 = vmul.f32 0.044715, %v2162_v34  ;;  %v2146_v44 = vadd.f32 %v2145_v35, %v2084_v60  ;;  %v2171_v45 = vmul.f32 0.5, %v2162_v34 }
0x11ed   :  { %v2183_v49 = vmul.f32 %v2177_v43, %v2162_v34  ;;  %v2178_v52 = vmul.f32 0.044715, %v2146_v44  ;;  %v2200_v38 = vmul.f32 0.7978846, %v2194_v28  ;;  %v2172_v36 = vmul.f32 0.5, %v2146_v44 }
0x11ef   :  { %v2189_v41 = vmul.f32 %v2183_v49, %v2162_v34  ;;  %v2184_v51 = vmul.f32 %v2178_v52, %v2146_v44  ;;  %3194 = vtanh.f32 %v2200_v38 }
0x11f0   :  { %v2163_v54 = vpop.f32.mrf.mxu2 }
0x11f1   :  { %v2195_v39 = vadd.f32 %v2189_v41, %v2162_v34  ;;  %v2190_v55 = vmul.f32 %v2184_v51, %v2146_v44  ;;  %v2164_v48 = vadd.f32 %v2163_v54, %v2085_v26  ;;  %v3051_v34 = vld [vmem:[%s4338_s20 + $0x1] ss:$0 sm:$0xff] }
0x11f2   :  { %v2148_v31 = vpop.f32.mrf.mxu0 }
0x11f3   :  { %v2196_v40 = vadd.f32 %v2190_v55, %v2146_v44  ;;  %v2179_v21 = vmul.f32 0.044715, %v2164_v48  ;;  %v2149_v9 = vadd.f32 %v2148_v31, %v2084_v60  ;;  %v2201_v57 = vmul.f32 0.7978846, %v2195_v39 }
0x11f4   :  { %v2173_v0 = vmul.f32 0.5, %v2164_v48 }
0x11f5   :  { %v2202_v11 = vmul.f32 0.7978846, %v2196_v40  ;;  %v2185_v37 = vmul.f32 %v2179_v21, %v2164_v48  ;;  %v2180_v2 = vmul.f32 0.044715, %v2149_v9  ;;  %v3195_v14 = vpop.eup %3194  ;;  %v2174_v32 = vmul.f32 0.5, %v2149_v9 }
0x11f6   :  { %v2212_v62 = vadd.f32 1.0, %v3195_v14 }
0x11f7   :  { %3196 = vtanh.f32 %v2202_v11  ;;  %v2191_v1 = vmul.f32 %v2185_v37, %v2164_v48  ;;  %v2186_v59 = vmul.f32 %v2180_v2, %v2149_v9 }
0x11f8   :  { %v2166_v16 = vpop.f32.mrf.mxu2  ;;  %3198 = vtanh.f32 %v2201_v57  ;;  %v2218_v5 = vmul.f32 %v2212_v62, %v2170_v12 }
0x11f9   :  { %v2197_v63 = vadd.f32 %v2191_v1, %v2164_v48  ;;  %v2167_v50 = vadd.f32 %v2166_v16, %v2085_v26  ;;  %v2192_v23 = vmul.f32 %v2186_v59, %v2149_v9 }
0x11fa   :  { %v2150_v27 = vpop.f32.mrf.mxu0 }
0x11fb   :  { %v2203_v3 = vmul.f32 0.7978846, %v2197_v63  ;;  %v2181_v30 = vmul.f32 0.044715, %v2167_v50  ;;  %v2198_v4 = vadd.f32 %v2192_v23, %v2149_v9  ;;  %v2175_v44 = vmul.f32 0.5, %v2167_v50 }
0x11fd   :  { %v3197_v7 = vpop.eup %3196  ;;  %3200 = vtanh.f32 %v2203_v3  ;;  %v2187_v8 = vmul.f32 %v2181_v30, %v2167_v50  ;;  %v2204_v24 = vmul.f32 0.7978846, %v2198_v4 }
0x11fe   :  { %v2214_v13 = vadd.f32 1.0, %v3197_v7  ;;  %v3199_v56 = vpop.eup %3198 }
0x11ff   :  { %v2193_v6 = vmul.f32 %v2187_v8, %v2167_v50  ;;  %3202 = vtanh.f32 %v2204_v24  ;;  %v2213_v18 = vadd.f32 1.0, %v3199_v56 }
0x1200   :  { %v2168_v46 = vpop.f32.mrf.mxu2  ;;  %v2220_v15 = vmul.f32 %v2214_v13, %v2172_v36 }
0x1201   :  { %v2199_v17 = vadd.f32 %v2193_v6, %v2167_v50  ;;  %v2219_v25 = vmul.f32 %v2213_v18, %v2171_v45 }
0x1202   :  { %v2224_v19 = vpack.c.bf16 %v2220_v15, %v2218_v5 }
0x1203   :  { %v3201_v20 = vpop.eup %3200  ;;  %v2205_v60 = vmul.f32 0.7978846, %v2199_v17 }
0x1204   :  { %v2215_v22 = vadd.f32 1.0, %v3201_v20  ;;  %2370 = vmatmul.bf16.vlgmr.msrb.gmra.mxu3 %v2224_v19 }
0x1205   :  { %v3203_v47 = vpop.eup %3202  ;;  %3204 = vtanh.f32 %v2205_v60 }
0x1206   :  { %v2221_v10 = vmul.f32 %v2215_v22, %v2173_v0  ;;  %v2216_v29 = vadd.f32 1.0, %v3203_v47 }
0x1208   :  { %v2225_v26 = vpack.c.bf16 %v2221_v10, %v2219_v25  ;;  %v2222_v35 = vmul.f32 %v2216_v29, %v2174_v32 }
0x120a   :  { %2388 = vmatmul.bf16.vlgmr.msrb.gmra.mxu1 %v2225_v26  ;;  %v2226_v43 = vpack.c.bf16 %v2222_v35, %v2222_v35  ;;  %v3052_v26 = vld [vmem:[%s4341_s21 + $0x1] ss:$0 sm:$0xff] }
0x120b   :  { %v3205_v33 = vpop.eup %3204 }
0x120c   :  { %v2217_v28 = vadd.f32 1.0, %v3205_v33  ;;  %v3053_v33 = vld [vmem:[%s4342_s22 + $0x1] ss:$0 sm:$0xff] }
0x120e   :  { %v2223_v49 = vmul.f32 %v2217_v28, %v2175_v44 }
0x1210   :  { %v2227_v52 = vpack.c.bf16 %v2223_v49, %v2223_v49 }
0x1214   :  { %2375 = vmatmul.bf16.gmra.mxu3 %v2226_v43 }
0x121a   :  { %2393 = vmatmul.bf16.gmra.mxu1 %v2227_v52 }
0x1287   :  { %v2371_v38 = vpop.f32.mrf.mxu3  ;;  %v2389_v41 = vpop.f32.mrf.mxu1 }
0x1288   :  { %v2372_v51 = vadd.f32 %v3051_v34, %v2371_v38 }
0x128a   :  { %v2390_v54 = vadd.f32 %v2389_v41, %v2372_v51 }
0x128c   :  { %v2398_v39 = vadd.f32 %v2390_v54, %v4218_v42 }
0x128e   :  { %v2405_v55 = vsel %vm245_vm1, %v2398_v39, 0.0 }
0x128f   :  { %v2373_v48 = vpop.f32.mrf.mxu3  ;;  %v2391_v31 = vpop.f32.mrf.mxu1  ;;  %2406 = vadd.xlane.f32.xlu1 %v2405_v55 }
0x1290   :  { %v2374_v40 = vadd.f32 %v3051_v34, %v2373_v48 }
0x1292   :  { %v2392_v21 = vadd.f32 %v2391_v31, %v2374_v40 }
0x1294   :  { %v2399_v9 = vadd.f32 %v2392_v21, %v4220_v58 }
0x1296   :  { %v2408_v57 = vsel %vm245_vm1, %v2399_v9, 0.0 }
0x1297   :  { %v2376_v11 = vpop.f32.mrf.mxu3  ;;  %v2394_v37 = vpop.f32.mrf.mxu1  ;;  %2409 = vadd.xlane.f32.xlu2 %v2408_v57 }
0x1298   :  { %v2377_v2 = vadd.f32 %v3051_v34, %v2376_v11 }
0x129a   :  { %v2395_v1 = vadd.f32 %v2394_v37, %v2377_v2 }
0x129c   :  { %v2400_v59 = vadd.f32 %v2395_v1, %v4227_v53 }
0x129e   :  { %v2411_v42 = vsel %vm252_vm2, %v2400_v59, 0.0 }
0x129f   :  { %v2378_v16 = vpop.f32.mrf.mxu3  ;;  %v2396_v14 = vpop.f32.mrf.mxu1  ;;  %2412 = vadd.xlane.f32.xlu0 %v2411_v42 }
0x1302   :  { %v2407_v63 = vpop.xlane.xlu1 %2406 }
0x1303   :  { %v2414_v50 = vmul.f32 %v2407_v63, %v3408_v61 }
0x1305   :  { %v2417_v27 = vsub.f32 %v2398_v39, %v2414_v50 }
0x1307   :  { %v2420_v23 = vmul.f32 %v2417_v27, %v2417_v27 }
0x1309   :  { %v2423_v58 = vsel %vm245_vm1, %v2420_v23, 0.0 }
0x130a   :  { %v2410_v3 = vpop.xlane.xlu2 %2409  ;;  %2424 = vadd.xlane.f32.xlu1 %v2423_v58 }
0x130b   :  { %v2415_v30 = vmul.f32 %v2410_v3, %v3408_v61 }
0x130d   :  { %v2418_v62 = vsub.f32 %v2399_v9, %v2415_v30 }
0x130f   :  { %v2421_v4 = vmul.f32 %v2418_v62, %v2418_v62 }
0x1311   :  { %v2426_v53 = vsel %vm245_vm1, %v2421_v4, 0.0 }
0x1312   :  { %v2413_v7 = vpop.xlane.xlu0 %2412  ;;  %2427 = vadd.xlane.f32.xlu2 %v2426_v53 }
0x1313   :  { %v2416_v8 = vmul.f32 %v2413_v7, %v3408_v61 }
0x1315   :  { %v2419_v12 = vsub.f32 %v2400_v59, %v2416_v8 }
0x1317   :  { %v2422_v36 = vmul.f32 %v2419_v12, %v2419_v12 }
0x1319   :  { %v2429_v13 = vsel %vm252_vm2, %v2422_v36, 0.0 }
0x131a   :  { %2430 = vadd.xlane.f32.xlu0 %v2429_v13 }
0x137d   :  { %v2425_v24 = vpop.xlane.xlu1 %2424 }
0x137e   :  { %v2432_v56 = vmul.f32 %v2425_v24, %v3408_v61 }
0x1380   :  { %v2435_v6 = vadd.f32 1e-12, %v2432_v56 }
0x1382   :  { %3206 = vrsqrt.f32 %v2435_v6  ;;  %vm2444_vm5 = vweird.f32 %v2435_v6 }
0x1385   :  { %v2428_v46 = vpop.xlane.xlu2 %2427 }
0x1386   :  { %v2433_v5 = vmul.f32 %v2428_v46, %v3408_v61 }
0x1388   :  { %v3207_v15 = vpop.eup %3206  ;;  %v2436_v17 = vadd.f32 1e-12, %v2433_v5 }
0x1389   :  { %v2439_v18 = vmul.f32 %v3207_v15, %v2435_v6  ;;  %vm2445_vm4 = vweird.f32 %v3207_v15 }
0x138a   :  { %3208 = vrsqrt.f32 %v2436_v17  ;;  %vm2446_vm6 = vmor %vm2444_vm5, %vm2445_vm4  ;;  %vm2454_vm8 = vweird.f32 %v2436_v17 }
0x138b   :  { %v2440_v19 = vmul.f32 %v3207_v15, %v2439_v18 }
0x138d   :  { %v2441_v20 = vmul.f32 0.5, %v2440_v19  ;;  %v2431_v60 = vpop.xlane.xlu0 %2430 }
0x138e   :  { %v2434_v45 = vmul.f32 %v2431_v60, %v3408_v61 }
0x138f   :  { %v2442_v0 = vsub.f32 1.5, %v2441_v20 }
0x1390   :  { %v3209_v22 = vpop.eup %3208  ;;  %v2437_v25 = vadd.f32 1e-12, %v2434_v45 }
0x1391   :  { %v2443_v10 = vmul.f32 %v3207_v15, %v2442_v0  ;;  %v2449_v47 = vmul.f32 %v3209_v22, %v2436_v17  ;;  %vm2455_vm7 = vweird.f32 %v3209_v22 }
0x1392   :  { %3210 = vrsqrt.f32 %v2437_v25  ;;  %vm2456_vm13 = vmor %vm2454_vm8, %vm2455_vm7  ;;  %vm2464_vm15 = vweird.f32 %v2437_v25 }
0x1393   :  { %v2447_v29 = vsel %vm2446_vm6, %v3207_v15, %v2443_v10  ;;  %v2450_v32 = vmul.f32 %v3209_v22, %v2449_v47 }
0x1394   :  { %v2468_v61 = vmul.f32 %v2447_v29, %v2417_v27 }
0x1395   :  { %v2451_v35 = vmul.f32 0.5, %v2450_v32 }
0x1396   :  { %v2474_v28 = vmul.f32 %v3052_v26, %v2468_v61 }
0x1397   :  { %v2452_v43 = vsub.f32 1.5, %v2451_v35 }
0x1398   :  { %v3211_v44 = vpop.eup %3210  ;;  %v2480_v49 = vadd.f32 %v3053_v33, %v2474_v28 }
0x1399   :  { %v2453_v52 = vmul.f32 %v3209_v22, %v2452_v43  ;;  %v2459_v34 = vmul.f32 %v3211_v44, %v2437_v25  ;;  %vm2465_vm14 = vweird.f32 %v3211_v44 }
0x139a   :  { %2483 = vst.msk [vmem:[%s4343_s23] sm:$0xff] %vm245_vm1, %v2480_v49  ;;  %vm2466_vm9 = vmor %vm2464_vm15, %vm2465_vm14 }
0x139b   :  { %v2457_v38 = vsel %vm2456_vm13, %v3209_v22, %v2453_v52  ;;  %v2460_v41 = vmul.f32 %v3211_v44, %v2459_v34 }
0x139c   :  { %v2469_v51 = vmul.f32 %v2457_v38, %v2418_v62 }
0x139d   :  { %v2461_v54 = vmul.f32 0.5, %v2460_v41 }
0x139e   :  { %v2475_v39 = vmul.f32 %v3052_v26, %v2469_v51 }
0x139f   :  { %v2462_v55 = vsub.f32 1.5, %v2461_v54 }
0x13a0   :  { %v2481_v48 = vadd.f32 %v3053_v33, %v2475_v39 }
0x13a1   :  { %v2463_v31 = vmul.f32 %v3211_v44, %v2462_v55 }
0x13a2   :  { %2484 = vst.msk [vmem:[%s4343_s23 + $0x8] sm:$0xff] %vm245_vm1, %v2481_v48 }
0x13a3   :  { %v2467_v40 = vsel %vm2466_vm9, %v3211_v44, %v2463_v31 }
0x13a4   :  { %v2470_v21 = vmul.f32 %v2467_v40, %v2419_v12 }
0x13a6   :  { %v2476_v9 = vmul.f32 %v3052_v26, %v2470_v21 }
0x13a8   :  { %v2482_v57 = vadd.f32 %v3053_v33, %v2476_v9 }
0x13aa   :  { %2485 = vst.msk [vmem:[%s4343_s23 + $0x10] sm:$0x3] %vm252_vm2, %v2482_v57 }

</bundles_post_ra>
